<compile_context>
chip_gen: v7x
topology: tpu7x:2x2x1
jax: 0.10.0
libtpu: 0.0.40
codegen_flags: <defaults>
</compile_context>

<pallas_src>
import jax
import jax.numpy as jnp
from jax.experimental import pallas as pl
from jax.experimental.pallas import tpu as pltpu


def _pick_rows_per_block(bh, w, c, qk):
    """Rows of the (b*h) axis handled per grid step.

    Sized against VMEM (the two (w, w) score tensors dominate for large w) and
    kept to >= 2 grid steps when possible so the "parallel" axis can be sharded
    across both TensorCores on v7x.  Sweep for large shapes; v7x VMEM is 64 MiB.
    """
    per_row_bytes = 4 * (2 * w * w + 2 * w * qk + 3 * w * c + c * w)
    budget = 4 * 1024 * 1024  # stay well under the default scoped-VMEM limit
    r = min(bh, max(8, budget // max(per_row_bytes, 1)), 256)
    if r >= bh and bh > 8:
        r = (bh + 1) // 2
    r = max(8, (r // 8) * 8)  # sublane-aligned
    return r


def _make_row_attention_kernel(R, W, C, QK):
    def kernel(x_ref, wq_ref, bq_ref, wk_ref, bk_ref, wv_ref, bvr_ref, bvc_ref, o_ref):
        # x_ref: (R*W, C) -- R image rows of W pixels each, channels last.
        x2d = x_ref[...]

        # 1x1 convolutions == one big per-pixel matmul per projection (MXU).
        # (the reshape below only splits the leading/sublane dims; W is a
        #  multiple of 8 at the test shape which keeps the layout trivial)
        q = (jnp.dot(x2d, wq_ref[...], preferred_element_type=jnp.float32)
             + bq_ref[...]).reshape(R, W, QK)
        k = (jnp.dot(x2d, wk_ref[...], preferred_element_type=jnp.float32)
             + bk_ref[...]).reshape(R, W, QK)
        v = (jnp.dot(x2d, wv_ref[...], preferred_element_type=jnp.float32)
             + bvr_ref[...]).reshape(R, W, C)          # (row, pixel, channel)

        # Channel-major V (PyTorch's per-row (c, w) view) computed directly via a
        # batched NT matmul, so branch 1 lands in the final row layout without any
        # in-kernel transpose of the result.
        x3d = x2d.reshape(R, W, C)
        wv_oc = wv_ref[...].T                          # (C_out, C_in)
        vt = jnp.einsum('roc,ric->roi',
                        jnp.broadcast_to(wv_oc, (R, C, C)), x3d,
                        preferred_element_type=jnp.float32) + bvc_ref[...]   # (R, C, W)

        # ---- branch 1: attn = softmax(Q K^T, axis=-1); out1 = V @ attn^T ----
        s1 = jnp.einsum('rid,rjd->rij', q, k, preferred_element_type=jnp.float32)
        s1 = s1 - jnp.max(s1, axis=-1, keepdims=True)
        e1 = jnp.exp(s1)
        a1 = e1 * pl.reciprocal(jnp.sum(e1, axis=-1, keepdims=True), approx=False)
        o1 = jnp.einsum('rcj,rij->rci', vt, a1,
                        preferred_element_type=jnp.float32)                  # (R, C, W)

        # ---- branch 2: attn2 = softmax(Q V^T, axis=-1); out2 = attn2^T @ Q ----
        # Kept in transposed (m, i) orientation so both matmuls stay NT / NN and
        # the softmax reductions run along the sublane axis.
        s2t = jnp.einsum('rmd,rid->rmi', v, q, preferred_element_type=jnp.float32)
        s2t = s2t - jnp.max(s2t, axis=1, keepdims=True)
        e2t = jnp.exp(s2t)
        a2t = e2t * pl.reciprocal(jnp.sum(e2t, axis=1, keepdims=True), approx=False)
        o2 = jnp.einsum('rmi,rid->rmd', a2t, q,
                        preferred_element_type=jnp.float32)                  # (R, W, QK)

        # ---- fuse both branches into one lane-dense row of length C*W ----
        # fused[r, ch*W + ww] = out1[r, ch, ww] + raw_view(out2[r])[ch, ww]
        # where raw_view is PyTorch's contiguous .view of (W, QK) as (C, W) (QK == C).
        # Built from static slices + lane concatenation (no minor-dim reshapes).
        b1 = jnp.concatenate([o1[:, ch:ch + 1, :] for ch in range(C)], axis=-1)  # (R,1,C*W)
        b2 = jnp.concatenate([o2[:, m:m + 1, :] for m in range(W)], axis=-1)     # (R,1,W*QK)
        o_ref[...] = b1 + b2

    return kernel


def row_attention_pallas(x_nchw, wq, bq, wk, bk, wv, bv, *, rows_per_block=None):
    b, c, h, w = x_nchw.shape
    qk = wq.shape[0]
    assert qk == c, "RowAttention requires q_k_dim == in_dim (forward does bmm(Q, V) and out + out2)"
    bh = b * h

    R = rows_per_block if rows_per_block is not None else _pick_rows_per_block(bh, w, c, qk)
    num_blocks = -(-bh // R)
    bh_pad = num_blocks * R

    # NCHW -> rows of pixels, channels last, flattened to 2-D (b*h*w, c).
    x_rows = jnp.transpose(x_nchw, (0, 2, 3, 1)).reshape(bh * w, c).astype(jnp.float32)
    if bh_pad != bh:
        x_rows = jnp.pad(x_rows, ((0, (bh_pad - bh) * w), (0, 0)))

    wq_t = jnp.asarray(wq, jnp.float32).T            # (c, qk)
    bq_r = jnp.asarray(bq, jnp.float32).reshape(1, qk)
    wk_t = jnp.asarray(wk, jnp.float32).T
    bk_r = jnp.asarray(bk, jnp.float32).reshape(1, qk)
    wv_t = jnp.asarray(wv, jnp.float32).T            # (c, c)
    bv_r = jnp.asarray(bv, jnp.float32).reshape(1, c)
    bv_c = jnp.asarray(bv, jnp.float32).reshape(c, 1)

    kernel = _make_row_attention_kernel(R, w, c, qk)

    def const_spec(shape):
        return pl.BlockSpec(shape, lambda i, _n=len(shape): (0,) * _n)

    fused = pl.pallas_call(
        kernel,
        out_shape=jax.ShapeDtypeStruct((bh_pad, 1, c * w), jnp.float32),
        grid_spec=pltpu.PrefetchScalarGridSpec(
            num_scalar_prefetch=0,
            grid=(num_blocks,),
            in_specs=[
                pl.BlockSpec((R * w, c), lambda i: (i, 0)),
                const_spec((c, qk)), const_spec((1, qk)),
                const_spec((c, qk)), const_spec((1, qk)),
                const_spec((c, c)), const_spec((1, c)), const_spec((c, 1)),
            ],
            out_specs=pl.BlockSpec((R, 1, c * w), lambda i: (i, 0, 0)),
        ),
        compiler_params=pltpu.CompilerParams(dimension_semantics=("parallel",)),
    )(x_rows, wq_t, bq_r, wk_t, bk_r, wv_t, bv_r, bv_c)

    fused = fused[:bh, 0, :]                 # drop padded rows / unit dim
    out = fused.reshape(b, h, c, w)          # row r already holds the final (c, w) slab
    return jnp.transpose(out, (0, 2, 1, 3))  # -> (b, c, h, w)


# ---------------- pure-JAX reference (mirrors the PyTorch forward exactly) ----------------
def _conv1x1(x, W, bias):
    return jnp.einsum('bchw,oc->bohw', x, W) + bias[None, :, None, None]


def row_attention_ref(x, wq, bq, wk, bk, wv, bv):
    b, c, h, w = x.shape
    qk = wq.shape[0]
    Q = _conv1x1(x, wq, bq)
    K = _conv1x1(x, wk, bk)
    V = _conv1x1(x, wv, bv)
    Qr = jnp.transpose(jnp.transpose(Q, (0, 2, 1, 3)).reshape(b * h, qk, w), (0, 2, 1))
    Kr = jnp.transpose(K, (0, 2, 1, 3)).reshape(b * h, qk, w)
    Vr = jnp.transpose(V, (0, 2, 1, 3)).reshape(b * h, c, w)
    attn = jax.nn.softmax(jnp.einsum('bik,bkj->bij', Qr, Kr), axis=2)
    out = jnp.einsum('bcj,bij->bci', Vr, attn)
    out = jnp.transpose(out.reshape(b, h, c, w), (0, 2, 1, 3))
    attn2 = jax.nn.softmax(jnp.einsum('bik,bkj->bij', Qr, Vr), axis=2)
    out2 = jnp.einsum('bij,bik->bjk', attn2, Qr)
    out2 = jnp.transpose(out2.reshape(b, h, qk, w), (0, 2, 1, 3))
    return out + out2


if __name__ == "__main__":
    b, in_dim, h, w = 2, 8, 16, 16
    q_k_dim = 8  # must equal in_dim (module constraint)

    key = jax.random.PRNGKey(0)
    kx, kq, kbq, kk, kbk, kv, kbv = jax.random.split(key, 7)
    bound = 1.0 / (in_dim ** 0.5)   # PyTorch Conv2d default init bound (fan_in = in_dim)

    x = jax.random.normal(kx, (b, in_dim, h, w), dtype=jnp.float32)
    wq = jax.random.uniform(kq, (q_k_dim, in_dim), jnp.float32, -bound, bound)
    bq = jax.random.uniform(kbq, (q_k_dim,), jnp.float32, -bound, bound)
    wk = jax.random.uniform(kk, (q_k_dim, in_dim), jnp.float32, -bound, bound)
    bk = jax.random.uniform(kbk, (q_k_dim,), jnp.float32, -bound, bound)
    wv = jax.random.uniform(kv, (in_dim, in_dim), jnp.float32, -bound, bound)
    bv = jax.random.uniform(kbv, (in_dim,), jnp.float32, -bound, bound)

    fwd = jax.jit(row_attention_pallas)
    out = jax.block_until_ready(fwd(x, wq, bq, wk, bk, wv, bv))
    ref = row_attention_ref(x, wq, bq, wk, bk, wv, bv)

    assert out.shape == (b, in_dim, h, w), out.shape
    max_err = float(jnp.max(jnp.abs(out - ref)))
    assert jnp.allclose(out, ref, rtol=1e-4, atol=1e-4), f"max abs err = {max_err}"
    print("KERNEL_OK")
</pallas_src>

<mosaic_0001>
module attributes {stable_mosaic.version = 11 : i64} {
  func.func @kernel(%arg0: i32, %arg1: memref<256x8xf32, #tpu.memory_space<vmem>>, %arg2: memref<8x8xf32, #tpu.memory_space<vmem>>, %arg3: memref<1x8xf32, #tpu.memory_space<vmem>>, %arg4: memref<8x8xf32, #tpu.memory_space<vmem>>, %arg5: memref<1x8xf32, #tpu.memory_space<vmem>>, %arg6: memref<8x8xf32, #tpu.memory_space<vmem>>, %arg7: memref<1x8xf32, #tpu.memory_space<vmem>>, %arg8: memref<8x1xf32, #tpu.memory_space<vmem>>, %arg9: memref<16x1x128xf32, #tpu.memory_space<vmem>>) attributes {dimension_semantics = [#tpu.dimension_semantics<parallel>], iteration_bounds = array<i64: 2>, scalar_prefetch = 0 : i64, scratch_operands = 0 : i64, tpu.core_type = #tpu.core_type<tc>, window_params = [{transform_indices = @transform_0, window_bounds = array<i64: 256, 8>}, {pipeline_mode = #tpu.pipeline_mode<synchronous>, transform_indices = @transform_1, window_bounds = array<i64: 8, 8>}, {pipeline_mode = #tpu.pipeline_mode<synchronous>, transform_indices = @transform_2, window_bounds = array<i64: 1, 8>}, {pipeline_mode = #tpu.pipeline_mode<synchronous>, transform_indices = @transform_3, window_bounds = array<i64: 8, 8>}, {pipeline_mode = #tpu.pipeline_mode<synchronous>, transform_indices = @transform_4, window_bounds = array<i64: 1, 8>}, {pipeline_mode = #tpu.pipeline_mode<synchronous>, transform_indices = @transform_5, window_bounds = array<i64: 8, 8>}, {pipeline_mode = #tpu.pipeline_mode<synchronous>, transform_indices = @transform_6, window_bounds = array<i64: 1, 8>}, {pipeline_mode = #tpu.pipeline_mode<synchronous>, transform_indices = @transform_7, window_bounds = array<i64: 8, 1>}, {transform_indices = @transform_8, window_bounds = array<i64: 16, 1, 128>}]} {
    %c0 = arith.constant 0 : index
    %c0_0 = arith.constant 0 : index
    %0 = vector.load %arg1[%c0, %c0_0] : memref<256x8xf32, #tpu.memory_space<vmem>>, vector<256x8xf32>
    %c0_1 = arith.constant 0 : index
    %c0_2 = arith.constant 0 : index
    %1 = vector.load %arg2[%c0_1, %c0_2] : memref<8x8xf32, #tpu.memory_space<vmem>>, vector<8x8xf32>
    %cst = arith.constant dense<0.000000e+00> : vector<256x8xf32>
    %2 = tpu.matmul %0, %1, %cst {dimension_numbers = #tpu.dot_dimension_numbers<[1], [0], [0], [1], [0, 0, 1, 1], [], []>} : vector<256x8xf32>, vector<8x8xf32>, vector<256x8xf32> -> vector<256x8xf32>
    %c0_3 = arith.constant 0 : index
    %c0_4 = arith.constant 0 : index
    %3 = vector.load %arg3[%c0_3, %c0_4] : memref<1x8xf32, #tpu.memory_space<vmem>>, vector<1x8xf32>
    %4 = vector.broadcast %3 : vector<1x8xf32> to vector<256x8xf32>
    %5 = arith.addf %2, %4 : vector<256x8xf32>
    %6 = vector.shape_cast %5 : vector<256x8xf32> to vector<16x16x8xf32>
    %c0_5 = arith.constant 0 : index
    %c0_6 = arith.constant 0 : index
    %7 = vector.load %arg4[%c0_5, %c0_6] : memref<8x8xf32, #tpu.memory_space<vmem>>, vector<8x8xf32>
    %cst_7 = arith.constant dense<0.000000e+00> : vector<256x8xf32>
    %8 = tpu.matmul %0, %7, %cst_7 {dimension_numbers = #tpu.dot_dimension_numbers<[1], [0], [0], [1], [0, 0, 1, 1], [], []>} : vector<256x8xf32>, vector<8x8xf32>, vector<256x8xf32> -> vector<256x8xf32>
    %c0_8 = arith.constant 0 : index
    %c0_9 = arith.constant 0 : index
    %9 = vector.load %arg5[%c0_8, %c0_9] : memref<1x8xf32, #tpu.memory_space<vmem>>, vector<1x8xf32>
    %10 = vector.broadcast %9 : vector<1x8xf32> to vector<256x8xf32>
    %11 = arith.addf %8, %10 : vector<256x8xf32>
    %12 = vector.shape_cast %11 : vector<256x8xf32> to vector<16x16x8xf32>
    %c0_10 = arith.constant 0 : index
    %c0_11 = arith.constant 0 : index
    %13 = vector.load %arg6[%c0_10, %c0_11] : memref<8x8xf32, #tpu.memory_space<vmem>>, vector<8x8xf32>
    %cst_12 = arith.constant dense<0.000000e+00> : vector<256x8xf32>
    %14 = tpu.matmul %0, %13, %cst_12 {dimension_numbers = #tpu.dot_dimension_numbers<[1], [0], [0], [1], [0, 0, 1, 1], [], []>} : vector<256x8xf32>, vector<8x8xf32>, vector<256x8xf32> -> vector<256x8xf32>
    %c0_13 = arith.constant 0 : index
    %c0_14 = arith.constant 0 : index
    %15 = vector.load %arg7[%c0_13, %c0_14] : memref<1x8xf32, #tpu.memory_space<vmem>>, vector<1x8xf32>
    %16 = vector.broadcast %15 : vector<1x8xf32> to vector<256x8xf32>
    %17 = arith.addf %14, %16 : vector<256x8xf32>
    %18 = vector.shape_cast %17 : vector<256x8xf32> to vector<16x16x8xf32>
    %19 = vector.shape_cast %0 : vector<256x8xf32> to vector<16x16x8xf32>
    %c0_15 = arith.constant 0 : index
    %c0_16 = arith.constant 0 : index
    %20 = vector.load %arg6[%c0_15, %c0_16] : memref<8x8xf32, #tpu.memory_space<vmem>>, vector<8x8xf32>
    %21 = tpu.transpose %20, [1, 0] : vector<8x8xf32> -> vector<8x8xf32>
    %22 = vector.shape_cast %21 : vector<8x8xf32> to vector<1x8x8xf32>
    %23 = vector.broadcast %22 : vector<1x8x8xf32> to vector<16x8x8xf32>
    "tpu.trace_start"() <{level = 10 : i32, message = "roc,ric->roi"}> : () -> ()
    %cst_17 = arith.constant dense<0.000000e+00> : vector<16x8x16xf32>
    %24 = tpu.matmul %23, %19, %cst_17 {dimension_numbers = #tpu.dot_dimension_numbers<[2], [2], [1], [1], [0, 0, 0, 1, 1, 1], [0], [0]>} : vector<16x8x8xf32>, vector<16x16x8xf32>, vector<16x8x16xf32> -> vector<16x8x16xf32>
    "tpu.trace_stop"() : () -> ()
    %c0_18 = arith.constant 0 : index
    %c0_19 = arith.constant 0 : index
    %25 = vector.load %arg8[%c0_18, %c0_19] : memref<8x1xf32, #tpu.memory_space<vmem>>, vector<8x1xf32>
    %26 = vector.shape_cast %25 : vector<8x1xf32> to vector<1x8x1xf32>
    %27 = vector.broadcast %26 : vector<1x8x1xf32> to vector<16x8x16xf32>
    %28 = arith.addf %24, %27 : vector<16x8x16xf32>
    "tpu.trace_start"() <{level = 10 : i32, message = "rid,rjd->rij"}> : () -> ()
    %cst_20 = arith.constant dense<0.000000e+00> : vector<16x16x16xf32>
    %29 = tpu.matmul %6, %12, %cst_20 {dimension_numbers = #tpu.dot_dimension_numbers<[2], [2], [1], [1], [0, 0, 0, 1, 1, 1], [0], [0]>} : vector<16x16x8xf32>, vector<16x16x8xf32>, vector<16x16x16xf32> -> vector<16x16x16xf32>
    "tpu.trace_stop"() : () -> ()
    %cst_21 = arith.constant dense<0xFF800000> : vector<16x16xf32>
    %30 = vector.multi_reduction <maximumf>, %29, %cst_21 [2] : vector<16x16x16xf32> to vector<16x16xf32>
    %31 = vector.shape_cast %30 : vector<16x16xf32> to vector<16x16x1xf32>
    %32 = vector.broadcast %31 : vector<16x16x1xf32> to vector<16x16x16xf32>
    %33 = arith.subf %29, %32 : vector<16x16x16xf32>
    %34 = math.exp %33 : vector<16x16x16xf32>
    %cst_22 = arith.constant dense<0.000000e+00> : vector<16x16xf32>
    %35 = vector.multi_reduction <add>, %34, %cst_22 [2] : vector<16x16x16xf32> to vector<16x16xf32>
    %36 = vector.shape_cast %35 : vector<16x16xf32> to vector<16x16x1xf32>
    %37 = tpu.reciprocal %36 : vector<16x16x1xf32> -> vector<16x16x1xf32>
    %38 = vector.broadcast %37 : vector<16x16x1xf32> to vector<16x16x16xf32>
    %39 = arith.mulf %34, %38 : vector<16x16x16xf32>
    "tpu.trace_start"() <{level = 10 : i32, message = "rcj,rij->rci"}> : () -> ()
    %cst_23 = arith.constant dense<0.000000e+00> : vector<16x8x16xf32>
    %40 = tpu.matmul %28, %39, %cst_23 {dimension_numbers = #tpu.dot_dimension_numbers<[2], [2], [1], [1], [0, 0, 0, 1, 1, 1], [0], [0]>} : vector<16x8x16xf32>, vector<16x16x16xf32>, vector<16x8x16xf32> -> vector<16x8x16xf32>
    "tpu.trace_stop"() : () -> ()
    "tpu.trace_start"() <{level = 10 : i32, message = "rmd,rid->rmi"}> : () -> ()
    %cst_24 = arith.constant dense<0.000000e+00> : vector<16x16x16xf32>
    %41 = tpu.matmul %18, %6, %cst_24 {dimension_numbers = #tpu.dot_dimension_numbers<[2], [2], [1], [1], [0, 0, 0, 1, 1, 1], [0], [0]>} : vector<16x16x8xf32>, vector<16x16x8xf32>, vector<16x16x16xf32> -> vector<16x16x16xf32>
    "tpu.trace_stop"() : () -> ()
    %cst_25 = arith.constant dense<0xFF800000> : vector<16x16xf32>
    %42 = vector.multi_reduction <maximumf>, %41, %cst_25 [1] : vector<16x16x16xf32> to vector<16x16xf32>
    %43 = vector.shape_cast %42 : vector<16x16xf32> to vector<16x1x16xf32>
    %44 = vector.broadcast %43 : vector<16x1x16xf32> to vector<16x16x16xf32>
    %45 = arith.subf %41, %44 : vector<16x16x16xf32>
    %46 = math.exp %45 : vector<16x16x16xf32>
    %cst_26 = arith.constant dense<0.000000e+00> : vector<16x16xf32>
    %47 = vector.multi_reduction <add>, %46, %cst_26 [1] : vector<16x16x16xf32> to vector<16x16xf32>
    %48 = vector.shape_cast %47 : vector<16x16xf32> to vector<16x1x16xf32>
    %49 = tpu.reciprocal %48 : vector<16x1x16xf32> -> vector<16x1x16xf32>
    %50 = vector.broadcast %49 : vector<16x1x16xf32> to vector<16x16x16xf32>
    %51 = arith.mulf %46, %50 : vector<16x16x16xf32>
    "tpu.trace_start"() <{level = 10 : i32, message = "rmi,rid->rmd"}> : () -> ()
    %cst_27 = arith.constant dense<0.000000e+00> : vector<16x16x8xf32>
    %52 = tpu.matmul %51, %6, %cst_27 {dimension_numbers = #tpu.dot_dimension_numbers<[2], [1], [1], [2], [0, 0, 0, 1, 1, 2], [0], [0]>} : vector<16x16x16xf32>, vector<16x16x8xf32>, vector<16x16x8xf32> -> vector<16x16x8xf32>
    "tpu.trace_stop"() : () -> ()
    %53 = vector.extract_strided_slice %40 {offsets = [0, 0, 0], sizes = [16, 1, 16], strides = [1, 1, 1]} : vector<16x8x16xf32> to vector<16x1x16xf32>
    %54 = vector.extract_strided_slice %40 {offsets = [0, 1, 0], sizes = [16, 1, 16], strides = [1, 1, 1]} : vector<16x8x16xf32> to vector<16x1x16xf32>
    %55 = vector.extract_strided_slice %40 {offsets = [0, 2, 0], sizes = [16, 1, 16], strides = [1, 1, 1]} : vector<16x8x16xf32> to vector<16x1x16xf32>
    %56 = vector.extract_strided_slice %40 {offsets = [0, 3, 0], sizes = [16, 1, 16], strides = [1, 1, 1]} : vector<16x8x16xf32> to vector<16x1x16xf32>
    %57 = vector.extract_strided_slice %40 {offsets = [0, 4, 0], sizes = [16, 1, 16], strides = [1, 1, 1]} : vector<16x8x16xf32> to vector<16x1x16xf32>
    %58 = vector.extract_strided_slice %40 {offsets = [0, 5, 0], sizes = [16, 1, 16], strides = [1, 1, 1]} : vector<16x8x16xf32> to vector<16x1x16xf32>
    %59 = vector.extract_strided_slice %40 {offsets = [0, 6, 0], sizes = [16, 1, 16], strides = [1, 1, 1]} : vector<16x8x16xf32> to vector<16x1x16xf32>
    %60 = vector.extract_strided_slice %40 {offsets = [0, 7, 0], sizes = [16, 1, 16], strides = [1, 1, 1]} : vector<16x8x16xf32> to vector<16x1x16xf32>
    %61 = tpu.concatenate %53, %54, %55, %56, %57, %58, %59, %60 in 2 : vector<16x1x16xf32>, vector<16x1x16xf32>, vector<16x1x16xf32>, vector<16x1x16xf32>, vector<16x1x16xf32>, vector<16x1x16xf32>, vector<16x1x16xf32>, vector<16x1x16xf32> -> vector<16x1x128xf32>
    %62 = vector.extract_strided_slice %52 {offsets = [0, 0, 0], sizes = [16, 1, 8], strides = [1, 1, 1]} : vector<16x16x8xf32> to vector<16x1x8xf32>
    %63 = vector.extract_strided_slice %52 {offsets = [0, 1, 0], sizes = [16, 1, 8], strides = [1, 1, 1]} : vector<16x16x8xf32> to vector<16x1x8xf32>
    %64 = vector.extract_strided_slice %52 {offsets = [0, 2, 0], sizes = [16, 1, 8], strides = [1, 1, 1]} : vector<16x16x8xf32> to vector<16x1x8xf32>
    %65 = vector.extract_strided_slice %52 {offsets = [0, 3, 0], sizes = [16, 1, 8], strides = [1, 1, 1]} : vector<16x16x8xf32> to vector<16x1x8xf32>
    %66 = vector.extract_strided_slice %52 {offsets = [0, 4, 0], sizes = [16, 1, 8], strides = [1, 1, 1]} : vector<16x16x8xf32> to vector<16x1x8xf32>
    %67 = vector.extract_strided_slice %52 {offsets = [0, 5, 0], sizes = [16, 1, 8], strides = [1, 1, 1]} : vector<16x16x8xf32> to vector<16x1x8xf32>
    %68 = vector.extract_strided_slice %52 {offsets = [0, 6, 0], sizes = [16, 1, 8], strides = [1, 1, 1]} : vector<16x16x8xf32> to vector<16x1x8xf32>
    %69 = vector.extract_strided_slice %52 {offsets = [0, 7, 0], sizes = [16, 1, 8], strides = [1, 1, 1]} : vector<16x16x8xf32> to vector<16x1x8xf32>
    %70 = vector.extract_strided_slice %52 {offsets = [0, 8, 0], sizes = [16, 1, 8], strides = [1, 1, 1]} : vector<16x16x8xf32> to vector<16x1x8xf32>
    %71 = vector.extract_strided_slice %52 {offsets = [0, 9, 0], sizes = [16, 1, 8], strides = [1, 1, 1]} : vector<16x16x8xf32> to vector<16x1x8xf32>
    %72 = vector.extract_strided_slice %52 {offsets = [0, 10, 0], sizes = [16, 1, 8], strides = [1, 1, 1]} : vector<16x16x8xf32> to vector<16x1x8xf32>
    %73 = vector.extract_strided_slice %52 {offsets = [0, 11, 0], sizes = [16, 1, 8], strides = [1, 1, 1]} : vector<16x16x8xf32> to vector<16x1x8xf32>
    %74 = vector.extract_strided_slice %52 {offsets = [0, 12, 0], sizes = [16, 1, 8], strides = [1, 1, 1]} : vector<16x16x8xf32> to vector<16x1x8xf32>
    %75 = vector.extract_strided_slice %52 {offsets = [0, 13, 0], sizes = [16, 1, 8], strides = [1, 1, 1]} : vector<16x16x8xf32> to vector<16x1x8xf32>
    %76 = vector.extract_strided_slice %52 {offsets = [0, 14, 0], sizes = [16, 1, 8], strides = [1, 1, 1]} : vector<16x16x8xf32> to vector<16x1x8xf32>
    %77 = vector.extract_strided_slice %52 {offsets = [0, 15, 0], sizes = [16, 1, 8], strides = [1, 1, 1]} : vector<16x16x8xf32> to vector<16x1x8xf32>
    %78 = tpu.concatenate %62, %63, %64, %65, %66, %67, %68, %69, %70, %71, %72, %73, %74, %75, %76, %77 in 2 : vector<16x1x8xf32>, vector<16x1x8xf32>, vector<16x1x8xf32>, vector<16x1x8xf32>, vector<16x1x8xf32>, vector<16x1x8xf32>, vector<16x1x8xf32>, vector<16x1x8xf32>, vector<16x1x8xf32>, vector<16x1x8xf32>, vector<16x1x8xf32>, vector<16x1x8xf32>, vector<16x1x8xf32>, vector<16x1x8xf32>, vector<16x1x8xf32>, vector<16x1x8xf32> -> vector<16x1x128xf32>
    %79 = arith.addf %61, %78 : vector<16x1x128xf32>
    %c0_28 = arith.constant 0 : index
    %c0_29 = arith.constant 0 : index
    %c0_30 = arith.constant 0 : index
    %80 = vector.load %arg9[%c0_28, %c0_29, %c0_30] : memref<16x1x128xf32, #tpu.memory_space<vmem>>, vector<16x1x128xf32>
    tpu.vector_store %arg9[%c0_28, %c0_29, %c0_30], %79 {strides = array<i32>} : memref<16x1x128xf32, #tpu.memory_space<vmem>>, vector<16x1x128xf32>,
    return
  }
  func.func @transform_0(%arg0: i32) -> (i32, i32) {
    %c0_i32 = arith.constant 0 : i32
    %c0_i32_0 = arith.constant 0 : i32
    return %arg0, %c0_i32 : i32, i32
  }
  func.func @transform_1(%arg0: i32) -> (i32, i32) {
    %c0_i32 = arith.constant 0 : i32
    %c0_i32_0 = arith.constant 0 : i32
    %c0_i32_1 = arith.constant 0 : i32
    return %c0_i32, %c0_i32_0 : i32, i32
  }
  func.func @transform_2(%arg0: i32) -> (i32, i32) {
    %c0_i32 = arith.constant 0 : i32
    %c0_i32_0 = arith.constant 0 : i32
    %c0_i32_1 = arith.constant 0 : i32
    return %c0_i32, %c0_i32_0 : i32, i32
  }
  func.func @transform_3(%arg0: i32) -> (i32, i32) {
    %c0_i32 = arith.constant 0 : i32
    %c0_i32_0 = arith.constant 0 : i32
    %c0_i32_1 = arith.constant 0 : i32
    return %c0_i32, %c0_i32_0 : i32, i32
  }
  func.func @transform_4(%arg0: i32) -> (i32, i32) {
    %c0_i32 = arith.constant 0 : i32
    %c0_i32_0 = arith.constant 0 : i32
    %c0_i32_1 = arith.constant 0 : i32
    return %c0_i32, %c0_i32_0 : i32, i32
  }
  func.func @transform_5(%arg0: i32) -> (i32, i32) {
    %c0_i32 = arith.constant 0 : i32
    %c0_i32_0 = arith.constant 0 : i32
    %c0_i32_1 = arith.constant 0 : i32
    return %c0_i32, %c0_i32_0 : i32, i32
  }
  func.func @transform_6(%arg0: i32) -> (i32, i32) {
    %c0_i32 = arith.constant 0 : i32
    %c0_i32_0 = arith.constant 0 : i32
    %c0_i32_1 = arith.constant 0 : i32
    return %c0_i32, %c0_i32_0 : i32, i32
  }
  func.func @transform_7(%arg0: i32) -> (i32, i32) {
    %c0_i32 = arith.constant 0 : i32
    %c0_i32_0 = arith.constant 0 : i32
    %c0_i32_1 = arith.constant 0 : i32
    return %c0_i32, %c0_i32_0 : i32, i32
  }
  func.func @transform_8(%arg0: i32) -> (i32, i32, i32) {
    %c0_i32 = arith.constant 0 : i32
    %c0_i32_0 = arith.constant 0 : i32
    %c0_i32_1 = arith.constant 0 : i32
    return %arg0, %c0_i32, %c0_i32_0 : i32, i32, i32
  }
}

</mosaic_0001>

<bundles_post_ra>
// kernel: squeeze.1
= control target key start
LH: loop header
LB: loop body
LE: loop exit
PB: predicated region body
PF: predicated region fallthrough
CT: control target
= control target key end

     0   :  { %vm3_vm0 = vcmask 130048   ;;  %s365_s12 = smov 112   ;;  %s366_s30 = smov 96   ;;  %s650_s0 = inlined_call_operand.vmem [shape: f32[32,128], index: 0, kind: input, shape index: {}]   ;;  %s651_s1 = inlined_call_operand.vmem [shape: f32[2,16,8,16], index: 1, kind: output, shape index: {}]  }
   0x1   :  { %v286_v0 = vld [vmem:[%s650_s0 + $0x10] sm:$0xff]   ;;  %v27_v1 = vld [vmem:[%s650_s0] sm:$0xff]   ;;  %v289_v2 = vld [vmem:[%s650_s0 + $0x18] sm:$0xff]   ;;  %s367_s2 = smov 80   ;;  %s368_s3 = smov 64  }
   0x2   :  { %46 = vrot.lane.b32.xlu1 %v286_v0, %s365_s12  ;;  %28 = vrot.lane.b32.xlu0 %v27_v1, %s365_s12  ;;  %v283_v3 = vld [vmem:[%s650_s0 + $0x8] sm:$0xff]   ;;  %4 = vst.msk [vmem:[%s651_s1] ss:$8 sm:$0xf] %vm3_vm0, %v27_v1   ;;  %s369_s4 = smov 48   ;;  %s370_s5 = smov 32  }
   0x3   :  { %5 = vst.msk [vmem:[%s651_s1] ss:$8 sm:$0xf0] %vm3_vm0, %v27_v1   ;;  %276 = vst.msk [vmem:[%s651_s1 + $0x80] ss:$8 sm:$0xf] %vm3_vm0, %v286_v0  }
   0x4   :  { %277 = vst.msk [vmem:[%s651_s1 + $0x80] ss:$8 sm:$0xf0] %vm3_vm0, %v286_v0   ;;  %279 = vst.msk [vmem:[%s651_s1 + $0xc0] ss:$8 sm:$0xf] %vm3_vm0, %v289_v2  }
   0x5   :  { %280 = vst.msk [vmem:[%s651_s1 + $0xc0] ss:$8 sm:$0xf0] %vm3_vm0, %v289_v2   ;;  %273 = vst.msk [vmem:[%s651_s1 + $0x40] ss:$8 sm:$0xf] %vm3_vm0, %v283_v3  }
   0x6   :  { %274 = vst.msk [vmem:[%s651_s1 + $0x40] ss:$8 sm:$0xf0] %vm3_vm0, %v283_v3   ;;  %55 = vrot.lane.b32.xlu1 %v289_v2, %s365_s12  ;;  %37 = vrot.lane.b32.xlu0 %v283_v3, %s365_s12  ;;  %s371_s6 = smov 16  }
   0xa   :  { %72 = vrot.lane.b32.xlu1 %v283_v3, %s366_s30  ;;  %63 = vrot.lane.b32.xlu0 %v27_v1, %s366_s30 }
   0xe   :  { %90 = vrot.lane.b32.xlu1 %v289_v2, %s366_s30  ;;  %81 = vrot.lane.b32.xlu0 %v286_v0, %s366_s30 }
  0x12   :  { %107 = vrot.lane.b32.xlu1 %v283_v3, %s367_s2  ;;  %98 = vrot.lane.b32.xlu0 %v27_v1, %s367_s2 }
  0x16   :  { %125 = vrot.lane.b32.xlu1 %v289_v2, %s367_s2  ;;  %116 = vrot.lane.b32.xlu0 %v286_v0, %s367_s2 }
  0x1a   :  { %142 = vrot.lane.b32.xlu1 %v283_v3, %s368_s3  ;;  %133 = vrot.lane.b32.xlu0 %v27_v1, %s368_s3 }
  0x1e   :  { %160 = vrot.lane.b32.xlu1 %v289_v2, %s368_s3  ;;  %151 = vrot.lane.b32.xlu0 %v286_v0, %s368_s3 }
  0x22   :  { %177 = vrot.lane.b32.xlu1 %v283_v3, %s369_s4  ;;  %168 = vrot.lane.b32.xlu0 %v27_v1, %s369_s4 }
  0x26   :  { %195 = vrot.lane.b32.xlu1 %v289_v2, %s369_s4  ;;  %186 = vrot.lane.b32.xlu0 %v286_v0, %s369_s4 }
  0x2a   :  { %212 = vrot.lane.b32.xlu1 %v283_v3, %s370_s5  ;;  %203 = vrot.lane.b32.xlu0 %v27_v1, %s370_s5 }
  0x2e   :  { %230 = vrot.lane.b32.xlu1 %v289_v2, %s370_s5  ;;  %221 = vrot.lane.b32.xlu0 %v286_v0, %s370_s5 }
  0x32   :  { %247 = vrot.lane.b32.xlu1 %v283_v3, %s371_s6  ;;  %238 = vrot.lane.b32.xlu0 %v27_v1, %s371_s6 }
  0x36   :  { %265 = vrot.lane.b32.xlu1 %v289_v2, %s371_s6  ;;  %256 = vrot.lane.b32.xlu0 %v286_v0, %s371_s6 }
  0x74   :  { %v47_v4 = vpop.permute.xlu1 %46   ;;  %v29_v5 = vpop.permute.xlu0 %28  }
  0x75   :  { %287 = vst.msk [vmem:[%s651_s1 + $0x81] ss:$8 sm:$0xf] %vm3_vm0, %v47_v4   ;;  %288 = vst.msk [vmem:[%s651_s1 + $0x81] ss:$8 sm:$0xf0] %vm3_vm0, %v47_v4  }
  0x76   :  { %281 = vst.msk [vmem:[%s651_s1 + $0x1] ss:$8 sm:$0xf] %vm3_vm0, %v29_v5   ;;  %282 = vst.msk [vmem:[%s651_s1 + $0x1] ss:$8 sm:$0xf0] %vm3_vm0, %v29_v5  }
  0x78   :  { %v56_v6 = vpop.permute.xlu1 %55   ;;  %v38_v7 = vpop.permute.xlu0 %37  }
  0x79   :  { %290 = vst.msk [vmem:[%s651_s1 + $0xc1] ss:$8 sm:$0xf] %vm3_vm0, %v56_v6   ;;  %291 = vst.msk [vmem:[%s651_s1 + $0xc1] ss:$8 sm:$0xf0] %vm3_vm0, %v56_v6  }
  0x7a   :  { %284 = vst.msk [vmem:[%s651_s1 + $0x41] ss:$8 sm:$0xf] %vm3_vm0, %v38_v7   ;;  %285 = vst.msk [vmem:[%s651_s1 + $0x41] ss:$8 sm:$0xf0] %vm3_vm0, %v38_v7  }
  0x7c   :  { %v73_v8 = vpop.permute.xlu1 %72   ;;  %v64_v9 = vpop.permute.xlu0 %63  }
  0x7d   :  { %295 = vst.msk [vmem:[%s651_s1 + $0x42] ss:$8 sm:$0xf] %vm3_vm0, %v73_v8   ;;  %296 = vst.msk [vmem:[%s651_s1 + $0x42] ss:$8 sm:$0xf0] %vm3_vm0, %v73_v8  }
  0x7e   :  { %292 = vst.msk [vmem:[%s651_s1 + $0x2] ss:$8 sm:$0xf] %vm3_vm0, %v64_v9   ;;  %293 = vst.msk [vmem:[%s651_s1 + $0x2] ss:$8 sm:$0xf0] %vm3_vm0, %v64_v9  }
  0x80   :  { %v91_v10 = vpop.permute.xlu1 %90   ;;  %v82_v11 = vpop.permute.xlu0 %81  }
  0x81   :  { %301 = vst.msk [vmem:[%s651_s1 + $0xc2] ss:$8 sm:$0xf] %vm3_vm0, %v91_v10   ;;  %302 = vst.msk [vmem:[%s651_s1 + $0xc2] ss:$8 sm:$0xf0] %vm3_vm0, %v91_v10  }
  0x82   :  { %298 = vst.msk [vmem:[%s651_s1 + $0x82] ss:$8 sm:$0xf] %vm3_vm0, %v82_v11   ;;  %299 = vst.msk [vmem:[%s651_s1 + $0x82] ss:$8 sm:$0xf0] %vm3_vm0, %v82_v11  }
  0x84   :  { %v108_v12 = vpop.permute.xlu1 %107   ;;  %v99_v13 = vpop.permute.xlu0 %98  }
  0x85   :  { %306 = vst.msk [vmem:[%s651_s1 + $0x43] ss:$8 sm:$0xf] %vm3_vm0, %v108_v12   ;;  %307 = vst.msk [vmem:[%s651_s1 + $0x43] ss:$8 sm:$0xf0] %vm3_vm0, %v108_v12  }
  0x86   :  { %303 = vst.msk [vmem:[%s651_s1 + $0x3] ss:$8 sm:$0xf] %vm3_vm0, %v99_v13   ;;  %304 = vst.msk [vmem:[%s651_s1 + $0x3] ss:$8 sm:$0xf0] %vm3_vm0, %v99_v13  }
  0x88   :  { %v126_v14 = vpop.permute.xlu1 %125   ;;  %v117_v15 = vpop.permute.xlu0 %116  }
  0x89   :  { %312 = vst.msk [vmem:[%s651_s1 + $0xc3] ss:$8 sm:$0xf] %vm3_vm0, %v126_v14   ;;  %313 = vst.msk [vmem:[%s651_s1 + $0xc3] ss:$8 sm:$0xf0] %vm3_vm0, %v126_v14  }
  0x8a   :  { %309 = vst.msk [vmem:[%s651_s1 + $0x83] ss:$8 sm:$0xf] %vm3_vm0, %v117_v15   ;;  %310 = vst.msk [vmem:[%s651_s1 + $0x83] ss:$8 sm:$0xf0] %vm3_vm0, %v117_v15  }
  0x8c   :  { %v143_v16 = vpop.permute.xlu1 %142   ;;  %v134_v17 = vpop.permute.xlu0 %133  }
  0x8d   :  { %317 = vst.msk [vmem:[%s651_s1 + $0x44] ss:$8 sm:$0xf] %vm3_vm0, %v143_v16   ;;  %318 = vst.msk [vmem:[%s651_s1 + $0x44] ss:$8 sm:$0xf0] %vm3_vm0, %v143_v16  }
  0x8e   :  { %314 = vst.msk [vmem:[%s651_s1 + $0x4] ss:$8 sm:$0xf] %vm3_vm0, %v134_v17   ;;  %315 = vst.msk [vmem:[%s651_s1 + $0x4] ss:$8 sm:$0xf0] %vm3_vm0, %v134_v17  }
  0x90   :  { %v161_v18 = vpop.permute.xlu1 %160   ;;  %v152_v19 = vpop.permute.xlu0 %151  }
  0x91   :  { %323 = vst.msk [vmem:[%s651_s1 + $0xc4] ss:$8 sm:$0xf] %vm3_vm0, %v161_v18   ;;  %324 = vst.msk [vmem:[%s651_s1 + $0xc4] ss:$8 sm:$0xf0] %vm3_vm0, %v161_v18  }
  0x92   :  { %320 = vst.msk [vmem:[%s651_s1 + $0x84] ss:$8 sm:$0xf] %vm3_vm0, %v152_v19   ;;  %321 = vst.msk [vmem:[%s651_s1 + $0x84] ss:$8 sm:$0xf0] %vm3_vm0, %v152_v19  }
  0x94   :  { %v178_v20 = vpop.permute.xlu1 %177   ;;  %v169_v21 = vpop.permute.xlu0 %168  }
  0x95   :  { %328 = vst.msk [vmem:[%s651_s1 + $0x45] ss:$8 sm:$0xf] %vm3_vm0, %v178_v20   ;;  %329 = vst.msk [vmem:[%s651_s1 + $0x45] ss:$8 sm:$0xf0] %vm3_vm0, %v178_v20  }
  0x96   :  { %325 = vst.msk [vmem:[%s651_s1 + $0x5] ss:$8 sm:$0xf] %vm3_vm0, %v169_v21   ;;  %326 = vst.msk [vmem:[%s651_s1 + $0x5] ss:$8 sm:$0xf0] %vm3_vm0, %v169_v21  }
  0x98   :  { %v196_v22 = vpop.permute.xlu1 %195   ;;  %v187_v23 = vpop.permute.xlu0 %186  }
  0x99   :  { %334 = vst.msk [vmem:[%s651_s1 + $0xc5] ss:$8 sm:$0xf] %vm3_vm0, %v196_v22   ;;  %335 = vst.msk [vmem:[%s651_s1 + $0xc5] ss:$8 sm:$0xf0] %vm3_vm0, %v196_v22  }
  0x9a   :  { %331 = vst.msk [vmem:[%s651_s1 + $0x85] ss:$8 sm:$0xf] %vm3_vm0, %v187_v23   ;;  %332 = vst.msk [vmem:[%s651_s1 + $0x85] ss:$8 sm:$0xf0] %vm3_vm0, %v187_v23  }
  0x9c   :  { %v213_v24 = vpop.permute.xlu1 %212   ;;  %v204_v25 = vpop.permute.xlu0 %203  }
  0x9d   :  { %339 = vst.msk [vmem:[%s651_s1 + $0x46] ss:$8 sm:$0xf] %vm3_vm0, %v213_v24   ;;  %340 = vst.msk [vmem:[%s651_s1 + $0x46] ss:$8 sm:$0xf0] %vm3_vm0, %v213_v24  }
  0x9e   :  { %336 = vst.msk [vmem:[%s651_s1 + $0x6] ss:$8 sm:$0xf] %vm3_vm0, %v204_v25   ;;  %337 = vst.msk [vmem:[%s651_s1 + $0x6] ss:$8 sm:$0xf0] %vm3_vm0, %v204_v25  }
  0xa0   :  { %v231_v26 = vpop.permute.xlu1 %230   ;;  %v222_v27 = vpop.permute.xlu0 %221  }
  0xa1   :  { %345 = vst.msk [vmem:[%s651_s1 + $0xc6] ss:$8 sm:$0xf] %vm3_vm0, %v231_v26   ;;  %346 = vst.msk [vmem:[%s651_s1 + $0xc6] ss:$8 sm:$0xf0] %vm3_vm0, %v231_v26  }
  0xa2   :  { %342 = vst.msk [vmem:[%s651_s1 + $0x86] ss:$8 sm:$0xf] %vm3_vm0, %v222_v27   ;;  %343 = vst.msk [vmem:[%s651_s1 + $0x86] ss:$8 sm:$0xf0] %vm3_vm0, %v222_v27  }
  0xa4   :  { %v248_v28 = vpop.permute.xlu1 %247   ;;  %v239_v29 = vpop.permute.xlu0 %238  }
  0xa5   :  { %350 = vst.msk [vmem:[%s651_s1 + $0x47] ss:$8 sm:$0xf] %vm3_vm0, %v248_v28   ;;  %351 = vst.msk [vmem:[%s651_s1 + $0x47] ss:$8 sm:$0xf0] %vm3_vm0, %v248_v28  }
  0xa6   :  { %347 = vst.msk [vmem:[%s651_s1 + $0x7] ss:$8 sm:$0xf] %vm3_vm0, %v239_v29   ;;  %348 = vst.msk [vmem:[%s651_s1 + $0x7] ss:$8 sm:$0xf0] %vm3_vm0, %v239_v29  }
  0xa8   :  { %v266_v30 = vpop.permute.xlu1 %265   ;;  %v257_v31 = vpop.permute.xlu0 %256  }
  0xa9   :  { %356 = vst.msk [vmem:[%s651_s1 + $0xc7] ss:$8 sm:$0xf] %vm3_vm0, %v266_v30   ;;  %357 = vst.msk [vmem:[%s651_s1 + $0xc7] ss:$8 sm:$0xf0] %vm3_vm0, %v266_v30  }
  0xaa   :  { %353 = vst.msk [vmem:[%s651_s1 + $0x87] ss:$8 sm:$0xf] %vm3_vm0, %v257_v31   ;;  %354 = vst.msk [vmem:[%s651_s1 + $0x87] ss:$8 sm:$0xf0] %vm3_vm0, %v257_v31  }

// kernel: row_attention_pallas.1
= control target key start
LH: loop header
LB: loop body
LE: loop exit
PB: predicated region body
PF: predicated region fallthrough
CT: control target
= control target key end

     0   :  { %s12387_s27 = smov 0   ;;  %s16225_s0 = inlined_call_operand.vmem [shape: f32[512,8], index: 0, kind: input, shape index: {}]   ;;  %s16226_s1 = inlined_call_operand.vmem [shape: f32[8,8], index: 1, kind: input, shape index: {}]   ;;  %s16227_s2 = inlined_call_operand.vmem [shape: f32[1,8], index: 2, kind: input, shape index: {}]   ;;  %s16228_s3 = inlined_call_operand.vmem [shape: f32[8,8], index: 3, kind: input, shape index: {}]   ;;  %s16229_s4 = inlined_call_operand.vmem [shape: f32[1,8], index: 4, kind: input, shape index: {}]   ;;  %s16230_s5 = inlined_call_operand.vmem [shape: f32[8,8], index: 5, kind: input, shape index: {}]   ;;  %s16231_s6 = inlined_call_operand.vmem [shape: f32[1,8], index: 6, kind: input, shape index: {}]   ;;  %s16232_s7 = inlined_call_operand.vmem [shape: f32[8,1], index: 7, kind: input, shape index: {}]   ;;  %s16233_s8 = inlined_call_operand.vmem [shape: f32[32,1,128], index: 8, kind: output, shape index: {}]  }
   0x1 LB: > { %s10216_s28 = sadd.s32 4294967295, %s12321_s27   ;;  %p10220_p0 = scmp.ge.s32.totalorder %s12321_s27, 1  ;;  %s12321_s27 = sphi %s12387_s27, %s18_s27  }
   0x2   : > { %p263_p1 = scmp.lt.s32.totalorder %s12321_s27, 3 }
   0x4   : > { %p264_p2 = pnand %p10220_p0, %p263_p1 }
   0x6   : > { %267 = sbr.rel (%p264_p2) target bundleno = 2012 (0x7dc), region = 52 }
   0xd   : > { %v902_v0 = vld [vmem:[%s16230_s5] sm:$0xff]  ;;  %s10221_s13 = sshll.u32 %s10216_s28, 5  ;;  %v16236_v3 = vmov 0.0|0.0   ;;  %vm347_vm0 = vcmask 64512   ;;  %vm12324_vm2 = vmmov 0   ;;  %v16234_v39 = vmov 0.0  }
   0xe   : > { %v339_v1 = vld [vmem:[%s16226_s1] sm:$0xff]  ;;  %1135 = vxpose.xlu0.b32.start.end [1/1] (short) (narrow) %v902_v0, 8  ;;  %p297_p3 = scmp.lt.s32.totalorder %s10221_s13, 63  ;;  %vm12429_vm1 = vmpackc.low %vm347_vm0, %vm347_vm0  ;;  %v12326_v40 = vmov 0   ;;  %vm3688_vm3 = vcmask 130048   ;;  %s12327_s30 = smov 16  }
   0xf   : > { %v669_v2 = vld [vmem:[%s16228_s3] sm:$0xff]  ;;  %10968 = vmatprep.subr.mxu0 %v339_v1  ;;  %vm13455_vm4 = vmpackc.low %vm3688_vm3, %vm3688_vm3  ;;  %s12328_s9 = smov 32   ;;  %s12329_s10 = smov 48   ;;  %vm9919_vm5 = vcmask 195584   ;;  %vm9952_vm6 = vcmask 326656   ;;  %vm8809_vm7 = vcmask 261120  }
  0x10   : > { %11018 = vmatprep.subr.mxu1 %v669_v2  ;;  %10969 = vmatpush3.msra.mxu0 %v339_v1  ;;  %s16713_s13 = smov (!%p297_p3, %s10221_s13), 63  ;;  %v1167_v41 = vld [vmem:[%s16232_s7] sm:$0xff]  ;;  %s12330_s11 = smov 64   ;;  %vm8826_vm8 = vcmask 392192   ;;  %vm8843_vm9 = vcmask 523264   ;;  %vm9985_vm10 = vcmask 457728  }
  0x11   : > { %11019 = vmatpush3.msra.mxu1 %v669_v2  ;;  %11068 = vmatprep.subr.mxu0 %v902_v0  ;;  %s10222_s14 = sshll.u32 %s16713_s13, 3  ;;  %v12857_v57 = vld [vmem:[%s16229_s4] ss:$0 sm:$0xff]  ;;  %s12331_s12 = smov 80   ;;  %vm8860_vm11 = vcmask 654336   ;;  %vm10018_vm12 = vcmask 588800  }
  0x12   : > { %11678 = vmatprep.subr.bf16.mxu1 %v16236_v3  ;;  %s12410_s17 = scalar_lea.vmem %s16225_s0, %s10222_s14  ;;  %v12862_v58 = vld [vmem:[%s16227_s2] ss:$0 sm:$0xff]  ;;  %s12332_s13 = smov 96   ;;  %vm8877_vm13 = vcmask 785408   ;;  %vm8894_vm14 = vcmask 916480   ;;  %vm10051_vm15 = vcmask 719872  }
  0x13   : > { %v12413_v4 = vld [vmem:[%s12410_s17] sm:$0xff]  ;;  %v12416_v5 = vld [vmem:[%s12410_s17 + $0x8] sm:$0xff]  ;;  %v12419_v6 = vld [vmem:[%s12410_s17 + $0x10] sm:$0xff]  ;;  %s12333_s14 = smov 112   ;;  %s12334_s15 = smov 72  }
  0x14   : > { %10970 = vmatprep.mubr.msk.f32.mxu0 %vm347_vm0, %v12413_v4  ;;  %11020 = vmatprep.mubr.msk.f32.mxu1 %vm347_vm0, %v12413_v4  ;;  %v11679_v7 = vpack.c.bf16 %v12416_v5, %v12413_v4  ;;  %v12442_v9 = vld [vmem:[%s12410_s17 + $0x18] sm:$0xff]  ;;  %v12445_v10 = vld [vmem:[%s12410_s17 + $0x20] sm:$0xff]  ;;  %v12460_v11 = vld [vmem:[%s12410_s17 + $0x28] sm:$0xff]  ;;  %s12335_s16 = smov 88   ;;  %s12337_s18 = smov 120  }
  0x15   : > { %10971 = vmatmul.mubr.msk.f32.vlgmr.msra.gmra.mrb[0].mxu0 %vm347_vm0, %v12416_v5  ;;  %11021 = vmatmul.mubr.msk.f32.vlgmr.msra.gmra.mrb[0].mxu1 %vm347_vm0, %v12416_v5  ;;  %v12463_v12 = vld [vmem:[%s12410_s17 + $0x30] sm:$0xff]  ;;  %v12474_v13 = vld [vmem:[%s12410_s17 + $0x38] sm:$0xff]  ;;  %v12477_v14 = vld [vmem:[%s12410_s17 + $0x40] sm:$0xff]  ;;  %v11683_v42 = vpack.c.bf16 %v12442_v9, %v12419_v6  ;;  %v11687_v45 = vpack.c.bf16 %v12460_v11, %v12445_v10  ;;  %s12338_s19 = smov 8   ;;  %s12339_s20 = smov 24  }
  0x16   : > { %10973 = vmatprep.mubr.msk.f32.mxu0 %vm347_vm0, %v12419_v6  ;;  %11023 = vmatprep.mubr.msk.f32.mxu1 %vm347_vm0, %v12419_v6  ;;  %v12488_v15 = vld [vmem:[%s12410_s17 + $0x48] sm:$0xff]  ;;  %v12491_v16 = vld [vmem:[%s12410_s17 + $0x50] sm:$0xff]  ;;  %v12502_v17 = vld [vmem:[%s12410_s17 + $0x58] sm:$0xff]  ;;  %v11691_v47 = vpack.c.bf16 %v12474_v13, %v12463_v12  ;;  %s12340_s21 = smov 40   ;;  %s12341_s22 = smov 56  }
  0x17   : > { %11069 = vmatpush3.msra.mxu0 %v902_v0  ;;  %v12505_v18 = vld [vmem:[%s12410_s17 + $0x60] sm:$0xff]  ;;  %v12516_v19 = vld [vmem:[%s12410_s17 + $0x68] sm:$0xff]  ;;  %v12519_v20 = vld [vmem:[%s12410_s17 + $0x70] sm:$0xff]  ;;  %v11695_v49 = vpack.c.bf16 %v12488_v15, %v12477_v14  ;;  %v11699_v50 = vpack.c.bf16 %v12502_v17, %v12491_v16  ;;  %s15096_s23 = sshll.u32 %s10216_s28, 4 }
  0x18   : > { %11681 = vmatpush3.bf16.xpose.msk.msra.mxu1 %vm12429_vm1, %v11679_v7  ;;  %11710 = vmatprep.subr.bf16.mxu0 %v16236_v3  ;;  %v12530_v21 = vld [vmem:[%s12410_s17 + $0x78] sm:$0xff]  ;;  %v12533_v22 = vld [vmem:[%s12410_s17 + $0x80] sm:$0xff]  ;;  %v12544_v23 = vld [vmem:[%s12410_s17 + $0x88] sm:$0xff]  ;;  %v11703_v51 = vpack.c.bf16 %v12516_v19, %v12505_v18  ;;  %p303_p4 = scmp.lt.s32.totalorder %s15096_s23, 31 }
  0x19   : > { %11682 = vmatprep.subr.bf16.mxu1 %v16236_v3  ;;  %10974 = vmatmul.mubr.msk.f32.gmra.mrb[2].mxu0 %vm347_vm0, %v12442_v9  ;;  %v12547_v24 = vld [vmem:[%s12410_s17 + $0x90] sm:$0xff]  ;;  %v12558_v25 = vld [vmem:[%s12410_s17 + $0x98] sm:$0xff]  ;;  %v12561_v26 = vld [vmem:[%s12410_s17 + $0xa0] sm:$0xff]  ;;  %v11711_v38 = vpack.c.bf16 %v12544_v23, %v12533_v22  ;;  %v11707_v52 = vpack.c.bf16 %v12530_v21, %v12519_v20 }
  0x1a   : > { %11024 = vmatmul.mubr.msk.f32.gmra.mrb[2].mxu1 %vm347_vm0, %v12442_v9  ;;  %10976 = vmatprep.mubr.msk.f32.mxu0 %vm347_vm0, %v12445_v10  ;;  %v12572_v27 = vld [vmem:[%s12410_s17 + $0xa8] sm:$0xff]  ;;  %v12575_v28 = vld [vmem:[%s12410_s17 + $0xb0] sm:$0xff]  ;;  %v12586_v29 = vld [vmem:[%s12410_s17 + $0xb8] sm:$0xff]  ;;  %v11715_v53 = vpack.c.bf16 %v12558_v25, %v12547_v24  ;;  %s16715_s23 = smov (!%p303_p4, %s15096_s23), 31 }
  0x1b   : > { %11026 = vmatprep.mubr.msk.f32.mxu1 %vm347_vm0, %v12445_v10  ;;  %v12589_v30 = vld [vmem:[%s12410_s17 + $0xc0] sm:$0xff]  ;;  %v12600_v31 = vld [vmem:[%s12410_s17 + $0xc8] sm:$0xff]  ;;  %v12603_v32 = vld [vmem:[%s12410_s17 + $0xd0] sm:$0xff]  ;;  %v11719_v44 = vpack.c.bf16 %v12572_v27, %v12561_v26  ;;  %v11723_v54 = vpack.c.bf16 %v12586_v29, %v12575_v28  ;;  %s15173_s25 = scalar_lea.vmem %s16233_s8, %s16715_s23 }
  0x1c   : > { %v12614_v33 = vld [vmem:[%s12410_s17 + $0xd8] sm:$0xff]  ;;  %v12617_v34 = vld [vmem:[%s12410_s17 + $0xe0] sm:$0xff]  ;;  %v12628_v35 = vld [vmem:[%s12410_s17 + $0xe8] sm:$0xff]  ;;  %v11727_v46 = vpack.c.bf16 %v12600_v31, %v12589_v30 }
  0x1d   : > { %10977 = vmatmul.mubr.msk.f32.gmra.mrb[4].mxu0 %vm347_vm0, %v12460_v11  ;;  %v12631_v36 = vld [vmem:[%s12410_s17 + $0xf0] sm:$0xff]  ;;  %v12642_v37 = vld [vmem:[%s12410_s17 + $0xf8] sm:$0xff]  ;;  %v11735_v48 = vpack.c.bf16 %v12628_v35, %v12617_v34  ;;  %v11731_v55 = vpack.c.bf16 %v12614_v33, %v12603_v32  ;;  %s12336_s17 = smov 104  }
  0x1e   : > { %11027 = vmatmul.mubr.msk.f32.gmra.mrb[4].mxu1 %vm347_vm0, %v12460_v11  ;;  %10979 = vmatprep.mubr.msk.f32.mxu0 %vm347_vm0, %v12463_v12  ;;  %v11739_v56 = vpack.c.bf16 %v12642_v37, %v12631_v36 }
  0x1f   : > { %11029 = vmatprep.mubr.msk.f32.mxu1 %vm347_vm0, %v12463_v12 }
  0x21   : > { %10980 = vmatmul.mubr.msk.f32.gmra.mrb[6].mxu0 %vm347_vm0, %v12474_v13 }
  0x22   : > { %11030 = vmatmul.mubr.msk.f32.gmra.mrb[6].mxu1 %vm347_vm0, %v12474_v13  ;;  %10982 = vmatprep.mubr.msk.f32.mxu0 %vm347_vm0, %v12477_v14 }
  0x23   : > { %11032 = vmatprep.mubr.msk.f32.mxu1 %vm347_vm0, %v12477_v14 }
  0x25   : > { %10983 = vmatmul.mubr.msk.f32.gmra.mrb[8].mxu0 %vm347_vm0, %v12488_v15 }
  0x26   : > { %11033 = vmatmul.mubr.msk.f32.gmra.mrb[8].mxu1 %vm347_vm0, %v12488_v15  ;;  %10985 = vmatprep.mubr.msk.f32.mxu0 %vm347_vm0, %v12491_v16 }
  0x27   : > { %11035 = vmatprep.mubr.msk.f32.mxu1 %vm347_vm0, %v12491_v16 }
  0x29   : > { %10986 = vmatmul.mubr.msk.f32.gmra.mrb[10].mxu0 %vm347_vm0, %v12502_v17 }
  0x2a   : > { %11036 = vmatmul.mubr.msk.f32.gmra.mrb[10].mxu1 %vm347_vm0, %v12502_v17  ;;  %10988 = vmatprep.mubr.msk.f32.mxu0 %vm347_vm0, %v12505_v18 }
  0x2b   : > { %11038 = vmatprep.mubr.msk.f32.mxu1 %vm347_vm0, %v12505_v18 }
  0x2d   : > { %10989 = vmatmul.mubr.msk.f32.gmra.mrb[12].mxu0 %vm347_vm0, %v12516_v19 }
  0x2e   : > { %11039 = vmatmul.mubr.msk.f32.gmra.mrb[12].mxu1 %vm347_vm0, %v12516_v19  ;;  %10991 = vmatprep.mubr.msk.f32.mxu0 %vm347_vm0, %v12519_v20 }
  0x2f   : > { %11041 = vmatprep.mubr.msk.f32.mxu1 %vm347_vm0, %v12519_v20 }
  0x31   : > { %10992 = vmatmul.mubr.msk.f32.gmra.mrb[14].mxu0 %vm347_vm0, %v12530_v21 }
  0x32   : > { %11042 = vmatmul.mubr.msk.f32.gmra.mrb[14].mxu1 %vm347_vm0, %v12530_v21  ;;  %10994 = vmatprep.mubr.msk.f32.mxu0 %vm347_vm0, %v12533_v22 }
  0x33   : > { %11044 = vmatprep.mubr.msk.f32.mxu1 %vm347_vm0, %v12533_v22 }
  0x35   : > { %10995 = vmatmul.mubr.msk.f32.gmra.mrb[16].mxu0 %vm347_vm0, %v12544_v23 }
  0x36   : > { %11045 = vmatmul.mubr.msk.f32.gmra.mrb[16].mxu1 %vm347_vm0, %v12544_v23  ;;  %10997 = vmatprep.mubr.msk.f32.mxu0 %vm347_vm0, %v12547_v24 }
  0x37   : > { %11047 = vmatprep.mubr.msk.f32.mxu1 %vm347_vm0, %v12547_v24  ;;  %12089 = vset.pattern.permute.xlu0 %v12326_v40 }
  0x38   : > { %1170 = vperm.xlu0 %12089, %v1167_v41  }
  0x39   : > { %10998 = vmatmul.mubr.msk.f32.gmra.mrb[18].mxu0 %vm347_vm0, %v12558_v25 }
  0x3a   : > { %11048 = vmatmul.mubr.msk.f32.gmra.mrb[18].mxu1 %vm347_vm0, %v12558_v25  ;;  %11000 = vmatprep.mubr.msk.f32.mxu0 %vm347_vm0, %v12561_v26 }
  0x3b   : > { %11050 = vmatprep.mubr.msk.f32.mxu1 %vm347_vm0, %v12561_v26 }
  0x3d   : > { %11001 = vmatmul.mubr.msk.f32.gmra.mrb[20].mxu0 %vm347_vm0, %v12572_v27 }
  0x3e   : > { %11051 = vmatmul.mubr.msk.f32.gmra.mrb[20].mxu1 %vm347_vm0, %v12572_v27  ;;  %11003 = vmatprep.mubr.msk.f32.mxu0 %vm347_vm0, %v12575_v28 }
  0x3f   : > { %11053 = vmatprep.mubr.msk.f32.mxu1 %vm347_vm0, %v12575_v28 }
  0x41   : > { %11004 = vmatmul.mubr.msk.f32.gmra.mrb[22].mxu0 %vm347_vm0, %v12586_v29 }
  0x42   : > { %11054 = vmatmul.mubr.msk.f32.gmra.mrb[22].mxu1 %vm347_vm0, %v12586_v29  ;;  %11006 = vmatprep.mubr.msk.f32.mxu0 %vm347_vm0, %v12589_v30 }
  0x43   : > { %11056 = vmatprep.mubr.msk.f32.mxu1 %vm347_vm0, %v12589_v30 }
  0x45   : > { %11007 = vmatmul.mubr.msk.f32.gmra.mrb[24].mxu0 %vm347_vm0, %v12600_v31 }
  0x46   : > { %11057 = vmatmul.mubr.msk.f32.gmra.mrb[24].mxu1 %vm347_vm0, %v12600_v31  ;;  %11009 = vmatprep.mubr.msk.f32.mxu0 %vm347_vm0, %v12603_v32 }
  0x47   : > { %11059 = vmatprep.mubr.msk.f32.mxu1 %vm347_vm0, %v12603_v32 }
  0x49   : > { %11010 = vmatmul.mubr.msk.f32.gmra.mrb[26].mxu0 %vm347_vm0, %v12614_v33 }
  0x4a   : > { %11060 = vmatmul.mubr.msk.f32.gmra.mrb[26].mxu1 %vm347_vm0, %v12614_v33  ;;  %11012 = vmatprep.mubr.msk.f32.mxu0 %vm347_vm0, %v12617_v34 }
  0x4b   : > { %11062 = vmatprep.mubr.msk.f32.mxu1 %vm347_vm0, %v12617_v34 }
  0x4d   : > { %11013 = vmatmul.mubr.msk.f32.gmra.mrb[28].mxu0 %vm347_vm0, %v12628_v35 }
  0x4e   : > { %11063 = vmatmul.mubr.msk.f32.gmra.mrb[28].mxu1 %vm347_vm0, %v12628_v35  ;;  %11015 = vmatprep.mubr.msk.f32.mxu0 %vm347_vm0, %v12631_v36 }
  0x4f   : > { %11065 = vmatprep.mubr.msk.f32.mxu1 %vm347_vm0, %v12631_v36 }
  0x51   : > { %11016 = vmatmul.mubr.msk.f32.gmra.mrb[30].mxu0 %vm347_vm0, %v12642_v37 }
  0x52   : > { %11066 = vmatmul.mubr.msk.f32.gmra.mrb[30].mxu1 %vm347_vm0, %v12642_v37  ;;  %11070 = vmatprep.mubr.msk.f32.mxu0 %vm347_vm0, %v12413_v4 }
  0x53   : > { %11122 = vmatprep.mubr.msk.f32.mxu1 %vm12324_vm2, %v16234_v39 }
  0x55   : > { %11071 = vmatmul.mubr.msk.f32.vlgmr.msra.gmra.mrb[32].mxu0 %vm347_vm0, %v12416_v5 }
  0x56   : > { %11073 = vmatprep.mubr.msk.f32.mxu0 %vm347_vm0, %v12419_v6  ;;  %11713 = vmatpush3.bf16.xpose.msk.msra.mxu0 %vm12429_vm1, %v11711_v38 }
  0x57   : > { %11718 = vmatprep.subr.bf16.mxu0 %v16236_v3 }
  0x59   : > { %11074 = vmatmul.mubr.msk.f32.gmra.mrb[34].mxu0 %vm347_vm0, %v12442_v9 }
  0x5a   : > { %11076 = vmatprep.mubr.msk.f32.mxu0 %vm347_vm0, %v12445_v10 }
  0x5d   : > { %11077 = vmatmul.mubr.msk.f32.gmra.mrb[36].mxu0 %vm347_vm0, %v12460_v11 }
  0x5e   : > { %11079 = vmatprep.mubr.msk.f32.mxu0 %vm347_vm0, %v12463_v12 }
  0x61   : > { %11080 = vmatmul.mubr.msk.f32.gmra.mrb[38].mxu0 %vm347_vm0, %v12474_v13 }
  0x62   : > { %11082 = vmatprep.mubr.msk.f32.mxu0 %vm347_vm0, %v12477_v14 }
  0x65   : > { %11083 = vmatmul.mubr.msk.f32.gmra.mrb[40].mxu0 %vm347_vm0, %v12488_v15 }
  0x66   : > { %11085 = vmatprep.mubr.msk.f32.mxu0 %vm347_vm0, %v12491_v16 }
  0x69   : > { %11086 = vmatmul.mubr.msk.f32.gmra.mrb[42].mxu0 %vm347_vm0, %v12502_v17 }
  0x6a   : > { %11088 = vmatprep.mubr.msk.f32.mxu0 %vm347_vm0, %v12505_v18 }
  0x6d   : > { %11089 = vmatmul.mubr.msk.f32.gmra.mrb[44].mxu0 %vm347_vm0, %v12516_v19 }
  0x6e   : > { %11091 = vmatprep.mubr.msk.f32.mxu0 %vm347_vm0, %v12519_v20 }
  0x71   : > { %11092 = vmatmul.mubr.msk.f32.gmra.mrb[46].mxu0 %vm347_vm0, %v12530_v21 }
  0x72   : > { %11094 = vmatprep.mubr.msk.f32.mxu0 %vm347_vm0, %v12533_v22 }
  0x75   : > { %11095 = vmatmul.mubr.msk.f32.gmra.mrb[48].mxu0 %vm347_vm0, %v12544_v23 }
  0x76   : > { %11097 = vmatprep.mubr.msk.f32.mxu0 %vm347_vm0, %v12547_v24 }
  0x79   : > { %11098 = vmatmul.mubr.msk.f32.gmra.mrb[50].mxu0 %vm347_vm0, %v12558_v25 }
  0x7a   : > { %11100 = vmatprep.mubr.msk.f32.mxu0 %vm347_vm0, %v12561_v26 }
  0x7d   : > { %11101 = vmatmul.mubr.msk.f32.gmra.mrb[52].mxu0 %vm347_vm0, %v12572_v27 }
  0x7e   : > { %11103 = vmatprep.mubr.msk.f32.mxu0 %vm347_vm0, %v12575_v28 }
  0x81   : > { %11104 = vmatmul.mubr.msk.f32.gmra.mrb[54].mxu0 %vm347_vm0, %v12586_v29 }
  0x82   : > { %11106 = vmatprep.mubr.msk.f32.mxu0 %vm347_vm0, %v12589_v30 }
  0x85   : > { %11107 = vmatmul.mubr.msk.f32.gmra.mrb[56].mxu0 %vm347_vm0, %v12600_v31 }
  0x86   : > { %11109 = vmatprep.mubr.msk.f32.mxu0 %vm347_vm0, %v12603_v32 }
  0x89   : > { %11110 = vmatmul.mubr.msk.f32.gmra.mrb[58].mxu0 %vm347_vm0, %v12614_v33 }
  0x8a   : > { %11112 = vmatprep.mubr.msk.f32.mxu0 %vm347_vm0, %v12617_v34 }
  0x8d   : > { %11113 = vmatmul.mubr.msk.f32.gmra.mrb[60].mxu0 %vm347_vm0, %v12628_v35 }
  0x8e   : > { %v12718_v43 = vpop.trf.xlu0  ;;  %11115 = vmatprep.mubr.msk.f32.mxu0 %vm347_vm0, %v12631_v36 }
  0x8f   : > { %11123 = vmatmul.mubr.msk.f32.vlgmr.msra.gmra.mrb[32].mxu1 %vm347_vm0, %v12718_v43 }
  0x90   : > { %11685 = vmatpush3.bf16.xpose.msk.msra.mxu1 %vm12429_vm1, %v11683_v42  ;;  %11129 = vmatprep.mubr.msk.f32.mxu1 %vm12324_vm2, %v16234_v39 }
  0x91   : > { %11686 = vmatprep.subr.bf16.mxu1 %v16236_v3  ;;  %11116 = vmatmul.mubr.msk.f32.gmra.mrb[62].mxu0 %vm347_vm0, %v12642_v37 }
  0x92   : > { %11178 = vmatprep.mubr.msk.f32.mxu0 %vm12324_vm2, %v16234_v39 }
  0x95   : > { %11179 = vmatmul.mubr.msk.f32.vlgmr.msra.gmra.mrb[64].mxu0 %vm347_vm0, %v12718_v43 }
  0x96   : > { %11721 = vmatpush3.bf16.xpose.msk.msra.mxu0 %vm12429_vm1, %v11719_v44  ;;  %11192 = vmatprep.mubr.msk.f32.mxu0 %vm12324_vm2, %v16234_v39 }
  0x97   : > { %11130 = vmatmul.mubr.msk.f32.vlgmr.msra.gmra.mrb[34].mxu1 %vm347_vm0, %v12718_v43  ;;  %11726 = vmatprep.subr.bf16.mxu0 %v16236_v3 }
  0x98   : > { %11689 = vmatpush3.bf16.xpose.msk.msra.mxu1 %vm12429_vm1, %v11687_v45  ;;  %11136 = vmatprep.mubr.msk.f32.mxu1 %vm12324_vm2, %v16234_v39 }
  0x99   : > { %11690 = vmatprep.subr.bf16.mxu1 %v16236_v3 }
  0x9d   : > { %11193 = vmatmul.mubr.msk.f32.vlgmr.msra.gmra.mrb[66].mxu0 %vm347_vm0, %v12718_v43 }
  0x9e   : > { %11729 = vmatpush3.bf16.xpose.msk.msra.mxu0 %vm12429_vm1, %v11727_v46  ;;  %11206 = vmatprep.mubr.msk.f32.mxu0 %vm12324_vm2, %v16234_v39 }
  0x9f   : > { %11137 = vmatmul.mubr.msk.f32.vlgmr.msra.gmra.mrb[36].mxu1 %vm347_vm0, %v12718_v43  ;;  %11734 = vmatprep.subr.bf16.mxu0 %v16236_v3 }
  0xa0   : > { %11693 = vmatpush3.bf16.xpose.msk.msra.mxu1 %vm12429_vm1, %v11691_v47  ;;  %11143 = vmatprep.mubr.msk.f32.mxu1 %vm12324_vm2, %v16234_v39 }
  0xa1   : > { %11694 = vmatprep.subr.bf16.mxu1 %v16236_v3 }
  0xa5   : > { %11207 = vmatmul.mubr.msk.f32.vlgmr.msra.gmra.mrb[68].mxu0 %vm347_vm0, %v12718_v43 }
  0xa6   : > { %11737 = vmatpush3.bf16.xpose.msk.msra.mxu0 %vm12429_vm1, %v11735_v48  ;;  %11220 = vmatprep.mubr.msk.f32.mxu0 %vm12324_vm2, %v16234_v39 }
  0xa7   : > { %11144 = vmatmul.mubr.msk.f32.vlgmr.msra.gmra.mrb[38].mxu1 %vm347_vm0, %v12718_v43 }
  0xa8   : > { %11697 = vmatpush3.bf16.xpose.msk.msra.mxu1 %vm12429_vm1, %v11695_v49  ;;  %11150 = vmatprep.mubr.msk.f32.mxu1 %vm12324_vm2, %v16234_v39 }
  0xa9   : > { %11698 = vmatprep.subr.bf16.mxu1 %v16236_v3 }
  0xad   : > { %11221 = vmatmul.mubr.msk.f32.vlgmr.msra.gmra.mrb[70].mxu0 %vm347_vm0, %v12718_v43 }
  0xaf   : > { %11151 = vmatmul.mubr.msk.f32.vlgmr.msra.gmra.mrb[40].mxu1 %vm347_vm0, %v12718_v43 }
  0xb0   : > { %11701 = vmatpush3.bf16.xpose.msk.msra.mxu1 %vm12429_vm1, %v11699_v50  ;;  %11157 = vmatprep.mubr.msk.f32.mxu1 %vm12324_vm2, %v16234_v39 }
  0xb1   : > { %11702 = vmatprep.subr.bf16.mxu1 %v16236_v3 }
  0xb7   : > { %11158 = vmatmul.mubr.msk.f32.vlgmr.msra.gmra.mrb[42].mxu1 %vm347_vm0, %v12718_v43 }
  0xb8   : > { %11705 = vmatpush3.bf16.xpose.msk.msra.mxu1 %vm12429_vm1, %v11703_v51  ;;  %11164 = vmatprep.mubr.msk.f32.mxu1 %vm12324_vm2, %v16234_v39 }
  0xb9   : > { %11706 = vmatprep.subr.bf16.mxu1 %v16236_v3 }
  0xbf   : > { %11165 = vmatmul.mubr.msk.f32.vlgmr.msra.gmra.mrb[44].mxu1 %vm347_vm0, %v12718_v43 }
  0xc0   : > { %11709 = vmatpush3.bf16.xpose.msk.msra.mxu1 %vm12429_vm1, %v11707_v52  ;;  %11171 = vmatprep.mubr.msk.f32.mxu1 %vm12324_vm2, %v16234_v39 }
  0xc1   : > { %11714 = vmatprep.subr.bf16.mxu1 %v16236_v3 }
  0xc7   : > { %11172 = vmatmul.mubr.msk.f32.vlgmr.msra.gmra.mrb[46].mxu1 %vm347_vm0, %v12718_v43 }
  0xc8   : > { %11717 = vmatpush3.bf16.xpose.msk.msra.mxu1 %vm12429_vm1, %v11715_v53  ;;  %11185 = vmatprep.mubr.msk.f32.mxu1 %vm12324_vm2, %v16234_v39 }
  0xc9   : > { %11722 = vmatprep.subr.bf16.mxu1 %v16236_v3 }
  0xcf   : > { %11186 = vmatmul.mubr.msk.f32.vlgmr.msra.gmra.mrb[48].mxu1 %vm347_vm0, %v12718_v43 }
  0xd0   : > { %11725 = vmatpush3.bf16.xpose.msk.msra.mxu1 %vm12429_vm1, %v11723_v54  ;;  %11199 = vmatprep.mubr.msk.f32.mxu1 %vm12324_vm2, %v16234_v39 }
  0xd1   : > { %11730 = vmatprep.subr.bf16.mxu1 %v16236_v3 }
  0xd7   : > { %11200 = vmatmul.mubr.msk.f32.vlgmr.msra.gmra.mrb[50].mxu1 %vm347_vm0, %v12718_v43 }
  0xd8   : > { %11733 = vmatpush3.bf16.xpose.msk.msra.mxu1 %vm12429_vm1, %v11731_v55  ;;  %11213 = vmatprep.mubr.msk.f32.mxu1 %vm12324_vm2, %v16234_v39 }
  0xd9   : > { %11738 = vmatprep.subr.bf16.mxu1 %v16236_v3 }
  0xdf   : > { %11214 = vmatmul.mubr.msk.f32.vlgmr.msra.gmra.mrb[52].mxu1 %vm347_vm0, %v12718_v43 }
  0xe0   : > { %11741 = vmatpush3.bf16.xpose.msk.msra.mxu1 %vm12429_vm1, %v11739_v56  ;;  %11227 = vmatprep.mubr.msk.f32.mxu1 %vm12324_vm2, %v16234_v39 }
  0xe7   : > { %11228 = vmatmul.mubr.msk.f32.vlgmr.msra.gmra.mrb[54].mxu1 %vm347_vm0, %v12718_v43 }
  0xe8   : > { %v11022_v59 = vpop.f32.mrb[0].mxu1  ;;  %v10972_v60 = vpop.f32.mrb[0].mxu0 }
  0xe9   : > { %v749_v61 = vadd.f32 %v11022_v59, %v12857_v57  ;;  %v743_v62 = vpop.f32.mrb[1].mxu1  ;;  %v516_v63 = vadd.f32 %v10972_v60, %v12862_v58  ;;  %v510_v0 = vpop.f32.mrb[1].mxu0 }
  0xea   : > { %v744_v1 = vadd.f32 %v12857_v57, %v743_v62  ;;  %v511_v2 = vadd.f32 %v12862_v58, %v510_v0 }
  0xec   : > { %v11742_v4 = vpack.c.bf16 %v749_v61, %v744_v1  ;;  %v12868_v6 = vpack.c.bf16 %v516_v63, %v511_v2  ;;  %11234 = vmatprep.mubr.msk.f32.mxu0 %vm347_vm0, %v511_v2  ;;  %v10975_v7 = vpop.f32.mrb[2].mxu0 }
  0xed   : > { %v11025_v5 = vpop.f32.mrb[2].mxu1  ;;  %v526_v11 = vadd.f32 %v10975_v7, %v12862_v58  ;;  %v520_v12 = vpop.f32.mrb[3].mxu0 }
  0xee   : > { %v759_v9 = vadd.f32 %v11025_v5, %v12857_v57  ;;  %v753_v10 = vpop.f32.mrb[3].mxu1  ;;  %11744 = vmatprep.subr.msk.bf16.mxu0 %vm12429_vm1, %v11742_v4  ;;  %v521_v14 = vadd.f32 %v12862_v58, %v520_v12 }
  0xef   : > { %v754_v13 = vadd.f32 %v12857_v57, %v753_v10  ;;  %11747 = vmatpush3.bf16.xpose.msk.msra.mxu0 %vm12429_vm1, %v11742_v4 }
  0xf0   : > { %v12879_v17 = vpack.c.bf16 %v526_v11, %v521_v14  ;;  %v10978_v18 = vpop.f32.mrb[4].mxu0  ;;  %11241 = vmatprep.mubr.msk.f32.mxu1 %vm347_vm0, %v521_v14 }
  0xf1   : > { %v11748_v15 = vpack.c.bf16 %v759_v9, %v754_v13  ;;  %v11028_v16 = vpop.f32.mrb[4].mxu1  ;;  %v530_v21 = vpop.f32.mrb[5].mxu0  ;;  %v536_v23 = vadd.f32 %v10978_v18, %v12862_v58 }
  0xf2   : > { %v769_v19 = vadd.f32 %v11028_v16, %v12857_v57  ;;  %v763_v20 = vpop.f32.mrb[5].mxu1  ;;  %v531_v24 = vadd.f32 %v12862_v58, %v530_v21 }
  0xf3   : > { %v764_v22 = vadd.f32 %v12857_v57, %v763_v20  ;;  %11750 = vmatprep.subr.msk.bf16.mxu1 %vm12429_vm1, %v11748_v15 }
  0xf4   : > { %11753 = vmatpush3.bf16.xpose.msk.msra.mxu1 %vm12429_vm1, %v11748_v15  ;;  %v12890_v27 = vpack.c.bf16 %v536_v23, %v531_v24  ;;  %v10981_v28 = vpop.f32.mrb[6].mxu0 }
  0xf5   : > { %v11754_v25 = vpack.c.bf16 %v769_v19, %v764_v22  ;;  %v11031_v26 = vpop.f32.mrb[6].mxu1  ;;  %v540_v31 = vpop.f32.mrb[7].mxu0  ;;  %v546_v33 = vadd.f32 %v10981_v28, %v12862_v58 }
  0xf6   : > { %16301 = vst [vmem:[#allocation2_spill] sm:$0xff] %v12890_v27  ;;  %v779_v29 = vadd.f32 %v11031_v26, %v12857_v57  ;;  %v773_v30 = vpop.f32.mrb[7].mxu1  ;;  %11235 = vmatmul.mubr.msk.f32.vlgmr.msra.gmra.mrb[72].mxu0 %vm347_vm0, %v516_v63  ;;  %v541_v34 = vadd.f32 %v12862_v58, %v540_v31 }
  0xf7   : > { %v774_v32 = vadd.f32 %v12857_v57, %v773_v30  ;;  %11756 = vmatprep.subr.msk.bf16.mxu0 %vm12429_vm1, %v11754_v25  ;;  %11248 = vmatprep.mubr.msk.f32.mxu0 %vm347_vm0, %v531_v24 }
  0xf8   : > { %11759 = vmatpush3.bf16.xpose.msk.msra.mxu0 %vm12429_vm1, %v11754_v25  ;;  %v12902_v37 = vpack.c.bf16 %v546_v33, %v541_v34  ;;  %v10984_v38 = vpop.f32.mrb[8].mxu0 }
  0xf9   : > { %v11760_v35 = vpack.c.bf16 %v779_v29, %v774_v32  ;;  %v11034_v36 = vpop.f32.mrb[8].mxu1  ;;  %v550_v42 = vpop.f32.mrb[9].mxu0  ;;  %v556_v44 = vadd.f32 %v10984_v38, %v12862_v58 }
  0xfa   : > { %16302 = vst [vmem:[#allocation3_spill] sm:$0xff] %v12902_v37  ;;  %v789_v40 = vadd.f32 %v11034_v36, %v12857_v57  ;;  %v783_v41 = vpop.f32.mrb[9].mxu1  ;;  %v551_v45 = vadd.f32 %v12862_v58, %v550_v42 }
  0xfb   : > { %v784_v43 = vadd.f32 %v12857_v57, %v783_v41  ;;  %11762 = vmatprep.subr.msk.bf16.mxu1 %vm12429_vm1, %v11760_v35  ;;  %11242 = vmatmul.mubr.msk.f32.vlgmr.msra.gmra.mrb[56].mxu1 %vm347_vm0, %v526_v11 }
  0xfc   : > { %11765 = vmatpush3.bf16.xpose.msk.msra.mxu1 %vm12429_vm1, %v11760_v35  ;;  %11255 = vmatprep.mubr.msk.f32.mxu1 %vm347_vm0, %v541_v34  ;;  %v12914_v48 = vpack.c.bf16 %v556_v44, %v551_v45  ;;  %v10987_v49 = vpop.f32.mrb[10].mxu0 }
  0xfd   : > { %v11766_v46 = vpack.c.bf16 %v789_v40, %v784_v43  ;;  %v11037_v47 = vpop.f32.mrb[10].mxu1  ;;  %v560_v52 = vpop.f32.mrb[11].mxu0  ;;  %v566_v54 = vadd.f32 %v10987_v49, %v12862_v58 }
  0xfe   : > { %16303 = vst [vmem:[#allocation4_spill] sm:$0xff] %v12914_v48  ;;  %v799_v50 = vadd.f32 %v11037_v47, %v12857_v57  ;;  %v793_v51 = vpop.f32.mrb[11].mxu1  ;;  %v561_v55 = vadd.f32 %v12862_v58, %v560_v52 }
  0xff   : > { %v794_v53 = vadd.f32 %v12857_v57, %v793_v51  ;;  %11768 = vmatprep.subr.msk.bf16.mxu0 %vm12429_vm1, %v11766_v46  ;;  %11249 = vmatmul.mubr.msk.f32.vlgmr.msra.gmra.mrb[74].mxu0 %vm347_vm0, %v536_v23 }
 0x100   : > { %11771 = vmatpush3.bf16.xpose.msk.msra.mxu0 %vm12429_vm1, %v11766_v46  ;;  %11262 = vmatprep.mubr.msk.f32.mxu0 %vm347_vm0, %v551_v45  ;;  %v12926_v60 = vpack.c.bf16 %v566_v54, %v561_v55  ;;  %v10990_v61 = vpop.f32.mrb[12].mxu0 }
 0x101   : > { %v11772_v56 = vpack.c.bf16 %v799_v50, %v794_v53  ;;  %v11040_v59 = vpop.f32.mrb[12].mxu1  ;;  %v570_v0 = vpop.f32.mrb[13].mxu0  ;;  %v576_v2 = vadd.f32 %v10990_v61, %v12862_v58 }
 0x102   : > { %16304 = vst [vmem:[#allocation5_spill] sm:$0xff] %v12926_v60  ;;  %v809_v62 = vadd.f32 %v11040_v59, %v12857_v57  ;;  %v803_v63 = vpop.f32.mrb[13].mxu1  ;;  %v571_v4 = vadd.f32 %v12862_v58, %v570_v0 }
 0x103   : > { %v804_v1 = vadd.f32 %v12857_v57, %v803_v63  ;;  %11774 = vmatprep.subr.msk.bf16.mxu1 %vm12429_vm1, %v11772_v56  ;;  %11256 = vmatmul.mubr.msk.f32.vlgmr.msra.gmra.mrb[58].mxu1 %vm347_vm0, %v546_v33 }
 0x104   : > { %11777 = vmatpush3.bf16.xpose.msk.msra.mxu1 %vm12429_vm1, %v11772_v56  ;;  %11269 = vmatprep.mubr.msk.f32.mxu1 %vm347_vm0, %v561_v55  ;;  %v12938_v9 = vpack.c.bf16 %v576_v2, %v571_v4  ;;  %v10993_v10 = vpop.f32.mrb[14].mxu0 }
 0x105   : > { %v11778_v5 = vpack.c.bf16 %v809_v62, %v804_v1  ;;  %v11043_v7 = vpop.f32.mrb[14].mxu1  ;;  %v580_v13 = vpop.f32.mrb[15].mxu0  ;;  %v586_v15 = vadd.f32 %v10993_v10, %v12862_v58 }
 0x106   : > { %16305 = vst [vmem:[#allocation6_spill] sm:$0xff] %v12938_v9  ;;  %v819_v11 = vadd.f32 %v11043_v7, %v12857_v57  ;;  %v813_v12 = vpop.f32.mrb[15].mxu1  ;;  %v581_v16 = vadd.f32 %v12862_v58, %v580_v13 }
 0x107   : > { %v814_v14 = vadd.f32 %v12857_v57, %v813_v12  ;;  %11780 = vmatprep.subr.msk.bf16.mxu0 %vm12429_vm1, %v11778_v5  ;;  %11263 = vmatmul.mubr.msk.f32.vlgmr.msra.gmra.mrb[76].mxu0 %vm347_vm0, %v556_v44 }
 0x108   : > { %11783 = vmatpush3.bf16.xpose.msk.msra.mxu0 %vm12429_vm1, %v11778_v5  ;;  %11276 = vmatprep.mubr.msk.f32.mxu0 %vm347_vm0, %v571_v4  ;;  %v12950_v20 = vpack.c.bf16 %v586_v15, %v581_v16  ;;  %v10996_v21 = vpop.f32.mrb[16].mxu0 }
 0x109   : > { %v11784_v18 = vpack.c.bf16 %v819_v11, %v814_v14  ;;  %v11046_v19 = vpop.f32.mrb[16].mxu1  ;;  %v590_v24 = vpop.f32.mrb[17].mxu0  ;;  %v596_v26 = vadd.f32 %v10996_v21, %v12862_v58 }
 0x10a   : > { %16306 = vst [vmem:[#allocation7_spill] sm:$0xff] %v12950_v20  ;;  %v829_v22 = vadd.f32 %v11046_v19, %v12857_v57  ;;  %v823_v23 = vpop.f32.mrb[17].mxu1  ;;  %v591_v28 = vadd.f32 %v12862_v58, %v590_v24 }
 0x10b   : > { %v824_v25 = vadd.f32 %v12857_v57, %v823_v23  ;;  %11786 = vmatprep.subr.msk.bf16.mxu1 %vm12429_vm1, %v11784_v18  ;;  %11270 = vmatmul.mubr.msk.f32.vlgmr.msra.gmra.mrb[60].mxu1 %vm347_vm0, %v566_v54 }
 0x10c   : > { %11789 = vmatpush3.bf16.xpose.msk.msra.mxu1 %vm12429_vm1, %v11784_v18  ;;  %11283 = vmatprep.mubr.msk.f32.mxu1 %vm347_vm0, %v581_v16  ;;  %v12962_v31 = vpack.c.bf16 %v596_v26, %v591_v28  ;;  %v10999_v32 = vpop.f32.mrb[18].mxu0 }
 0x10d   : > { %v11790_v29 = vpack.c.bf16 %v829_v22, %v824_v25  ;;  %v11049_v30 = vpop.f32.mrb[18].mxu1  ;;  %v600_v35 = vpop.f32.mrb[19].mxu0  ;;  %v606_v38 = vadd.f32 %v10999_v32, %v12862_v58 }
 0x10e   : > { %16307 = vst [vmem:[#allocation8_spill] sm:$0xff] %v12962_v31  ;;  %v839_v33 = vadd.f32 %v11049_v30, %v12857_v57  ;;  %v833_v34 = vpop.f32.mrb[19].mxu1  ;;  %v601_v40 = vadd.f32 %v12862_v58, %v600_v35 }
 0x10f   : > { %v834_v36 = vadd.f32 %v12857_v57, %v833_v34  ;;  %11277 = vmatmul.mubr.msk.f32.vlgmr.msra.gmra.mrb[78].mxu0 %vm347_vm0, %v576_v2  ;;  %11792 = vmatprep.subr.msk.bf16.mxu0 %vm12429_vm1, %v11790_v29 }
 0x110   : > { %11795 = vmatpush3.bf16.xpose.msk.msra.mxu0 %vm12429_vm1, %v11790_v29  ;;  %11290 = vmatprep.mubr.msk.f32.mxu0 %vm347_vm0, %v591_v28  ;;  %v12974_v43 = vpack.c.bf16 %v606_v38, %v601_v40  ;;  %v11002_v44 = vpop.f32.mrb[20].mxu0 }
 0x111   : > { %v11796_v41 = vpack.c.bf16 %v839_v33, %v834_v36  ;;  %v11052_v42 = vpop.f32.mrb[20].mxu1  ;;  %v610_v47 = vpop.f32.mrb[21].mxu0  ;;  %v616_v50 = vadd.f32 %v11002_v44, %v12862_v58 }
 0x112   : > { %16308 = vst [vmem:[#allocation9_spill] sm:$0xff] %v12974_v43  ;;  %v849_v45 = vadd.f32 %v11052_v42, %v12857_v57  ;;  %v843_v46 = vpop.f32.mrb[21].mxu1  ;;  %v611_v51 = vadd.f32 %v12862_v58, %v610_v47 }
 0x113   : > { %v844_v49 = vadd.f32 %v12857_v57, %v843_v46  ;;  %11798 = vmatprep.subr.msk.bf16.mxu1 %vm12429_vm1, %v11796_v41  ;;  %11284 = vmatmul.mubr.msk.f32.vlgmr.msra.gmra.mrb[62].mxu1 %vm347_vm0, %v586_v15 }
 0x114   : > { %11801 = vmatpush3.bf16.xpose.msk.msra.mxu1 %vm12429_vm1, %v11796_v41  ;;  %11297 = vmatprep.mubr.msk.f32.mxu1 %vm347_vm0, %v601_v40  ;;  %v12986_v54 = vpack.c.bf16 %v616_v50, %v611_v51  ;;  %v11005_v55 = vpop.f32.mrb[22].mxu0 }
 0x115   : > { %v11802_v52 = vpack.c.bf16 %v849_v45, %v844_v49  ;;  %v11055_v53 = vpop.f32.mrb[22].mxu1  ;;  %v620_v61 = vpop.f32.mrb[23].mxu0  ;;  %v626_v63 = vadd.f32 %v11005_v55, %v12862_v58 }
 0x116   : > { %16309 = vst [vmem:[#allocation10_spill] sm:$0xff] %v12986_v54  ;;  %v859_v56 = vadd.f32 %v11055_v53, %v12857_v57  ;;  %v853_v59 = vpop.f32.mrb[23].mxu1  ;;  %v621_v0 = vadd.f32 %v12862_v58, %v620_v61 }
 0x117   : > { %v854_v62 = vadd.f32 %v12857_v57, %v853_v59  ;;  %11804 = vmatprep.subr.msk.bf16.mxu0 %vm12429_vm1, %v11802_v52  ;;  %11291 = vmatmul.mubr.msk.f32.vlgmr.msra.gmra.mrb[80].mxu0 %vm347_vm0, %v596_v26 }
 0x118   : > { %11807 = vmatpush3.bf16.xpose.msk.msra.mxu0 %vm12429_vm1, %v11802_v52  ;;  %11304 = vmatprep.mubr.msk.f32.mxu0 %vm347_vm0, %v611_v51  ;;  %v12998_v4 = vpack.c.bf16 %v626_v63, %v621_v0  ;;  %v11008_v5 = vpop.f32.mrb[24].mxu0 }
 0x119   : > { %v11808_v1 = vpack.c.bf16 %v859_v56, %v854_v62  ;;  %v11058_v2 = vpop.f32.mrb[24].mxu1  ;;  %v630_v11 = vpop.f32.mrb[25].mxu0  ;;  %v636_v13 = vadd.f32 %v11008_v5, %v12862_v58 }
 0x11a   : > { %16310 = vst [vmem:[#allocation11_spill] sm:$0xff] %v12998_v4  ;;  %v869_v7 = vadd.f32 %v11058_v2, %v12857_v57  ;;  %v863_v10 = vpop.f32.mrb[25].mxu1  ;;  %v631_v14 = vadd.f32 %v12862_v58, %v630_v11 }
 0x11b   : > { %v864_v12 = vadd.f32 %v12857_v57, %v863_v10  ;;  %11810 = vmatprep.subr.msk.bf16.mxu1 %vm12429_vm1, %v11808_v1  ;;  %11298 = vmatmul.mubr.msk.f32.vlgmr.msra.gmra.mrb[64].mxu1 %vm347_vm0, %v606_v38 }
 0x11c   : > { %11813 = vmatpush3.bf16.xpose.msk.msra.mxu1 %vm12429_vm1, %v11808_v1  ;;  %11311 = vmatprep.mubr.msk.f32.mxu1 %vm347_vm0, %v621_v0  ;;  %v13010_v18 = vpack.c.bf16 %v636_v13, %v631_v14  ;;  %v11011_v19 = vpop.f32.mrb[26].mxu0 }
 0x11d   : > { %v11814_v15 = vpack.c.bf16 %v869_v7, %v864_v12  ;;  %v11061_v16 = vpop.f32.mrb[26].mxu1  ;;  %v640_v23 = vpop.f32.mrb[27].mxu0  ;;  %v646_v25 = vadd.f32 %v11011_v19, %v12862_v58 }
 0x11e   : > { %16311 = vst [vmem:[#allocation12_spill] sm:$0xff] %v13010_v18  ;;  %v879_v21 = vadd.f32 %v11061_v16, %v12857_v57  ;;  %v873_v22 = vpop.f32.mrb[27].mxu1  ;;  %v641_v26 = vadd.f32 %v12862_v58, %v640_v23 }
 0x11f   : > { %v874_v24 = vadd.f32 %v12857_v57, %v873_v22  ;;  %11305 = vmatmul.mubr.msk.f32.vlgmr.msra.gmra.mrb[82].mxu0 %vm347_vm0, %v616_v50  ;;  %11816 = vmatprep.subr.msk.bf16.mxu0 %vm12429_vm1, %v11814_v15 }
 0x120   : > { %11819 = vmatpush3.bf16.xpose.msk.msra.mxu0 %vm12429_vm1, %v11814_v15  ;;  %11318 = vmatprep.mubr.msk.f32.mxu0 %vm347_vm0, %v631_v14  ;;  %v13022_v30 = vpack.c.bf16 %v646_v25, %v641_v26  ;;  %v11014_v32 = vpop.f32.mrb[28].mxu0 }
 0x121   : > { %v11820_v28 = vpack.c.bf16 %v879_v21, %v874_v24  ;;  %v11064_v29 = vpop.f32.mrb[28].mxu1  ;;  %v656_v35 = vadd.f32 %v11014_v32, %v12862_v58  ;;  %v650_v36 = vpop.f32.mrb[29].mxu0 }
 0x122   : > { %16312 = vst [vmem:[#allocation13_spill] sm:$0xff] %v13022_v30  ;;  %v889_v33 = vadd.f32 %v11064_v29, %v12857_v57  ;;  %v883_v34 = vpop.f32.mrb[29].mxu1  ;;  %v651_v40 = vadd.f32 %v12862_v58, %v650_v36  ;;  %v10290_v36 = vld [vmem:[%s16231_s6] ss:$0 sm:$0xff] }
 0x123   : > { %v884_v38 = vadd.f32 %v12857_v57, %v883_v34  ;;  %11312 = vmatmul.mubr.msk.f32.vlgmr.msra.gmra.mrb[66].mxu1 %vm347_vm0, %v626_v63  ;;  %11822 = vmatprep.subr.msk.bf16.mxu1 %vm12429_vm1, %v11820_v28 }
 0x124   : > { %11825 = vmatpush3.bf16.xpose.msk.msra.mxu1 %vm12429_vm1, %v11820_v28  ;;  %11325 = vmatprep.mubr.msk.f32.mxu1 %vm347_vm0, %v641_v26  ;;  %v13034_v44 = vpack.c.bf16 %v656_v35, %v651_v40  ;;  %v11017_v45 = vpop.f32.mrb[30].mxu0 }
 0x125   : > { %v11826_v41 = vpack.c.bf16 %v889_v33, %v884_v38  ;;  %v11067_v42 = vpop.f32.mrb[30].mxu1  ;;  %v666_v49 = vadd.f32 %v11017_v45, %v12862_v58  ;;  %v660_v50 = vpop.f32.mrb[31].mxu0 }
 0x126   : > { %16313 = vst [vmem:[#allocation14_spill] sm:$0xff] %v13034_v44  ;;  %v899_v46 = vadd.f32 %v11067_v42, %v12857_v57  ;;  %v893_v47 = vpop.f32.mrb[31].mxu1  ;;  %v661_v52 = vadd.f32 %v12862_v58, %v660_v50 }
 0x127   : > { %v894_v51 = vadd.f32 %v12857_v57, %v893_v47  ;;  %11319 = vmatmul.mubr.msk.f32.vlgmr.msra.gmra.mrb[84].mxu0 %vm347_vm0, %v636_v13  ;;  %11828 = vmatprep.subr.msk.bf16.mxu0 %vm12429_vm1, %v11826_v41 }
 0x128   : > { %11831 = vmatpush3.bf16.xpose.msk.msra.mxu0 %vm12429_vm1, %v11826_v41  ;;  %11332 = vmatprep.mubr.msk.f32.mxu0 %vm347_vm0, %v651_v40  ;;  %v13046_v55 = vpack.c.bf16 %v666_v49, %v661_v52  ;;  %v13048_v56 = vpop.f32.mrb[32].mxu0 }
 0x129   : > { %v11832_v53 = vpack.c.bf16 %v899_v46, %v894_v51  ;;  %16315 = vst [vmem:[#allocation16_spill] sm:$0xff] %v13048_v56  ;;  %11838 = vmatprep.subr.bf16.mxu0 %v16236_v3  ;;  %v13051_v57 = vpop.f32.mrb[33].mxu0 }
 0x12a   : > { %16314 = vst [vmem:[#allocation15_spill] sm:$0xff] %v13046_v55  ;;  %16316 = vst [vmem:[#allocation17_spill] sm:$0xff] %v13051_v57 }
 0x12b   : > { %11326 = vmatmul.mubr.msk.f32.vlgmr.msra.gmra.mrb[68].mxu1 %vm347_vm0, %v646_v25  ;;  %11834 = vmatprep.subr.msk.bf16.mxu1 %vm12429_vm1, %v11832_v53 }
 0x12c   : > { %11837 = vmatpush3.bf16.xpose.msk.msra.mxu1 %vm12429_vm1, %v11832_v53  ;;  %11339 = vmatprep.mubr.msk.f32.mxu1 %vm347_vm0, %v661_v52  ;;  %v13059_v58 = vpop.f32.mrb[34].mxu0 }
 0x12d   : > { %16317 = vst [vmem:[#allocation18_spill] sm:$0xff] %v13059_v58  ;;  %11842 = vmatprep.subr.bf16.mxu1 %v16236_v3  ;;  %v13062_v59 = vpop.f32.mrb[35].mxu0 }
 0x12e   : > { %16318 = vst [vmem:[#allocation19_spill] sm:$0xff] %v13062_v59 }
 0x12f   : > { %11333 = vmatmul.mubr.msk.f32.vlgmr.msra.gmra.mrb[86].mxu0 %vm347_vm0, %v656_v35 }
 0x130   : > { %11346 = vmatprep.mubr.msk.f32.mxu0 %vm12324_vm2, %v16234_v39  ;;  %v13067_v61 = vpop.f32.mrb[36].mxu0 }
 0x131   : > { %16319 = vst [vmem:[#allocation20_spill] sm:$0xff] %v13067_v61  ;;  %v13069_v62 = vpop.f32.mrb[37].mxu0 }
 0x132   : > { %16320 = vst [vmem:[#allocation21_spill] sm:$0xff] %v13069_v62 }
 0x133   : > { %11340 = vmatmul.mubr.msk.f32.vlgmr.msra.gmra.mrb[70].mxu1 %vm347_vm0, %v666_v49 }
 0x134   : > { %11353 = vmatprep.mubr.msk.f32.mxu1 %vm12324_vm2, %v16234_v39  ;;  %v13074_v63 = vpop.f32.mrb[38].mxu0 }
 0x135   : > { %16321 = vst [vmem:[#allocation22_spill] sm:$0xff] %v13074_v63  ;;  %v13076_v0 = vpop.f32.mrb[39].mxu0 }
 0x136   : > { %16322 = vst [vmem:[#allocation23_spill] sm:$0xff] %v13076_v0 }
 0x138   : > { %v13078_v1 = vpop.f32.mrb[40].mxu0 }
 0x139   : > { %16323 = vst [vmem:[#allocation24_spill] sm:$0xff] %v13078_v1  ;;  %v13080_v2 = vpop.f32.mrb[41].mxu0 }
 0x13a   : > { %16324 = vst [vmem:[#allocation25_spill] sm:$0xff] %v13080_v2 }
 0x13c   : > { %v13082_v5 = vpop.f32.mrb[42].mxu0 }
 0x13d   : > { %16325 = vst [vmem:[#allocation26_spill] sm:$0xff] %v13082_v5  ;;  %v13084_v7 = vpop.f32.mrb[43].mxu0 }
 0x13e   : > { %16326 = vst [vmem:[#allocation27_spill] sm:$0xff] %v13084_v7 }
 0x140   : > { %v13086_v10 = vpop.f32.mrb[44].mxu0 }
 0x141   : > { %16327 = vst [vmem:[#allocation28_spill] sm:$0xff] %v13086_v10  ;;  %v13088_v11 = vpop.f32.mrb[45].mxu0 }
 0x142   : > { %16328 = vst [vmem:[#allocation29_spill] sm:$0xff] %v13088_v11 }
 0x144   : > { %v13090_v12 = vpop.f32.mrb[46].mxu0 }
 0x145   : > { %16329 = vst [vmem:[#allocation30_spill] sm:$0xff] %v13090_v12  ;;  %v13092_v13 = vpop.f32.mrb[47].mxu0 }
 0x146   : > { %16330 = vst [vmem:[#allocation31_spill] sm:$0xff] %v13092_v13 }
 0x148   : > { %v13094_v14 = vpop.f32.mrb[48].mxu0 }
 0x149   : > { %16331 = vst [vmem:[#allocation32_spill] sm:$0xff] %v13094_v14  ;;  %v13096_v15 = vpop.f32.mrb[49].mxu0 }
 0x14a   : > { %16332 = vst [vmem:[#allocation33_spill] sm:$0xff] %v13096_v15 }
 0x14c   : > { %v13098_v16 = vpop.f32.mrb[50].mxu0 }
 0x14d   : > { %16333 = vst [vmem:[#allocation34_spill] sm:$0xff] %v13098_v16  ;;  %v13100_v19 = vpop.f32.mrb[51].mxu0 }
 0x14e   : > { %16334 = vst [vmem:[#allocation35_spill] sm:$0xff] %v13100_v19 }
 0x150   : > { %v13102_v21 = vpop.f32.mrb[52].mxu0 }
 0x151   : > { %16335 = vst [vmem:[#allocation36_spill] sm:$0xff] %v13102_v21  ;;  %v13104_v22 = vpop.f32.mrb[53].mxu0 }
 0x152   : > { %16336 = vst [vmem:[#allocation37_spill] sm:$0xff] %v13104_v22 }
 0x154   : > { %v13106_v23 = vpop.f32.mrb[54].mxu0 }
 0x155   : > { %16337 = vst [vmem:[#allocation38_spill] sm:$0xff] %v13106_v23  ;;  %v13108_v24 = vpop.f32.mrb[55].mxu0 }
 0x156   : > { %16338 = vst [vmem:[#allocation39_spill] sm:$0xff] %v13108_v24 }
 0x158   : > { %v13110_v25 = vpop.f32.mrb[56].mxu0 }
 0x159   : > { %16339 = vst [vmem:[#allocation40_spill] sm:$0xff] %v13110_v25  ;;  %v13112_v26 = vpop.f32.mrb[57].mxu0 }
 0x15a   : > { %16340 = vst [vmem:[#allocation41_spill] sm:$0xff] %v13112_v26 }
 0x15c   : > { %v13114_v28 = vpop.f32.mrb[58].mxu0 }
 0x15d   : > { %16341 = vst [vmem:[#allocation42_spill] sm:$0xff] %v13114_v28  ;;  %v13116_v29 = vpop.f32.mrb[59].mxu0 }
 0x15e   : > { %16342 = vst [vmem:[#allocation43_spill] sm:$0xff] %v13116_v29 }
 0x160   : > { %v13118_v32 = vpop.f32.mrb[60].mxu0 }
 0x161   : > { %16343 = vst [vmem:[#allocation44_spill] sm:$0xff] %v13118_v32  ;;  %v13120_v33 = vpop.f32.mrb[61].mxu0 }
 0x162   : > { %16344 = vst [vmem:[#allocation45_spill] sm:$0xff] %v13120_v33  ;;  %v13122_v34 = vpop.f32.mrb[32].mxu1 }
 0x163   : > { %v11124_v35 = vpop.f32.mrb[33].mxu1 }
 0x164   : > { %v11117_v38 = vpop.f32.mrb[62].mxu0 }
 0x165   : > { %v13127_v40 = vadd.f32 %v11117_v38, %v10290_v36  ;;  %v13129_v41 = vpop.f32.mrb[63].mxu0 }
 0x166   : > { %16346 = vst [vmem:[#allocation47_spill] sm:$0xff] %v13129_v41 }
 0x167   : > { %16345 = vst [vmem:[#allocation46_spill] sm:$0xff] %v13127_v40 }
 0x168   : > { %v13131_v42 = vpop.f32.mrb[64].mxu0 }
 0x169   : > { %v11180_v46 = vpop.f32.mrb[65].mxu0 }
 0x16a   : > { %v13133_v45 = vpop.f32.mrb[34].mxu1 }
 0x16b   : > { %v11131_v47 = vpop.f32.mrb[35].mxu1 }
 0x170   : > { %v13135_v49 = vpop.f32.mrb[66].mxu0 }
 0x171   : > { %v11194_v51 = vpop.f32.mrb[67].mxu0 }
 0x172   : > { %v13137_v50 = vpop.f32.mrb[36].mxu1 }
 0x173   : > { %v11138_v52 = vpop.f32.mrb[37].mxu1 }
 0x178   : > { %v13139_v53 = vpop.f32.mrb[68].mxu0 }
 0x179   : > { %v11208_v36 = vpop.f32.mrb[69].mxu0 }
 0x17a   : > { %v13141_v35 = vpop.f32.mrb[38].mxu1 }
 0x17b   : > { %v11145_v38 = vpop.f32.mrb[39].mxu1 }
 0x180   : > { %v13143_v39 = vpop.f32.mrb[70].mxu0 }
 0x181   : > { %v11222_v40 = vpop.f32.mrb[71].mxu0 }
 0x182   : > { %v13145_v3 = vpop.f32.mrb[40].mxu1 }
 0x183   : > { %v11152_v32 = vpop.f32.mrb[41].mxu1 }
 0x18a   : > { %v13147_v46 = vpop.f32.mrb[42].mxu1 }
 0x18b   : > { %v11159_v47 = vpop.f32.mrb[43].mxu1 }
 0x192   : > { %v13149_v41 = vpop.f32.mrb[44].mxu1 }
 0x193   : > { %v11166_v28 = vpop.f32.mrb[45].mxu1 }
 0x19a   : > { %v13151_v51 = vpop.f32.mrb[46].mxu1 }
 0x19b   : > { %v11173_v52 = vpop.f32.mrb[47].mxu1 }
 0x1a2   : > { %v13153_v33 = vpop.f32.mrb[48].mxu1 }
 0x1a3   : > { %v11187_v55 = vpop.f32.mrb[49].mxu1 }
 0x1aa   : > { %v13155_v36 = vpop.f32.mrb[50].mxu1 }
 0x1ab   : > { %v11201_v38 = vpop.f32.mrb[51].mxu1 }
 0x1b2   : > { %v13157_v25 = vpop.f32.mrb[52].mxu1 }
 0x1b3   : > { %v11215_v29 = vpop.f32.mrb[53].mxu1 }
 0x1ba   : > { %v13159_v40 = vpop.f32.mrb[54].mxu1 }
 0x1bb   : > { %16347 = vst [vmem:[#allocation48_spill] sm:$0xff] %v13159_v40  ;;  %v11229_v32 = vpop.f32.mrb[55].mxu1 }
 0x1c9   : > { %v13161_v47 = vpop.f32.mrb[72].mxu0 }
 0x1ca   : > { %v13163_v44 = vpop.f32.mrb[73].mxu0  ;;  %v3692_v28 = vsel %vm3688_vm3, %v13161_v47, -inf }
 0x1cb   : > { %3693 = vmax.xlane.f32.xlu1 %v3692_v28  ;;  %v3689_v38 = vsel %vm3688_vm3, %v13163_v44, -inf }
 0x1ce   : > { %v13167_v52 = vpop.f32.mrb[56].mxu1 }
 0x1cf   : > { %v13169_v55 = vpop.f32.mrb[57].mxu1  ;;  %3690 = vmax.xlane.f32.xlu1 %v3689_v38  ;;  %v3698_v32 = vsel %vm3688_vm3, %v13167_v52, -inf }
 0x1d0   : > { %v3695_v28 = vsel %vm3688_vm3, %v13169_v55, -inf }
 0x1d2   : > { %v13173_v29 = vpop.f32.mrb[74].mxu0 }
 0x1d3   : > { %v13177_v23 = vpop.f32.mrb[75].mxu0  ;;  %3699 = vmax.xlane.f32.xlu1 %v3698_v32  ;;  %v3704_v38 = vsel %vm3688_vm3, %v13173_v29, -inf }
 0x1d4   : > { %v3701_v32 = vsel %vm3688_vm3, %v13177_v23, -inf }
 0x1d6   : > { %v13179_v26 = vpop.f32.mrb[58].mxu1 }
 0x1d7   : > { %v13183_v30 = vpop.f32.mrb[59].mxu1  ;;  %3696 = vmax.xlane.f32.xlu1 %v3695_v28  ;;  %v3710_v28 = vsel %vm3688_vm3, %v13179_v26, -inf }
 0x1d8   : > { %v3707_v19 = vsel %vm3688_vm3, %v13183_v30, -inf }
 0x1da   : > { %v13185_v21 = vpop.f32.mrb[76].mxu0 }
 0x1db   : > { %v13189_v24 = vpop.f32.mrb[77].mxu0  ;;  %3705 = vmax.xlane.f32.xlu1 %v3704_v38  ;;  %v3716_v12 = vsel %vm3688_vm3, %v13185_v21, -inf }
 0x1de   : > { %v13191_v18 = vpop.f32.mrb[60].mxu1 }
 0x1df   : > { %v13195_v16 = vpop.f32.mrb[61].mxu1  ;;  %3702 = vmax.xlane.f32.xlu1 %v3701_v32 }
 0x1e0   : > { %v3719_v11 = vsel %vm3688_vm3, %v13195_v16, -inf }
 0x1e2   : > { %v13197_v22 = vpop.f32.mrb[78].mxu0 }
 0x1e3   : > { %v13199_v4 = vpop.f32.mrb[79].mxu0  ;;  %3711 = vmax.xlane.f32.xlu1 %v3710_v28 }
 0x1e4   : > { %v3725_v14 = vsel %vm3688_vm3, %v13199_v4, -inf }
 0x1e5   : > { %3726 = vmax.xlane.f32.xlu0 %v3725_v14  ;;  %v3713_v14 = vsel %vm3688_vm3, %v13189_v24, -inf }
 0x1e6   : > { %v13205_v38 = vpop.f32.mrb[62].mxu1 }
 0x1e7   : > { %v13209_v54 = vpop.f32.mrb[63].mxu1  ;;  %3708 = vmax.xlane.f32.xlu1 %v3707_v19  ;;  %v3722_v19 = vsel %vm3688_vm3, %v13191_v18, -inf }
 0x1ea   : > { %v13211_v32 = vpop.f32.mrb[80].mxu0 }
 0x1eb   : > { %v13215_v15 = vpop.f32.mrb[81].mxu0  ;;  %3717 = vmax.xlane.f32.xlu1 %v3716_v12 }
 0x1ec   : > { %v3737_v0 = vsel %vm3688_vm3, %v13215_v15, -inf }
 0x1ee   : > { %v13217_v28 = vpop.f32.mrb[64].mxu1 }
 0x1ef   : > { %v13221_v43 = vpop.f32.mrb[65].mxu1  ;;  %3714 = vmax.xlane.f32.xlu1 %v3713_v14 }
 0x1f2   : > { %v13223_v10 = vpop.f32.mrb[82].mxu0 }
 0x1f3   : > { %v13225_v13 = vpop.f32.mrb[83].mxu0  ;;  %3723 = vmax.xlane.f32.xlu1 %v3722_v19  ;;  %v3728_v19 = vsel %vm3688_vm3, %v13197_v22, -inf  ;;  %v3752_v48 = vsel %vm3688_vm3, %v13223_v10, -inf }
 0x1f4   : > { %v3749_v31 = vsel %vm3688_vm3, %v13225_v13, -inf }
 0x1f5   : > { %3750 = vmax.xlane.f32.xlu0 %v3749_v31 }
 0x1f6   : > { %v13231_v12 = vpop.f32.mrb[66].mxu1 }
 0x1f7   : > { %v13233_v5 = vpop.f32.mrb[67].mxu1  ;;  %3720 = vmax.xlane.f32.xlu1 %v3719_v11  ;;  %v3734_v11 = vsel %vm3688_vm3, %v13205_v38, -inf }
 0x1f8   : > { %v3755_v14 = vsel %vm3688_vm3, %v13233_v5, -inf }
 0x1f9   : > { %3756 = vmax.xlane.f32.xlu0 %v3755_v14 }
 0x1fa   : > { %v13239_v20 = vpop.f32.mrb[84].mxu0 }
 0x1fb   : > { %v13241_v1 = vpop.f32.mrb[85].mxu0  ;;  %3729 = vmax.xlane.f32.xlu1 %v3728_v19  ;;  %v3731_v19 = vsel %vm3688_vm3, %v13209_v54, -inf }
 0x1fc   : > { %v3761_v31 = vsel %vm3688_vm3, %v13241_v1, -inf }
 0x1fd   : > { %3762 = vmax.xlane.f32.xlu0 %v3761_v31 }
 0x1fe   : > { %v13247_v7 = vpop.f32.mrb[68].mxu1 }
 0x1ff   : > { %v13249_v9 = vpop.f32.mrb[69].mxu1  ;;  %3735 = vmax.xlane.f32.xlu1 %v3734_v11  ;;  %v3740_v11 = vsel %vm3688_vm3, %v13211_v32, -inf }
 0x200   : > { %v3767_v14 = vsel %vm3688_vm3, %v13249_v9, -inf }
 0x201   : > { %3768 = vmax.xlane.f32.xlu0 %v3767_v14 }
 0x202   : > { %v13255_v63 = vpop.f32.mrb[86].mxu0 }
 0x203   : > { %v13257_v2 = vpop.f32.mrb[87].mxu0  ;;  %3732 = vmax.xlane.f32.xlu1 %v3731_v19  ;;  %v3746_v19 = vsel %vm3688_vm3, %v13217_v28, -inf }
 0x204   : > { %v3773_v31 = vsel %vm3688_vm3, %v13257_v2, -inf }
 0x205   : > { %3774 = vmax.xlane.f32.xlu0 %v3773_v31  ;;  %v3743_v31 = vsel %vm3688_vm3, %v13221_v43, -inf }
 0x206   : > { %v13263_v60 = vpop.f32.mrb[70].mxu1 }
 0x207   : > { %v13265_v61 = vpop.f32.mrb[71].mxu1  ;;  %3741 = vmax.xlane.f32.xlu1 %v3740_v11  ;;  %v3758_v11 = vsel %vm3688_vm3, %v13231_v12, -inf }
 0x208   : > { %v3779_v14 = vsel %vm3688_vm3, %v13265_v61, -inf }
 0x209   : > { %3780 = vmax.xlane.f32.xlu0 %v3779_v14  ;;  %v3764_v14 = vsel %vm3688_vm3, %v13239_v20, -inf }
 0x20b   : > { %3738 = vmax.xlane.f32.xlu1 %v3737_v0  ;;  %v3770_v0 = vsel %vm3688_vm3, %v13247_v7, -inf }
 0x20f   : > { %3747 = vmax.xlane.f32.xlu1 %v3746_v19  ;;  %v3776_v19 = vsel %vm3688_vm3, %v13255_v63, -inf }
 0x213   : > { %3744 = vmax.xlane.f32.xlu1 %v3743_v31  ;;  %v3782_v31 = vsel %vm3688_vm3, %v13263_v60, -inf }
 0x217   : > { %3753 = vmax.xlane.f32.xlu1 %v3752_v48 }
 0x21b   : > { %3759 = vmax.xlane.f32.xlu1 %v3758_v11 }
 0x21f   : > { %3765 = vmax.xlane.f32.xlu1 %v3764_v14 }
 0x223   : > { %3771 = vmax.xlane.f32.xlu1 %v3770_v0 }
 0x227   : > { %3777 = vmax.xlane.f32.xlu1 %v3776_v19 }
 0x22b   : > { %3783 = vmax.xlane.f32.xlu1 %v3782_v31 }
 0x258   : > { %v3694_v48 = vpop.xlane.xlu1 %3693 }
 0x259   : > { %v3786_v58 = vsub.f32 %v13161_v47, %v3694_v48 }
 0x25b   : > { %v3819_v11 = vmul.f32 1.442695, %v3786_v58 }
 0x25c   : > { %v3691_v62 = vpop.xlane.xlu1 %3690 }
 0x25d   : > { %12090 = vpow2.f32 %v3819_v11  ;;  %v3785_v14 = vsub.f32 %v13163_v44, %v3691_v62 }
 0x25f   : > { %v3817_v37 = vmul.f32 1.442695, %v3785_v14 }
 0x260   : > { %v3700_v56 = vpop.xlane.xlu1 %3699 }
 0x261   : > { %12092 = vpow2.f32 %v3817_v37  ;;  %v3788_v0 = vsub.f32 %v13167_v52, %v3700_v56 }
 0x263   : > { %v3823_v59 = vmul.f32 1.442695, %v3788_v0 }
 0x264   : > { %v3697_v27 = vpop.xlane.xlu1 %3696 }
 0x265   : > { %12094 = vpow2.f32 %v3823_v59  ;;  %v3787_v19 = vsub.f32 %v13169_v55, %v3697_v27 }
 0x267   : > { %v13293_v40 = vpop.eup %12090  ;;  %v3821_v31 = vmul.f32 1.442695, %v3787_v19 }
 0x268   : > { %v3706_v57 = vpop.xlane.xlu1 %3705  ;;  %v3884_v58 = vsel %vm3688_vm3, %v13293_v40, 0.0 }
 0x269   : > { %12096 = vpow2.f32 %v3821_v31  ;;  %v3790_v44 = vsub.f32 %v13173_v29, %v3706_v57  ;;  %3885 = vadd.xlane.f32.xlu1 %v3884_v58 }
 0x26b   : > { %v13298_v62 = vpop.eup %12092  ;;  %v3827_v37 = vmul.f32 1.442695, %v3790_v44 }
 0x26c   : > { %v3703_v56 = vpop.xlane.xlu1 %3702  ;;  %v3881_v59 = vsel %vm3688_vm3, %v13298_v62, 0.0 }
 0x26d   : > { %12098 = vpow2.f32 %v3827_v37  ;;  %v3789_v27 = vsub.f32 %v13177_v23, %v3703_v56  ;;  %3882 = vadd.xlane.f32.xlu0 %v3881_v59  ;;  %v13320_v59 = vpop.permute.xlu0 %1170 }
 0x26f   : > { %v13303_v47 = vpop.eup %12094  ;;  %v3825_v52 = vmul.f32 1.442695, %v3789_v27 }
 0x270   : > { %v3712_v55 = vpop.xlane.xlu1 %3711  ;;  %v3890_v48 = vsel %vm3688_vm3, %v13303_v47, 0.0 }
 0x271   : > { %12100 = vpow2.f32 %v3825_v52  ;;  %v3792_v57 = vsub.f32 %v13179_v26, %v3712_v55  ;;  %3891 = vadd.xlane.f32.xlu1 %v3890_v48 }
 0x273   : > { %v13308_v29 = vpop.eup %12096  ;;  %v3831_v11 = vmul.f32 1.442695, %v3792_v57  ;;  %v3727_v57 = vpop.xlane.xlu0 %3726 }
 0x274   : > { %v3709_v14 = vpop.xlane.xlu1 %3708  ;;  %v3887_v0 = vsel %vm3688_vm3, %v13308_v29, 0.0 }
 0x275   : > { %12102 = vpow2.f32 %v3831_v11  ;;  %v3791_v23 = vsub.f32 %v13183_v30, %v3709_v14  ;;  %3888 = vadd.xlane.f32.xlu0 %v3887_v0 }
 0x277   : > { %v13313_v19 = vpop.eup %12098  ;;  %v3829_v31 = vmul.f32 1.442695, %v3791_v23  ;;  %v3797_v23 = vsub.f32 %v13199_v4, %v3727_v57 }
 0x278   : > { %v3718_v58 = vpop.xlane.xlu1 %3717  ;;  %v3896_v44 = vsel %vm3688_vm3, %v13313_v19, 0.0 }
 0x279   : > { %12104 = vpow2.f32 %v3829_v31  ;;  %v3794_v26 = vsub.f32 %v13185_v21, %v3718_v58  ;;  %3897 = vadd.xlane.f32.xlu1 %v3896_v44 }
 0x27b   : > { %v13318_v37 = vpop.eup %12100  ;;  %v3835_v56 = vmul.f32 1.442695, %v3794_v26 }
 0x27c   : > { %v3715_v27 = vpop.xlane.xlu1 %3714  ;;  %v3893_v30 = vsel %vm3688_vm3, %v13318_v37, 0.0 }
 0x27d   : > { %12106 = vpow2.f32 %v3835_v56  ;;  %v3793_v52 = vsub.f32 %v13189_v24, %v3715_v27  ;;  %3894 = vadd.xlane.f32.xlu0 %v3893_v30  ;;  %v3841_v56 = vmul.f32 1.442695, %v3797_v23 }
 0x27f   : > { %v13325_v55 = vpop.eup %12102  ;;  %v3833_v48 = vmul.f32 1.442695, %v3793_v52 }
 0x280   : > { %v3724_v11 = vpop.xlane.xlu1 %3723  ;;  %v3902_v21 = vsel %vm3688_vm3, %v13325_v55, 0.0 }
 0x281   : > { %12108 = vpow2.f32 %v3833_v48  ;;  %v3796_v14 = vsub.f32 %v13191_v18, %v3724_v11  ;;  %3903 = vadd.xlane.f32.xlu1 %v3902_v21 }
 0x283   : > { %v13330_v0 = vpop.eup %12104  ;;  %v3839_v31 = vmul.f32 1.442695, %v3796_v14 }
 0x284   : > { %v3721_v58 = vpop.xlane.xlu1 %3720  ;;  %v3899_v24 = vsel %vm3688_vm3, %v13330_v0, 0.0 }
 0x285   : > { %12110 = vpow2.f32 %v3839_v31  ;;  %v3795_v44 = vsub.f32 %v13195_v16, %v3721_v58  ;;  %3900 = vadd.xlane.f32.xlu0 %v3899_v24  ;;  %v3751_v58 = vpop.xlane.xlu0 %3750 }
 0x287   : > { %v13336_v26 = vpop.eup %12106  ;;  %v3837_v27 = vmul.f32 1.442695, %v3795_v44 }
 0x288   : > { %v3730_v30 = vpop.xlane.xlu1 %3729  ;;  %v3908_v18 = vsel %vm3688_vm3, %v13336_v26, 0.0 }
 0x289   : > { %12112 = vpow2.f32 %v3837_v27  ;;  %v3798_v4 = vsub.f32 %v13197_v22, %v3730_v30  ;;  %3909 = vadd.xlane.f32.xlu1 %v3908_v18 }
 0x28a   : > { %12114 = vpow2.f32 %v3841_v56 }
 0x28b   : > { %v13341_v52 = vpop.eup %12108  ;;  %v3843_v48 = vmul.f32 1.442695, %v3798_v4 }
 0x28c   : > { %v3736_v57 = vpop.xlane.xlu1 %3735  ;;  %v3905_v16 = vsel %vm3688_vm3, %v13341_v52, 0.0 }
 0x28d   : > { %12116 = vpow2.f32 %v3843_v48  ;;  %v3800_v11 = vsub.f32 %v13205_v38, %v3736_v57  ;;  %3906 = vadd.xlane.f32.xlu0 %v3905_v16  ;;  %v3757_v48 = vpop.xlane.xlu0 %3756 }
 0x28f   : > { %v13346_v21 = vpop.eup %12110  ;;  %v3847_v14 = vmul.f32 1.442695, %v3800_v11 }
 0x290   : > { %v3733_v23 = vpop.xlane.xlu1 %3732  ;;  %v3914_v22 = vsel %vm3688_vm3, %v13346_v21, 0.0 }
 0x291   : > { %12118 = vpow2.f32 %v3847_v14  ;;  %v3799_v31 = vsub.f32 %v13209_v54, %v3733_v23  ;;  %3915 = vadd.xlane.f32.xlu1 %v3914_v22 }
 0x293   : > { %v13351_v24 = vpop.eup %12112  ;;  %v3845_v44 = vmul.f32 1.442695, %v3799_v31 }
 0x294   : > { %v3742_v56 = vpop.xlane.xlu1 %3741  ;;  %v3911_v38 = vsel %vm3688_vm3, %v13351_v24, 0.0  ;;  %v13355_v27 = vpop.eup %12114 }
 0x295   : > { %12120 = vpow2.f32 %v3845_v44  ;;  %v3802_v30 = vsub.f32 %v13211_v32, %v3742_v56  ;;  %3912 = vadd.xlane.f32.xlu0 %v3911_v38  ;;  %v3917_v16 = vsel %vm3688_vm3, %v13355_v27, 0.0  ;;  %v3763_v44 = vpop.xlane.xlu0 %3762  ;;  %v3805_v38 = vsub.f32 %v13225_v13, %v3751_v58 }
 0x297   : > { %v13358_v18 = vpop.eup %12116  ;;  %v3851_v4 = vmul.f32 1.442695, %v3802_v30 }
 0x298   : > { %v3739_v54 = vpop.xlane.xlu1 %3738  ;;  %v3920_v57 = vsel %vm3688_vm3, %v13358_v18, 0.0 }
 0x299   : > { %12122 = vpow2.f32 %v3851_v4  ;;  %v3801_v11 = vsub.f32 %v13215_v15, %v3739_v54  ;;  %3921 = vadd.xlane.f32.xlu1 %v3920_v57  ;;  %3918 = vadd.xlane.f32.xlu0 %v3917_v16  ;;  %v3857_v16 = vmul.f32 1.442695, %v3805_v38 }
 0x29b   : > { %v13365_v14 = vpop.eup %12118  ;;  %v3849_v32 = vmul.f32 1.442695, %v3801_v11 }
 0x29c   : > { %v3748_v23 = vpop.xlane.xlu1 %3747  ;;  %v3926_v22 = vsel %vm3688_vm3, %v13365_v14, 0.0 }
 0x29d   : > { %12124 = vpow2.f32 %v3849_v32  ;;  %v3804_v31 = vsub.f32 %v13217_v28, %v3748_v23  ;;  %3927 = vadd.xlane.f32.xlu1 %v3926_v22  ;;  %v3807_v28 = vsub.f32 %v13233_v5, %v3757_v48  ;;  %v3769_v32 = vpop.xlane.xlu0 %3768 }
 0x29f   : > { %v13370_v56 = vpop.eup %12120  ;;  %v3855_v30 = vmul.f32 1.442695, %v3804_v31  ;;  %v3809_v31 = vsub.f32 %v13241_v1, %v3763_v44 }
 0x2a0   : > { %v3745_v15 = vpop.xlane.xlu1 %3744  ;;  %v3923_v4 = vsel %vm3688_vm3, %v13370_v56, 0.0 }
 0x2a1   : > { %12126 = vpow2.f32 %v3855_v30  ;;  %v3803_v54 = vsub.f32 %v13221_v43, %v3745_v15  ;;  %3924 = vadd.xlane.f32.xlu0 %v3923_v4  ;;  %v3861_v43 = vmul.f32 1.442695, %v3807_v28  ;;  %v3775_v15 = vpop.xlane.xlu0 %3774 }
 0x2a3   : > { %v13376_v57 = vpop.eup %12122  ;;  %v3853_v11 = vmul.f32 1.442695, %v3803_v54  ;;  %v3811_v54 = vsub.f32 %v13249_v9, %v3769_v32 }
 0x2a4   : > { %v3754_v23 = vpop.xlane.xlu1 %3753  ;;  %v3932_v13 = vsel %vm3688_vm3, %v13376_v57, 0.0 }
 0x2a5   : > { %12128 = vpow2.f32 %v3853_v11  ;;  %v3806_v58 = vsub.f32 %v13223_v10, %v3754_v23  ;;  %3933 = vadd.xlane.f32.xlu1 %v3932_v13  ;;  %v3865_v10 = vmul.f32 1.442695, %v3809_v31  ;;  %v3813_v23 = vsub.f32 %v13257_v2, %v3775_v15 }
 0x2a6   : > { %12130 = vpow2.f32 %v3857_v16 }
 0x2a7   : > { %v13382_v22 = vpop.eup %12124  ;;  %v3859_v30 = vmul.f32 1.442695, %v3806_v58  ;;  %v3781_v58 = vpop.xlane.xlu0 %3780 }
 0x2a8   : > { %v3760_v38 = vpop.xlane.xlu1 %3759  ;;  %v3929_v5 = vsel %vm3688_vm3, %v13382_v22, 0.0 }
 0x2a9   : > { %12132 = vpow2.f32 %v3859_v30  ;;  %v3808_v48 = vsub.f32 %v13231_v12, %v3760_v38  ;;  %3930 = vadd.xlane.f32.xlu0 %v3929_v5  ;;  %v3869_v12 = vmul.f32 1.442695, %v3811_v54  ;;  %v3873_v30 = vmul.f32 1.442695, %v3813_v23 }
 0x2aa   : > { %12134 = vpow2.f32 %v3861_v43  ;;  %v3815_v38 = vsub.f32 %v13265_v61, %v3781_v58 }
 0x2ab   : > { %v13388_v4 = vpop.eup %12126  ;;  %v3863_v16 = vmul.f32 1.442695, %v3808_v48 }
 0x2ac   : > { %v3766_v28 = vpop.xlane.xlu1 %3765  ;;  %v3938_v1 = vsel %vm3688_vm3, %v13388_v4, 0.0 }
 0x2ad   : > { %12136 = vpow2.f32 %v3863_v16  ;;  %v3810_v44 = vsub.f32 %v13239_v20, %v3766_v28  ;;  %3939 = vadd.xlane.f32.xlu1 %v3938_v1  ;;  %v3877_v16 = vmul.f32 1.442695, %v3815_v38 }
 0x2ae   : > { %12138 = vpow2.f32 %v3865_v10 }
 0x2af   : > { %v13394_v11 = vpop.eup %12128  ;;  %v3867_v13 = vmul.f32 1.442695, %v3810_v44 }
 0x2b0   : > { %v3772_v43 = vpop.xlane.xlu1 %3771  ;;  %v3935_v9 = vsel %vm3688_vm3, %v13394_v11, 0.0  ;;  %v13399_v32 = vpop.eup %12130 }
 0x2b1   : > { %12140 = vpow2.f32 %v3867_v13  ;;  %v3812_v31 = vsub.f32 %v13247_v7, %v3772_v43  ;;  %3936 = vadd.xlane.f32.xlu0 %v3935_v9  ;;  %v3941_v15 = vsel %vm3688_vm3, %v13399_v32, 0.0 }
 0x2b2   : > { %12142 = vpow2.f32 %v3869_v12 }
 0x2b3   : > { %v13402_v20 = vpop.eup %12132  ;;  %v3871_v5 = vmul.f32 1.442695, %v3812_v31 }
 0x2b4   : > { %v3778_v2 = vpop.xlane.xlu1 %3777  ;;  %v3944_v48 = vsel %vm3688_vm3, %v13402_v20, 0.0  ;;  %v13409_v10 = vpop.eup %12134 }
 0x2b5   : > { %12144 = vpow2.f32 %v3871_v5  ;;  %v3814_v7 = vsub.f32 %v13255_v63, %v3778_v2  ;;  %3945 = vadd.xlane.f32.xlu1 %v3944_v48  ;;  %3942 = vadd.xlane.f32.xlu0 %v3941_v15  ;;  %v3947_v44 = vsel %vm3688_vm3, %v13409_v10, 0.0 }
 0x2b6   : > { %12146 = vpow2.f32 %v3873_v30 }
 0x2b7   : > { %v13412_v54 = vpop.eup %12136  ;;  %v3875_v61 = vmul.f32 1.442695, %v3814_v7 }
 0x2b8   : > { %v3784_v28 = vpop.xlane.xlu1 %3783  ;;  %v3950_v1 = vsel %vm3688_vm3, %v13412_v54, 0.0  ;;  %v13418_v12 = vpop.eup %12138 }
 0x2b9   : > { %12148 = vpow2.f32 %v3875_v61  ;;  %v3816_v23 = vsub.f32 %v13263_v60, %v3784_v28  ;;  %3951 = vadd.xlane.f32.xlu1 %v3950_v1  ;;  %3948 = vadd.xlane.f32.xlu0 %v3947_v44  ;;  %v3953_v43 = vsel %vm3688_vm3, %v13418_v12, 0.0 }
 0x2ba   : > { %12150 = vpow2.f32 %v3877_v16 }
 0x2bb   : > { %v13421_v63 = vpop.eup %12140  ;;  %v3879_v13 = vmul.f32 1.442695, %v3816_v23 }
 0x2bc   : > { %v3956_v58 = vsel %vm3688_vm3, %v13421_v63, 0.0  ;;  %v13427_v9 = vpop.eup %12142 }
 0x2bd   : > { %12152 = vpow2.f32 %v3879_v13  ;;  %3957 = vadd.xlane.f32.xlu1 %v3956_v58  ;;  %3954 = vadd.xlane.f32.xlu0 %v3953_v43  ;;  %v3959_v30 = vsel %vm3688_vm3, %v13427_v9, 0.0 }
 0x2bf   : > { %v13429_v31 = vpop.eup %12144 }
 0x2c0   : > { %v3962_v60 = vsel %vm3688_vm3, %v13429_v31, 0.0  ;;  %v13435_v38 = vpop.eup %12146 }
 0x2c1   : > { %3963 = vadd.xlane.f32.xlu1 %v3962_v60  ;;  %3960 = vadd.xlane.f32.xlu0 %v3959_v30  ;;  %v3965_v48 = vsel %vm3688_vm3, %v13435_v38, 0.0 }
 0x2c3   : > { %v13437_v5 = vpop.eup %12148 }
 0x2c4   : > { %v3968_v2 = vsel %vm3688_vm3, %v13437_v5, 0.0  ;;  %v13443_v15 = vpop.eup %12150 }
 0x2c5   : > { %3969 = vadd.xlane.f32.xlu1 %v3968_v2  ;;  %3966 = vadd.xlane.f32.xlu0 %v3965_v48  ;;  %v3971_v61 = vsel %vm3688_vm3, %v13443_v15, 0.0 }
 0x2c7   : > { %v13445_v7 = vpop.eup %12152 }
 0x2c8   : > { %v3974_v16 = vsel %vm3688_vm3, %v13445_v7, 0.0 }
 0x2c9   : > { %3975 = vadd.xlane.f32.xlu1 %v3974_v16  ;;  %3972 = vadd.xlane.f32.xlu0 %v3971_v61 }
 0x2f6   : > { %v3886_v28 = vpop.xlane.xlu1 %3885 }
 0x2f7   : > { %12154 = vrcp.f32 %v3886_v28  ;;  %v16350_v28 = vmov 0.0|0.0  }
 0x2fa   : > { %v3883_v1 = vpop.xlane.xlu0 %3882 }
 0x2fb   : > { %12156 = vrcp.f32 %v3883_v1 }
 0x2fe   : > { %v3892_v44 = vpop.xlane.xlu1 %3891 }
 0x2ff   : > { %12158 = vrcp.f32 %v3892_v44 }
 0x301   : > { %v12155_v13 = vpop.eup %12154 }
 0x302   : > { %v3889_v23 = vpop.xlane.xlu0 %3888  ;;  %v4010_v43 = vmul.f32 %v12155_v13, %v13293_v40 }
 0x303   : > { %12160 = vrcp.f32 %v3889_v23  ;;  %v1243_v23 = vadd.f32 %v13122_v34, %v13320_v59 }
 0x305   : > { %v12157_v58 = vpop.eup %12156 }
 0x306   : > { %v4009_v60 = vmul.f32 %v12157_v58, %v13298_v62  ;;  %v3898_v30 = vpop.xlane.xlu1 %3897 }
 0x307   : > { %12162 = vrcp.f32 %v3898_v30 }
 0x308   : > { %v11839_v48 = vpack.c.bf16 %v4010_v43, %v4009_v60  ;;  %v16351_v43 = vmov 0.0  }
 0x309   : > { %v12159_v61 = vpop.eup %12158 }
 0x30a   : > { %11841 = vmatpush3.bf16.xpose.msk.msra.mxu0 %vm13455_vm4, %v11839_v48  ;;  %v3895_v16 = vpop.xlane.xlu0 %3894  ;;  %v4012_v62 = vmul.f32 %v12159_v61, %v13303_v47  ;;  %v1313_v48 = vadd.f32 %v13133_v45, %v13320_v59 }
 0x30b   : > { %12164 = vrcp.f32 %v3895_v16  ;;  %11846 = vmatprep.subr.bf16.mxu0 %v16350_v28 }
 0x30d   : > { %v12161_v40 = vpop.eup %12160 }
 0x30e   : > { %v4011_v1 = vmul.f32 %v12161_v40, %v13308_v29  ;;  %v3904_v44 = vpop.xlane.xlu1 %3903 }
 0x30f   : > { %12166 = vrcp.f32 %v3904_v44 }
 0x310   : > { %v11843_v13 = vpack.c.bf16 %v4012_v62, %v4011_v1  ;;  %v1383_v1 = vadd.f32 %v13137_v50, %v13320_v59 }
 0x311   : > { %11347 = vmatmul.mubr.msk.f32.vlgmr.msra.gmra.mrb[88].mxu0 %vm3688_vm3, %v1243_v23  ;;  %v12163_v60 = vpop.eup %12162 }
 0x312   : > { %11845 = vmatpush3.bf16.xpose.msk.msra.mxu1 %vm13455_vm4, %v11843_v13  ;;  %v3901_v58 = vpop.xlane.xlu0 %3900  ;;  %11360 = vmatprep.mubr.msk.f32.mxu0 %vm12324_vm2, %v16351_v43  ;;  %v4014_v29 = vmul.f32 %v12163_v60, %v13313_v19 }
 0x313   : > { %12168 = vrcp.f32 %v3901_v58  ;;  %11850 = vmatprep.subr.bf16.mxu1 %v16350_v28 }
 0x315   : > { %v12165_v47 = vpop.eup %12164 }
 0x316   : > { %v4013_v34 = vmul.f32 %v12165_v47, %v13318_v37  ;;  %v3910_v30 = vpop.xlane.xlu1 %3909  ;;  %v1453_v47 = vadd.f32 %v13141_v35, %v13320_v59 }
 0x317   : > { %12170 = vrcp.f32 %v3910_v30 }
 0x318   : > { %v11847_v16 = vpack.c.bf16 %v4014_v29, %v4013_v34 }
 0x319   : > { %11354 = vmatmul.mubr.msk.f32.vlgmr.msra.gmra.mrb[72].mxu1 %vm3688_vm3, %v1313_v48  ;;  %v12167_v40 = vpop.eup %12166 }
 0x31a   : > { %11849 = vmatpush3.bf16.xpose.msk.msra.mxu0 %vm13455_vm4, %v11847_v16  ;;  %v3907_v61 = vpop.xlane.xlu0 %3906  ;;  %11367 = vmatprep.mubr.msk.f32.mxu1 %vm12324_vm2, %v16351_v43  ;;  %v4016_v37 = vmul.f32 %v12167_v40, %v13325_v55  ;;  %v1523_v16 = vadd.f32 %v13145_v3, %v13320_v59 }
 0x31b   : > { %12172 = vrcp.f32 %v3907_v61  ;;  %11854 = vmatprep.subr.bf16.mxu0 %v16350_v28 }
 0x31d   : > { %v12169_v19 = vpop.eup %12168 }
 0x31e   : > { %v4015_v45 = vmul.f32 %v12169_v19, %v13330_v0  ;;  %v3916_v62 = vpop.xlane.xlu1 %3915 }
 0x31f   : > { %12174 = vrcp.f32 %v3916_v62 }
 0x320   : > { %v11851_v44 = vpack.c.bf16 %v4016_v37, %v4015_v45 }
 0x321   : > { %11361 = vmatmul.mubr.msk.f32.vlgmr.msra.gmra.mrb[90].mxu0 %vm3688_vm3, %v1383_v1  ;;  %v12171_v13 = vpop.eup %12170  ;;  %v1593_v1 = vadd.f32 %v13147_v46, %v13320_v59  ;;  %v1663_v46 = vadd.f32 %v13149_v41, %v13320_v59 }
 0x322   : > { %11853 = vmatpush3.bf16.xpose.msk.msra.mxu1 %vm13455_vm4, %v11851_v44  ;;  %v3913_v23 = vpop.xlane.xlu0 %3912  ;;  %11374 = vmatprep.mubr.msk.f32.mxu0 %vm12324_vm2, %v16351_v43  ;;  %v4018_v0 = vmul.f32 %v12171_v13, %v13336_v26 }
 0x323   : > { %12176 = vrcp.f32 %v3913_v23  ;;  %11858 = vmatprep.subr.bf16.mxu1 %v16350_v28 }
 0x325   : > { %v12173_v55 = vpop.eup %12172 }
 0x326   : > { %v4017_v50 = vmul.f32 %v12173_v55, %v13341_v52  ;;  %v3922_v58 = vpop.xlane.xlu1 %3921  ;;  %v3919_v60 = vpop.xlane.xlu0 %3918 }
 0x327   : > { %12178 = vrcp.f32 %v3922_v58 }
 0x328   : > { %12180 = vrcp.f32 %v3919_v60  ;;  %v11855_v29 = vpack.c.bf16 %v4018_v0, %v4017_v50  ;;  %v1733_v60 = vadd.f32 %v13151_v51, %v13320_v59 }
 0x329   : > { %11368 = vmatmul.mubr.msk.f32.vlgmr.msra.gmra.mrb[74].mxu1 %vm3688_vm3, %v1453_v47  ;;  %v12175_v26 = vpop.eup %12174 }
 0x32a   : > { %v3928_v34 = vpop.xlane.xlu1 %3927  ;;  %11857 = vmatpush3.bf16.xpose.msk.msra.mxu0 %vm13455_vm4, %v11855_v29  ;;  %11381 = vmatprep.mubr.msk.f32.mxu1 %vm12324_vm2, %v16351_v43  ;;  %v4020_v30 = vmul.f32 %v12175_v26, %v13346_v21 }
 0x32b   : > { %11862 = vmatprep.subr.bf16.mxu0 %v16350_v28  ;;  %12182 = vrcp.f32 %v3928_v34 }
 0x32d   : > { %v12177_v52 = vpop.eup %12176 }
 0x32e   : > { %v4019_v35 = vmul.f32 %v12177_v52, %v13351_v24  ;;  %v3925_v48 = vpop.xlane.xlu0 %3924 }
 0x32f   : > { %12184 = vrcp.f32 %v3925_v48 }
 0x330   : > { %v11859_v61 = vpack.c.bf16 %v4020_v30, %v4019_v35  ;;  %v1803_v35 = vadd.f32 %v13131_v42, %v13320_v59 }
 0x331   : > { %v12179_v40 = vpop.eup %12178  ;;  %11375 = vmatmul.mubr.msk.f32.vlgmr.msra.gmra.mrb[92].mxu0 %vm3688_vm3, %v1523_v16 }
 0x332   : > { %v12181_v19 = vpop.eup %12180  ;;  %v4022_v37 = vmul.f32 %v12179_v40, %v13358_v18  ;;  %v3934_v45 = vpop.xlane.xlu1 %3933  ;;  %11861 = vmatpush3.bf16.xpose.msk.msra.mxu1 %vm13455_vm4, %v11859_v61  ;;  %11388 = vmatprep.mubr.msk.f32.mxu0 %vm12324_vm2, %v16351_v43 }
 0x333   : > { %v4021_v21 = vmul.f32 %v12181_v19, %v13355_v27  ;;  %11866 = vmatprep.subr.bf16.mxu1 %v16350_v28  ;;  %12186 = vrcp.f32 %v3934_v45 }
 0x335   : > { %v11863_v3 = vpack.c.bf16 %v4022_v37, %v4021_v21  ;;  %v12183_v62 = vpop.eup %12182 }
 0x336   : > { %v3931_v24 = vpop.xlane.xlu0 %3930  ;;  %v4024_v27 = vmul.f32 %v12183_v62, %v13365_v14 }
 0x337   : > { %11865 = vmatpush3.bf16.xpose.msk.msra.mxu0 %vm13455_vm4, %v11863_v3  ;;  %12188 = vrcp.f32 %v3931_v24  ;;  %v1873_v24 = vadd.f32 %v13153_v33, %v13320_v59 }
 0x338   : > { %11870 = vmatprep.subr.bf16.mxu0 %v16350_v28 }
 0x339   : > { %v12185_v18 = vpop.eup %12184  ;;  %11382 = vmatmul.mubr.msk.f32.vlgmr.msra.gmra.mrb[76].mxu1 %vm3688_vm3, %v1593_v1 }
 0x33a   : > { %v4023_v44 = vmul.f32 %v12185_v18, %v13370_v56  ;;  %v3940_v23 = vpop.xlane.xlu1 %3939  ;;  %11395 = vmatprep.mubr.msk.f32.mxu1 %vm12324_vm2, %v16351_v43 }
 0x33b   : > { %12190 = vrcp.f32 %v3940_v23 }
 0x33c   : > { %v11867_v13 = vpack.c.bf16 %v4024_v27, %v4023_v44 }
 0x33d   : > { %v12187_v0 = vpop.eup %12186 }
 0x33e   : > { %11389 = vmatmul.mubr.msk.f32.vlgmr.msra.gmra.mrb[94].mxu0 %vm3688_vm3, %v1663_v46  ;;  %11869 = vmatpush3.bf16.xpose.msk.msra.mxu1 %vm13455_vm4, %v11867_v13  ;;  %v3937_v55 = vpop.xlane.xlu0 %3936  ;;  %v4026_v56 = vmul.f32 %v12187_v0, %v13376_v57 }
 0x33f   : > { %12192 = vrcp.f32 %v3937_v55  ;;  %11402 = vmatprep.mubr.msk.f32.mxu0 %vm12324_vm2, %v16351_v43  ;;  %11874 = vmatprep.subr.bf16.mxu1 %v16350_v28 }
 0x341   : > { %v12189_v14 = vpop.eup %12188 }
 0x342   : > { %v4025_v41 = vmul.f32 %v12189_v14, %v13382_v22  ;;  %v3946_v50 = vpop.xlane.xlu1 %3945  ;;  %v3943_v58 = vpop.xlane.xlu0 %3942 }
 0x343   : > { %12194 = vrcp.f32 %v3946_v50 }
 0x344   : > { %12196 = vrcp.f32 %v3943_v58  ;;  %v11871_v47 = vpack.c.bf16 %v4026_v56, %v4025_v41 }
 0x345   : > { %11396 = vmatmul.mubr.msk.f32.vlgmr.msra.gmra.mrb[78].mxu1 %vm3688_vm3, %v1733_v60  ;;  %v12191_v57 = vpop.eup %12190  ;;  %v16355_v60 = vld [vmem:[#allocation19_spill] sm:$0xff] }
 0x346   : > { %v3952_v29 = vpop.xlane.xlu1 %3951  ;;  %11873 = vmatpush3.bf16.xpose.msk.msra.mxu0 %vm13455_vm4, %v11871_v47  ;;  %v3949_v34 = vpop.xlane.xlu0 %3948  ;;  %11409 = vmatprep.mubr.msk.f32.mxu1 %vm12324_vm2, %v16351_v43  ;;  %v4028_v51 = vmul.f32 %v12191_v57, %v13388_v4  ;;  %v16357_v57 = vld [vmem:[#allocation3_spill] sm:$0xff] }
 0x347   : > { %12198 = vrcp.f32 %v3952_v29  ;;  %11878 = vmatprep.subr.bf16.mxu0 %v16350_v28  ;;  %v16356_v29 = vld [vmem:[#allocation16_spill] sm:$0xff] }
 0x348   : > { %12200 = vrcp.f32 %v3949_v34 }
 0x349   : > { %v12193_v22 = vpop.eup %12192 }
 0x34a   : > { %v4027_v26 = vmul.f32 %v12193_v22, %v13394_v11  ;;  %v3958_v52 = vpop.xlane.xlu1 %3957  ;;  %v3955_v30 = vpop.xlane.xlu0 %3954 }
 0x34b   : > { %12202 = vrcp.f32 %v3958_v52  ;;  %v16360_v52 = vld [vmem:[#allocation4_spill] sm:$0xff] }
 0x34c   : > { %12204 = vrcp.f32 %v3955_v30  ;;  %v11875_v48 = vpack.c.bf16 %v4028_v51, %v4027_v26  ;;  %v16359_v51 = vld [vmem:[#allocation18_spill] sm:$0xff]  ;;  %v16361_v30 = vld [vmem:[#allocation23_spill] sm:$0xff] }
 0x34d   : > { %v12195_v16 = vpop.eup %12194  ;;  %11403 = vmatmul.mubr.msk.f32.vlgmr.msra.gmra.mrb[96].mxu0 %vm3688_vm3, %v1803_v35 }
 0x34e   : > { %v12197_v61 = vpop.eup %12196  ;;  %v4030_v40 = vmul.f32 %v12195_v16, %v13402_v20  ;;  %v3964_v19 = vpop.xlane.xlu1 %3963  ;;  %11877 = vmatpush3.bf16.xpose.msk.msra.mxu1 %vm13455_vm4, %v11875_v48  ;;  %11416 = vmatprep.mubr.msk.f32.mxu0 %vm12324_vm2, %v16351_v43  ;;  %v16362_v48 = vld [vmem:[#allocation20_spill] sm:$0xff] }
 0x34f   : > { %v3961_v4 = vpop.xlane.xlu0 %3960  ;;  %v4029_v11 = vmul.f32 %v12197_v61, %v13399_v32  ;;  %12206 = vrcp.f32 %v3964_v19  ;;  %11882 = vmatprep.subr.bf16.mxu1 %v16350_v28  ;;  %v16363_v61 = vld [vmem:[#allocation5_spill] sm:$0xff] }
 0x350   : > { %12208 = vrcp.f32 %v3961_v4  ;;  %v16365_v4 = vld [vmem:[#allocation22_spill] sm:$0xff] }
 0x351   : > { %v12199_v42 = vpop.eup %12198  ;;  %v11879_v37 = vpack.c.bf16 %v4030_v40, %v4029_v11  ;;  %v16364_v40 = vld [vmem:[#allocation25_spill] sm:$0xff] }
 0x352   : > { %v12201_v45 = vpop.eup %12200  ;;  %v4032_v21 = vmul.f32 %v12199_v42, %v13412_v54  ;;  %v3970_v20 = vpop.xlane.xlu1 %3969  ;;  %v16366_v42 = vld [vmem:[#allocation6_spill] sm:$0xff] }
 0x353   : > { %v3967_v3 = vpop.xlane.xlu0 %3966  ;;  %v4031_v62 = vmul.f32 %v12201_v45, %v13409_v10  ;;  %12210 = vrcp.f32 %v3970_v20  ;;  %11881 = vmatpush3.bf16.xpose.msk.msra.mxu0 %vm13455_vm4, %v11879_v37  ;;  %v1943_v10 = vadd.f32 %v13135_v49, %v13320_v59  ;;  %v2013_v49 = vadd.f32 %v13155_v36, %v13320_v59  ;;  %v16367_v37 = vld [vmem:[#allocation27_spill] sm:$0xff] }
 0x354   : > { %12212 = vrcp.f32 %v3967_v3  ;;  %11886 = vmatprep.subr.bf16.mxu0 %v16350_v28  ;;  %v2083_v36 = vadd.f32 %v13139_v53, %v13320_v59  ;;  %v2153_v53 = vadd.f32 %v13157_v25, %v13320_v59  ;;  %v13616_v25 = vld [vmem:[%s16231_s6] ss:$0 sm:$0xff]  ;;  %v16369_v3 = vld [vmem:[#allocation7_spill] sm:$0xff] }
 0x355   : > { %v12203_v32 = vpop.eup %12202  ;;  %11410 = vmatmul.mubr.msk.f32.vlgmr.msra.gmra.mrb[80].mxu1 %vm3688_vm3, %v1873_v24  ;;  %v11883_v1 = vpack.c.bf16 %v4032_v21, %v4031_v62  ;;  %v987_v47 = vadd.f32 %v13616_v25, %v16355_v60  ;;  %v982_v34 = vadd.f32 %v13616_v25, %v16356_v29  ;;  %v992_v26 = vadd.f32 %v13616_v25, %v16359_v51  ;;  %v16368_v21 = vld [vmem:[#allocation24_spill] sm:$0xff]  ;;  %v16370_v24 = vld [vmem:[#allocation29_spill] sm:$0xff]  ;;  %v16390_v60 = vld [vmem:[#allocation14_spill] sm:$0xff] }
 0x356   : > { %v12205_v18 = vpop.eup %12204  ;;  %v4034_v54 = vmul.f32 %v12203_v32, %v13421_v63  ;;  %v3976_v27 = vpop.xlane.xlu1 %3975  ;;  %11423 = vmatprep.mubr.msk.f32.mxu1 %vm12324_vm2, %v16351_v43  ;;  %v1007_v35 = vadd.f32 %v13616_v25, %v16361_v30  ;;  %v1002_v16 = vadd.f32 %v13616_v25, %v16362_v48  ;;  %v1017_v19 = vadd.f32 %v13616_v25, %v16364_v40  ;;  %v16371_v32 = vld [vmem:[#allocation26_spill] sm:$0xff]  ;;  %v16394_v51 = vld [vmem:[#allocation45_spill] sm:$0xff]  ;;  %v16396_v48 = vld [vmem:[#allocation47_spill] sm:$0xff] }
 0x357   : > { %v3973_v44 = vpop.xlane.xlu0 %3972  ;;  %v4033_v33 = vmul.f32 %v12205_v18, %v13418_v12  ;;  %12214 = vrcp.f32 %v3976_v27  ;;  %11885 = vmatpush3.bf16.xpose.msk.msra.mxu1 %vm13455_vm4, %v11883_v1  ;;  %v1012_v11 = vadd.f32 %v13616_v25, %v16365_v4  ;;  %v1027_v45 = vadd.f32 %v13616_v25, %v16367_v37  ;;  %v16372_v18 = vld [vmem:[#allocation8_spill] sm:$0xff]  ;;  %v16395_v30 = vld [vmem:[#allocation42_spill] sm:$0xff] }
 0x358   : > { %12216 = vrcp.f32 %v3973_v44  ;;  %11890 = vmatprep.subr.bf16.mxu1 %v16350_v28  ;;  %v1022_v20 = vadd.f32 %v13616_v25, %v16368_v21  ;;  %v1037_v62 = vadd.f32 %v13616_v25, %v16370_v24  ;;  %v1032_v1 = vadd.f32 %v13616_v25, %v16371_v32  ;;  %v16374_v44 = vld [vmem:[#allocation28_spill] sm:$0xff]  ;;  %v16398_v4 = vld [vmem:[#allocation46_spill] sm:$0xff] }
 0x359   : > { %v12207_v23 = vpop.eup %12206  ;;  %v11887_v46 = vpack.c.bf16 %v4034_v54, %v4033_v33  ;;  %v16373_v54 = vld [vmem:[#allocation31_spill] sm:$0xff]  ;;  %v1042_v33 = vadd.f32 %v13616_v25, %v16374_v44  ;;  %v16397_v40 = vld [vmem:[#allocation44_spill] sm:$0xff] }
 0x35a   : > { %v12209_v63 = vpop.eup %12208  ;;  %v4036_v13 = vmul.f32 %v12207_v23, %v13429_v31  ;;  %11417 = vmatmul.mubr.msk.f32.vlgmr.msra.gmra.mrb[98].mxu0 %vm3688_vm3, %v1943_v10  ;;  %v1047_v27 = vadd.f32 %v13616_v25, %v16373_v54  ;;  %v16375_v10 = vld [vmem:[#allocation9_spill] sm:$0xff] }
 0x35b   : > { %v4035_v55 = vmul.f32 %v12209_v63, %v13427_v9  ;;  %11889 = vmatpush3.bf16.xpose.msk.msra.mxu0 %vm13455_vm4, %v11887_v46  ;;  %11430 = vmatprep.mubr.msk.f32.mxu0 %vm12324_vm2, %v16351_v43  ;;  %v16376_v23 = vld [vmem:[#allocation33_spill] sm:$0xff]  ;;  %v16377_v63 = vld [vmem:[#allocation30_spill] sm:$0xff] }
 0x35c   : > { %11894 = vmatprep.subr.bf16.mxu0 %v16350_v28  ;;  %v1057_v46 = vadd.f32 %v13616_v25, %v16376_v23 }
 0x35d   : > { %v12211_v12 = vpop.eup %12210  ;;  %v11891_v0 = vpack.c.bf16 %v4036_v13, %v4035_v55  ;;  %v1052_v13 = vadd.f32 %v13616_v25, %v16377_v63  ;;  %v16378_v55 = vld [vmem:[#allocation10_spill] sm:$0xff] }
 0x35e   : > { %v12213_v14 = vpop.eup %12212  ;;  %v4038_v31 = vmul.f32 %v12211_v12, %v13437_v5  ;;  %11424 = vmatmul.mubr.msk.f32.vlgmr.msra.gmra.mrb[82].mxu1 %vm3688_vm3, %v2013_v49  ;;  %v16379_v49 = vld [vmem:[#allocation35_spill] sm:$0xff] }
 0x35f   : > { %v4037_v9 = vmul.f32 %v12213_v14, %v13435_v38  ;;  %11893 = vmatpush3.bf16.xpose.msk.msra.mxu1 %vm13455_vm4, %v11891_v0  ;;  %11437 = vmatprep.mubr.msk.f32.mxu1 %vm12324_vm2, %v16351_v43  ;;  %v1067_v12 = vadd.f32 %v13616_v25, %v16379_v49  ;;  %v16380_v0 = vld [vmem:[#allocation32_spill] sm:$0xff] }
 0x360   : > { %11898 = vmatprep.subr.bf16.mxu1 %v16350_v28  ;;  %v1062_v14 = vadd.f32 %v13616_v25, %v16380_v0 }
 0x361   : > { %v12215_v56 = vpop.eup %12214  ;;  %v11895_v41 = vpack.c.bf16 %v4038_v31, %v4037_v9  ;;  %v16381_v31 = vld [vmem:[#allocation11_spill] sm:$0xff]  ;;  %v16382_v9 = vld [vmem:[#allocation37_spill] sm:$0xff] }
 0x362   : > { %v12217_v50 = vpop.eup %12216  ;;  %v4040_v5 = vmul.f32 %v12215_v56, %v13445_v7  ;;  %11431 = vmatmul.mubr.msk.f32.vlgmr.msra.gmra.mrb[100].mxu0 %vm3688_vm3, %v2083_v36  ;;  %v16352_v7 = vld [vmem:[#allocation17_spill] sm:$0xff]  ;;  %v1077_v36 = vadd.f32 %v13616_v25, %v16382_v9  ;;  %v16383_v56 = vld [vmem:[#allocation34_spill] sm:$0xff] }
 0x363   : > { %v4039_v38 = vmul.f32 %v12217_v50, %v13443_v15  ;;  %11897 = vmatpush3.bf16.xpose.msk.msra.mxu0 %vm13455_vm4, %v11895_v41  ;;  %11444 = vmatprep.mubr.msk.f32.mxu0 %vm12324_vm2, %v16351_v43  ;;  %v2223_v15 = vadd.f32 %v13143_v39, %v13320_v59  ;;  %v977_v58 = vadd.f32 %v13616_v25, %v16352_v7  ;;  %v16353_v39 = vld [vmem:[#allocation48_spill] sm:$0xff]  ;;  %v16388_v7 = vld [vmem:[#allocation41_spill] sm:$0xff] }
 0x364   : > { %11904 = vmatprep.subr.msk.bf16.mxu0 %vm12429_vm1, %v12868_v6  ;;  %v2293_v2 = vadd.f32 %v16353_v39, %v13320_v59  ;;  %v16358_v59 = vld [vmem:[#allocation21_spill] sm:$0xff]  ;;  %v1072_v41 = vadd.f32 %v13616_v25, %v16383_v56  ;;  %v16384_v50 = vld [vmem:[#allocation12_spill] sm:$0xff]  ;;  %v16389_v39 = vld [vmem:[#allocation38_spill] sm:$0xff] }
 0x365   : > { %v11899_v28 = vpack.c.bf16 %v4040_v5, %v4039_v38  ;;  %v997_v22 = vadd.f32 %v13616_v25, %v16358_v59  ;;  %v16385_v5 = vld [vmem:[#allocation39_spill] sm:$0xff] }
 0x366   : > { %11438 = vmatmul.mubr.msk.f32.vlgmr.msra.gmra.mrb[84].mxu1 %vm3688_vm3, %v2153_v53  ;;  %v1087_v38 = vadd.f32 %v13616_v25, %v16385_v5  ;;  %v16386_v53 = vld [vmem:[#allocation36_spill] sm:$0xff] }
 0x367   : > { %11901 = vmatpush3.bf16.xpose.msk.msra.mxu1 %vm13455_vm4, %v11899_v28  ;;  %11451 = vmatprep.mubr.msk.f32.mxu1 %vm12324_vm2, %v16351_v43  ;;  %v16354_v43 = vld [vmem:[#allocation2_spill] sm:$0xff]  ;;  %v1082_v28 = vadd.f32 %v13616_v25, %v16386_v53  ;;  %vm10117_vm2 = vcmask 982016  }
 0x368   : > { %11910 = vmatprep.subr.msk.bf16.mxu1 %vm12429_vm1, %v12879_v17 }
 0x36a   : > { %11445 = vmatmul.mubr.msk.f32.vlgmr.msra.gmra.mrb[102].mxu0 %vm3688_vm3, %v2223_v15  ;;  %v16387_v15 = vld [vmem:[#allocation13_spill] sm:$0xff] }
 0x36b   : > { %11907 = vmatpush3.bf16.xpose.msk.msra.mxu0 %vm12429_vm1, %v12868_v6  ;;  %11458 = vmatprep.mubr.msk.f32.mxu0 %vm347_vm0, %v977_v58  ;;  %v1097_v58 = vadd.f32 %v13616_v25, %v16388_v7 }
 0x36c   : > { %11916 = vmatprep.subr.msk.bf16.mxu0 %vm12429_vm1, %v16354_v43 }
 0x36e   : > { %11452 = vmatmul.mubr.msk.f32.vlgmr.msra.gmra.mrb[86].mxu1 %vm3688_vm3, %v2293_v2  ;;  %v1092_v2 = vadd.f32 %v13616_v25, %v16389_v39 }
 0x36f   : > { %11913 = vmatpush3.bf16.xpose.msk.msra.mxu1 %vm12429_vm1, %v12879_v17  ;;  %11465 = vmatprep.mubr.msk.f32.mxu1 %vm347_vm0, %v987_v47  ;;  %v16391_v47 = vld [vmem:[#allocation43_spill] sm:$0xff] }
 0x370   : > { %11922 = vmatprep.subr.msk.bf16.mxu1 %vm12429_vm1, %v16357_v57  ;;  %v1107_v29 = vadd.f32 %v13616_v25, %v16391_v47 }
 0x372   : > { %11459 = vmatmul.mubr.msk.f32.vlgmr.msra.gmra.mrb[104].mxu0 %vm347_vm0, %v982_v34  ;;  %v16392_v34 = vld [vmem:[#allocation40_spill] sm:$0xff] }
 0x373   : > { %11919 = vmatpush3.bf16.xpose.msk.msra.mxu0 %vm12429_vm1, %v16354_v43  ;;  %11472 = vmatprep.mubr.msk.f32.mxu0 %vm347_vm0, %v997_v22  ;;  %v1102_v59 = vadd.f32 %v13616_v25, %v16392_v34  ;;  %v16393_v22 = vld [vmem:[#allocation15_spill] sm:$0xff] }
 0x374   : > { %11928 = vmatprep.subr.msk.bf16.mxu0 %vm12429_vm1, %v16360_v52 }
 0x376   : > { %11466 = vmatmul.mubr.msk.f32.vlgmr.msra.gmra.mrb[88].mxu1 %vm347_vm0, %v992_v26  ;;  %v1117_v26 = vadd.f32 %v13616_v25, %v16394_v51 }
 0x377   : > { %11925 = vmatpush3.bf16.xpose.msk.msra.mxu1 %vm12429_vm1, %v16357_v57  ;;  %11479 = vmatprep.mubr.msk.f32.mxu1 %vm347_vm0, %v1007_v35  ;;  %v1112_v35 = vadd.f32 %v13616_v25, %v16395_v30 }
 0x378   : > { %11934 = vmatprep.subr.msk.bf16.mxu1 %vm12429_vm1, %v16363_v61 }
 0x37a   : > { %11473 = vmatmul.mubr.msk.f32.vlgmr.msra.gmra.mrb[106].mxu0 %vm347_vm0, %v1002_v16  ;;  %v1127_v16 = vadd.f32 %v13616_v25, %v16396_v48 }
 0x37b   : > { %11931 = vmatpush3.bf16.xpose.msk.msra.mxu0 %vm12429_vm1, %v16360_v52  ;;  %11486 = vmatprep.mubr.msk.f32.mxu0 %vm347_vm0, %v1017_v19  ;;  %v1122_v19 = vadd.f32 %v13616_v25, %v16397_v40 }
 0x37c   : > { %11940 = vmatprep.subr.msk.bf16.mxu0 %vm12429_vm1, %v16366_v42 }
 0x37e   : > { %11480 = vmatmul.mubr.msk.f32.vlgmr.msra.gmra.mrb[90].mxu1 %vm347_vm0, %v1012_v11 }
 0x37f   : > { %11937 = vmatpush3.bf16.xpose.msk.msra.mxu1 %vm12429_vm1, %v16363_v61  ;;  %11493 = vmatprep.mubr.msk.f32.mxu1 %vm347_vm0, %v1027_v45 }
 0x380   : > { %11946 = vmatprep.subr.msk.bf16.mxu1 %vm12429_vm1, %v16369_v3 }
 0x382   : > { %11487 = vmatmul.mubr.msk.f32.vlgmr.msra.gmra.mrb[108].mxu0 %vm347_vm0, %v1022_v20 }
 0x383   : > { %11943 = vmatpush3.bf16.xpose.msk.msra.mxu0 %vm12429_vm1, %v16366_v42  ;;  %11500 = vmatprep.mubr.msk.f32.mxu0 %vm347_vm0, %v1037_v62 }
 0x384   : > { %11952 = vmatprep.subr.msk.bf16.mxu0 %vm12429_vm1, %v16372_v18 }
 0x386   : > { %11494 = vmatmul.mubr.msk.f32.vlgmr.msra.gmra.mrb[92].mxu1 %vm347_vm0, %v1032_v1 }
 0x387   : > { %11949 = vmatpush3.bf16.xpose.msk.msra.mxu1 %vm12429_vm1, %v16369_v3  ;;  %11507 = vmatprep.mubr.msk.f32.mxu1 %vm347_vm0, %v1047_v27 }
 0x388   : > { %11958 = vmatprep.subr.msk.bf16.mxu1 %vm12429_vm1, %v16375_v10 }
 0x38a   : > { %11501 = vmatmul.mubr.msk.f32.vlgmr.msra.gmra.mrb[110].mxu0 %vm347_vm0, %v1042_v33 }
 0x38b   : > { %11955 = vmatpush3.bf16.xpose.msk.msra.mxu0 %vm12429_vm1, %v16372_v18  ;;  %11514 = vmatprep.mubr.msk.f32.mxu0 %vm347_vm0, %v1057_v46 }
 0x38c   : > { %11964 = vmatprep.subr.msk.bf16.mxu0 %vm12429_vm1, %v16378_v55 }
 0x38e   : > { %11508 = vmatmul.mubr.msk.f32.vlgmr.msra.gmra.mrb[94].mxu1 %vm347_vm0, %v1052_v13 }
 0x38f   : > { %11961 = vmatpush3.bf16.xpose.msk.msra.mxu1 %vm12429_vm1, %v16375_v10  ;;  %11521 = vmatprep.mubr.msk.f32.mxu1 %vm347_vm0, %v1067_v12 }
 0x390   : > { %11970 = vmatprep.subr.msk.bf16.mxu1 %vm12429_vm1, %v16381_v31 }
 0x392   : > { %11515 = vmatmul.mubr.msk.f32.vlgmr.msra.gmra.mrb[112].mxu0 %vm347_vm0, %v1062_v14 }
 0x393   : > { %11967 = vmatpush3.bf16.xpose.msk.msra.mxu0 %vm12429_vm1, %v16378_v55  ;;  %11528 = vmatprep.mubr.msk.f32.mxu0 %vm347_vm0, %v1077_v36 }
 0x394   : > { %11976 = vmatprep.subr.msk.bf16.mxu0 %vm12429_vm1, %v16384_v50 }
 0x396   : > { %11522 = vmatmul.mubr.msk.f32.vlgmr.msra.gmra.mrb[96].mxu1 %vm347_vm0, %v1072_v41 }
 0x397   : > { %11973 = vmatpush3.bf16.xpose.msk.msra.mxu1 %vm12429_vm1, %v16381_v31  ;;  %11535 = vmatprep.mubr.msk.f32.mxu1 %vm347_vm0, %v1087_v38 }
 0x398   : > { %11982 = vmatprep.subr.msk.bf16.mxu1 %vm12429_vm1, %v16387_v15 }
 0x39a   : > { %11529 = vmatmul.mubr.msk.f32.vlgmr.msra.gmra.mrb[114].mxu0 %vm347_vm0, %v1082_v28 }
 0x39b   : > { %11979 = vmatpush3.bf16.xpose.msk.msra.mxu0 %vm12429_vm1, %v16384_v50  ;;  %11542 = vmatprep.mubr.msk.f32.mxu0 %vm347_vm0, %v1097_v58 }
 0x39c   : > { %11988 = vmatprep.subr.msk.bf16.mxu0 %vm12429_vm1, %v16390_v60 }
 0x39e   : > { %11536 = vmatmul.mubr.msk.f32.vlgmr.msra.gmra.mrb[98].mxu1 %vm347_vm0, %v1092_v2 }
 0x39f   : > { %11985 = vmatpush3.bf16.xpose.msk.msra.mxu1 %vm12429_vm1, %v16387_v15  ;;  %11549 = vmatprep.mubr.msk.f32.mxu1 %vm347_vm0, %v1107_v29 }
 0x3a0   : > { %11994 = vmatprep.subr.msk.bf16.mxu1 %vm12429_vm1, %v16393_v22 }
 0x3a2   : > { %11543 = vmatmul.mubr.msk.f32.vlgmr.msra.gmra.mrb[116].mxu0 %vm347_vm0, %v1102_v59 }
 0x3a3   : > { %11991 = vmatpush3.bf16.xpose.msk.msra.mxu0 %vm12429_vm1, %v16390_v60  ;;  %11556 = vmatprep.mubr.msk.f32.mxu0 %vm347_vm0, %v1117_v26 }
 0x3a4   : > { %11999 = vmatprep.subr.bf16.mxu0 %v12868_v6 }
 0x3a6   : > { %11550 = vmatmul.mubr.msk.f32.vlgmr.msra.gmra.mrb[100].mxu1 %vm347_vm0, %v1112_v35 }
 0x3a7   : > { %11997 = vmatpush3.bf16.xpose.msk.msra.mxu1 %vm12429_vm1, %v16393_v22  ;;  %11563 = vmatprep.mubr.msk.f32.mxu1 %vm347_vm0, %v1127_v16  ;;  %vm10084_vm1 = vcmask 850944  }
 0x3a8   : > { %12003 = vmatprep.subr.bf16.mxu1 %v12879_v17 }
 0x3aa   : > { %11557 = vmatmul.mubr.msk.f32.vlgmr.msra.gmra.mrb[118].mxu0 %vm347_vm0, %v1122_v19 }
 0x3ab   : > { %12001 = vmatpush3.bf16.msra.mxu0 %v12868_v6 }
 0x3ac   : > { %12007 = vmatprep.subr.bf16.mxu0 %v16354_v43 }
 0x3ae   : > { %11564 = vmatmul.mubr.msk.f32.vlgmr.msra.gmra.mrb[102].mxu1 %vm347_vm0, %v16398_v4 }
 0x3af   : > { %12005 = vmatpush3.bf16.msra.mxu1 %v12879_v17 }
 0x3b0   : > { %12011 = vmatprep.subr.bf16.mxu1 %v16357_v57 }
 0x3e4   : > { %v13813_v8 = vpop.f32.mrb[88].mxu0 }
 0x3e5   : > { %16399 = vst [vmem:[#allocation17_spill] sm:$0xff] %v13813_v8  ;;  %v11348_v11 = vpop.f32.mrb[89].mxu0  ;;  %v8345_v25 = vrot.slane %v13813_v8, 1  ;;  %v8409_v37 = vrot.slane %v13813_v8, 2  ;;  %v8473_v17 = vrot.slane %v13813_v8, 3  ;;  %v8537_v20 = vrot.slane %v13813_v8, 4 }
 0x3e6   : > { %v8601_v1 = vrot.slane %v13813_v8, 5  ;;  %v8665_v27 = vrot.slane %v13813_v8, 6  ;;  %v8729_v46 = vrot.slane %v13813_v8, 7 }
 0x3e7   : > { %8361 = vrot.lane.b32.xlu0 %v8345_v25, %s12327_s30 }
 0x3eb   : > { %8425 = vrot.lane.b32.xlu0 %v8409_v37, %s12328_s9 }
 0x3ec   : > { %v13819_v6 = vpop.f32.mrb[72].mxu1 }
 0x3ed   : > { %16400 = vst [vmem:[#allocation48_spill] sm:$0xff] %v13819_v6  ;;  %v11355_v45 = vpop.f32.mrb[73].mxu1  ;;  %v8346_v21 = vrot.slane %v13819_v6, 1  ;;  %v8410_v24 = vrot.slane %v13819_v6, 2  ;;  %v8474_v54 = vrot.slane %v13819_v6, 3  ;;  %v8538_v44 = vrot.slane %v13819_v6, 4 }
 0x3ee   : > { %v8602_v63 = vrot.slane %v13819_v6, 5  ;;  %v8666_v13 = vrot.slane %v13819_v6, 6  ;;  %v8730_v14 = vrot.slane %v13819_v6, 7 }
 0x3ef   : > { %8489 = vrot.lane.b32.xlu0 %v8473_v17, %s12329_s10  ;;  %8363 = vrot.lane.b32.xlu1 %v8346_v21, %s12327_s30 }
 0x3f3   : > { %8553 = vrot.lane.b32.xlu0 %v8537_v20, %s12330_s11  ;;  %8427 = vrot.lane.b32.xlu1 %v8410_v24, %s12328_s9 }
 0x3f4   : > { %v13829_v62 = vpop.f32.mrb[90].mxu0 }
 0x3f5   : > { %16401 = vst [vmem:[#allocation2_spill] sm:$0xff] %v13829_v62  ;;  %v11362_v32 = vpop.f32.mrb[91].mxu0  ;;  %v8411_v49 = vrot.slane %v13829_v62, 2  ;;  %v8475_v9 = vrot.slane %v13829_v62, 3  ;;  %v8539_v36 = vrot.slane %v13829_v62, 4  ;;  %v8347_v56 = vrot.slane %v13829_v62, 1 }
 0x3f6   : > { %v8603_v38 = vrot.slane %v13829_v62, 5  ;;  %v8667_v7 = vrot.slane %v13829_v62, 6  ;;  %v8731_v2 = vrot.slane %v13829_v62, 7 }
 0x3f7   : > { %8617 = vrot.lane.b32.xlu0 %v8601_v1, %s12331_s12  ;;  %8491 = vrot.lane.b32.xlu1 %v8474_v54, %s12329_s10 }
 0x3fb   : > { %8681 = vrot.lane.b32.xlu0 %v8665_v27, %s12332_s13  ;;  %8555 = vrot.lane.b32.xlu1 %v8538_v44, %s12330_s11 }
 0x3fc   : > { %v13839_v33 = vpop.f32.mrb[74].mxu1 }
 0x3fd   : > { %16402 = vst [vmem:[#allocation19_spill] sm:$0xff] %v13839_v33  ;;  %v11369_v23 = vpop.f32.mrb[75].mxu1  ;;  %v8348_v53 = vrot.slane %v13839_v33, 1  ;;  %v8412_v58 = vrot.slane %v13839_v33, 2  ;;  %v8476_v47 = vrot.slane %v13839_v33, 3  ;;  %v8540_v59 = vrot.slane %v13839_v33, 4 }
 0x3fe   : > { %v8604_v26 = vrot.slane %v13839_v33, 5  ;;  %v8668_v16 = vrot.slane %v13839_v33, 6  ;;  %v8732_v19 = vrot.slane %v13839_v33, 7 }
 0x3ff   : > { %8745 = vrot.lane.b32.xlu0 %v8729_v46, %s12333_s14  ;;  %8619 = vrot.lane.b32.xlu1 %v8602_v63, %s12331_s12 }
 0x403   : > { %8683 = vrot.lane.b32.xlu1 %v8666_v13, %s12332_s13  ;;  %8429 = vrot.lane.b32.xlu0 %v8411_v49, %s12328_s9 }
 0x404   : > { %v13849_v12 = vpop.f32.mrb[92].mxu0 }
 0x405   : > { %16403 = vst [vmem:[#allocation16_spill] sm:$0xff] %v13849_v12  ;;  %v11376_v0 = vpop.f32.mrb[93].mxu0  ;;  %v8349_v51 = vrot.slane %v13849_v12, 1  ;;  %v8413_v30 = vrot.slane %v13849_v12, 2  ;;  %v8477_v40 = vrot.slane %v13849_v12, 3  ;;  %v8541_v4 = vrot.slane %v13849_v12, 4 }
 0x406   : > { %v8605_v37 = vrot.slane %v13849_v12, 5  ;;  %v8669_v21 = vrot.slane %v13849_v12, 6  ;;  %v8733_v1 = vrot.slane %v13849_v12, 7 }
 0x407   : > { %8747 = vrot.lane.b32.xlu1 %v8730_v14, %s12333_s14  ;;  %8493 = vrot.lane.b32.xlu0 %v8475_v9, %s12329_s10 }
 0x40b   : > { %8557 = vrot.lane.b32.xlu0 %v8539_v36, %s12330_s11  ;;  %8365 = vrot.lane.b32.xlu1 %v8347_v56, %s12327_s30 }
 0x40c   : > { %v13859_v41 = vpop.f32.mrb[76].mxu1 }
 0x40d   : > { %16404 = vst [vmem:[#allocation3_spill] sm:$0xff] %v13859_v41  ;;  %v11383_v5 = vpop.f32.mrb[77].mxu1  ;;  %v8350_v45 = vrot.slane %v13859_v41, 1  ;;  %v8414_v20 = vrot.slane %v13859_v41, 2  ;;  %v8478_v54 = vrot.slane %v13859_v41, 3  ;;  %v8542_v23 = vrot.slane %v13859_v41, 4 }
 0x40e   : > { %v8606_v49 = vrot.slane %v13859_v41, 5  ;;  %v8670_v36 = vrot.slane %v13859_v41, 6 }
 0x40f   : > { %8621 = vrot.lane.b32.xlu0 %v8603_v38, %s12331_s12  ;;  %8367 = vrot.lane.b32.xlu1 %v8348_v53, %s12327_s30  ;;  %v8734_v53 = vrot.slane %v13859_v41, 7 }
 0x411   : > { %v13865_v28 = vpop.f32.mrb[94].mxu0 }
 0x412   : > { %16405 = vst [vmem:[#allocation21_spill] sm:$0xff] %v13865_v28  ;;  %v11390_v39 = vpop.f32.mrb[95].mxu0  ;;  %v8351_v46 = vrot.slane %v13865_v28, 1  ;;  %v8415_v0 = vrot.slane %v13865_v28, 2  ;;  %v8479_v56 = vrot.slane %v13865_v28, 3 }
 0x413   : > { %8685 = vrot.lane.b32.xlu0 %v8667_v7, %s12332_s13  ;;  %8431 = vrot.lane.b32.xlu1 %v8412_v58, %s12328_s9  ;;  %v8543_v7 = vrot.slane %v13865_v28, 4 }
 0x417   : > { %8749 = vrot.lane.b32.xlu0 %v8731_v2, %s12333_s14  ;;  %8495 = vrot.lane.b32.xlu1 %v8476_v47, %s12329_s10  ;;  %v8607_v2 = vrot.slane %v13865_v28, 5 }
 0x418   : > { %v13875_v29 = vpop.f32.mrb[78].mxu1 }
 0x419   : > { %16406 = vst [vmem:[#allocation18_spill] sm:$0xff] %v13875_v29  ;;  %v11397_v34 = vpop.f32.mrb[79].mxu1  ;;  %v8352_v47 = vrot.slane %v13875_v29, 1 }
 0x41b   : > { %8559 = vrot.lane.b32.xlu1 %v8540_v59, %s12330_s11  ;;  %8369 = vrot.lane.b32.xlu0 %v8349_v51, %s12327_s30 }
 0x41f   : > { %8623 = vrot.lane.b32.xlu1 %v8604_v26, %s12331_s12  ;;  %8433 = vrot.lane.b32.xlu0 %v8413_v30, %s12328_s9 }
 0x420   : > { %v13885_v35 = vpop.f32.mrb[96].mxu0 }
 0x421   : > { %16407 = vst [vmem:[#allocation4_spill] sm:$0xff] %v13885_v35  ;;  %v11404_v48 = vpop.f32.mrb[97].mxu0 }
 0x422   : > { %v8671_v48 = vrot.slane %v13865_v28, 6 }
 0x423   : > { %8687 = vrot.lane.b32.xlu1 %v8668_v16, %s12332_s13  ;;  %8497 = vrot.lane.b32.xlu0 %v8477_v40, %s12329_s10  ;;  %v8416_v16 = vrot.slane %v13875_v29, 2 }
 0x427   : > { %8751 = vrot.lane.b32.xlu1 %v8732_v19, %s12333_s14  ;;  %8561 = vrot.lane.b32.xlu0 %v8541_v4, %s12330_s11 }
 0x428   : > { %v13895_v11 = vpop.f32.mrb[80].mxu1 }
 0x429   : > { %16408 = vst [vmem:[#allocation23_spill] sm:$0xff] %v13895_v11  ;;  %v11411_v25 = vpop.f32.mrb[81].mxu1 }
 0x42b   : > { %8625 = vrot.lane.b32.xlu0 %v8605_v37, %s12331_s12  ;;  %8371 = vrot.lane.b32.xlu1 %v8350_v45, %s12327_s30 }
 0x42d   : > { %v13901_v17 = vpop.f32.mrb[98].mxu0 }
 0x42e   : > { %16409 = vst [vmem:[#allocation20_spill] sm:$0xff] %v13901_v17  ;;  %v11418_v24 = vpop.f32.mrb[99].mxu0 }
 0x42f   : > { %8689 = vrot.lane.b32.xlu0 %v8669_v21, %s12332_s13  ;;  %8435 = vrot.lane.b32.xlu1 %v8414_v20, %s12328_s9  ;;  %v8735_v20 = vrot.slane %v13865_v28, 7  ;;  %v8480_v24 = vrot.slane %v13875_v29, 3 }
 0x431   : > { %v13907_v32 = vpop.f32.mrb[82].mxu1 }
 0x432   : > { %16410 = vst [vmem:[#allocation5_spill] sm:$0xff] %v13907_v32  ;;  %v11425_v27 = vpop.f32.mrb[83].mxu1  ;;  %v16432_v50 = vrot.slane %v13907_v32, 1 }
 0x433   : > { %8753 = vrot.lane.b32.xlu0 %v8733_v1, %s12333_s14  ;;  %8499 = vrot.lane.b32.xlu1 %v8478_v54, %s12329_s10 }
 0x435   : > { %v13913_v44 = vpop.f32.mrb[100].mxu0 }
 0x436   : > { %16411 = vst [vmem:[#allocation25_spill] sm:$0xff] %v13913_v44  ;;  %v11432_v63 = vpop.f32.mrb[101].mxu0 }
 0x437   : > { %8563 = vrot.lane.b32.xlu1 %v8542_v23, %s12330_s11  ;;  %8373 = vrot.lane.b32.xlu0 %v8351_v46, %s12327_s30 }
 0x439   : > { %v13919_v13 = vpop.f32.mrb[84].mxu1 }
 0x43a   : > { %16412 = vst [vmem:[#allocation22_spill] sm:$0xff] %v13919_v13  ;;  %v11439_v14 = vpop.f32.mrb[85].mxu1 }
 0x43b   : > { %8627 = vrot.lane.b32.xlu1 %v8606_v49, %s12331_s12  ;;  %8437 = vrot.lane.b32.xlu0 %v8415_v0, %s12328_s9  ;;  %v8544_v14 = vrot.slane %v13875_v29, 4 }
 0x43d   : > { %v13925_v9 = vpop.f32.mrb[102].mxu0 }
 0x43e   : > { %16413 = vst [vmem:[#allocation6_spill] sm:$0xff] %v13925_v9  ;;  %v11446_v5 = vpop.f32.mrb[103].mxu0 }
 0x43f   : > { %8691 = vrot.lane.b32.xlu1 %v8670_v36, %s12332_s13  ;;  %8501 = vrot.lane.b32.xlu0 %v8479_v56, %s12329_s10  ;;  %v8353_v56 = vrot.slane %v13885_v35, 1  ;;  %v8608_v5 = vrot.slane %v13875_v29, 5 }
 0x441   : > { %v13931_v38 = vpop.f32.mrb[86].mxu1 }
 0x442   : > { %16414 = vst [vmem:[#allocation27_spill] sm:$0xff] %v13931_v38  ;;  %v11453_v58 = vpop.f32.mrb[87].mxu1 }
 0x443   : > { %8755 = vrot.lane.b32.xlu1 %v8734_v53, %s12333_s14  ;;  %8565 = vrot.lane.b32.xlu0 %v8543_v7, %s12330_s11  ;;  %v8672_v53 = vrot.slane %v13875_v29, 6 }
 0x445   : > { %v13937_v39 = vpop.f32.mrb[104].mxu0 }
 0x446   : > { %v6602_v34 = vsel %vm3688_vm3, %v13937_v39, -inf  ;;  %v13943_v59 = vpop.f32.mrb[105].mxu0 }
 0x447   : > { %v6601_v51 = vsel %vm3688_vm3, %v13943_v59, -inf  ;;  %8629 = vrot.lane.b32.xlu0 %v8607_v2, %s12331_s12  ;;  %8375 = vrot.lane.b32.xlu1 %v8352_v47, %s12327_s30 }
 0x448   : > { %v6603_v26 = vmax.f32 %v6601_v51, %v6602_v34 }
 0x449   : > { %v13949_v30 = vpop.f32.mrb[88].mxu1 }
 0x44a   : > { %v6604_v40 = vrot.slane %v6603_v26, 4  ;;  %v6611_v19 = vsel %vm3688_vm3, %v13949_v30, -inf  ;;  %v13955_v4 = vpop.f32.mrb[89].mxu1 }
 0x44b   : > { %v6610_v25 = vsel %vm3688_vm3, %v13955_v4, -inf  ;;  %8693 = vrot.lane.b32.xlu0 %v8671_v48, %s12332_s13  ;;  %8439 = vrot.lane.b32.xlu1 %v8416_v16, %s12328_s9  ;;  %v8417_v48 = vrot.slane %v13885_v35, 2  ;;  %v8481_v16 = vrot.slane %v13885_v35, 3 }
 0x44c   : > { %v6605_v37 = vmax.f32 %v6603_v26, %v6604_v40  ;;  %v6612_v45 = vmax.f32 %v6610_v25, %v6611_v19  ;;  %v8545_v40 = vrot.slane %v13885_v35, 4 }
 0x44d   : > { %v13961_v21 = vpop.f32.mrb[106].mxu0 }
 0x44e   : > { %v6606_v1 = vrot.slane %v6605_v37, 2  ;;  %v6613_v54 = vrot.slane %v6612_v45, 4  ;;  %v6620_v27 = vsel %vm3688_vm3, %v13961_v21, -inf  ;;  %v13967_v23 = vpop.f32.mrb[107].mxu0 }
 0x44f   : > { %v6619_v46 = vsel %vm3688_vm3, %v13967_v23, -inf  ;;  %8757 = vrot.lane.b32.xlu0 %v8735_v20, %s12333_s14  ;;  %8503 = vrot.lane.b32.xlu1 %v8480_v24, %s12329_s10 }
 0x450   : > { %v6607_v63 = vmax.f32 %v6605_v37, %v6606_v1  ;;  %v6614_v49 = vmax.f32 %v6612_v45, %v6613_v54  ;;  %v6621_v0 = vmax.f32 %v6619_v46, %v6620_v27  ;;  %v8482_v54 = vrot.slane %v13895_v11, 3 }
 0x451   : > { %v13974_v36 = vpop.f32.mrb[90].mxu1 }
 0x452   : > { %v6608_v58 = vrot.slane %v6607_v63, 1  ;;  %v6615_v2 = vrot.slane %v6614_v49, 2  ;;  %v6622_v47 = vrot.slane %v6621_v0, 4  ;;  %v6629_v34 = vsel %vm3688_vm3, %v13974_v36, -inf  ;;  %v13982_v51 = vpop.f32.mrb[91].mxu1 }
 0x453   : > { %v6628_v26 = vsel %vm3688_vm3, %v13982_v51, -inf  ;;  %8567 = vrot.lane.b32.xlu1 %v8544_v14, %s12330_s11  ;;  %8377 = vrot.lane.b32.xlu0 %v8353_v56, %s12327_s30 }
 0x454   : > { %v6609_v19 = vmax.f32 %v6607_v63, %v6608_v58  ;;  %v6616_v25 = vmax.f32 %v6614_v49, %v6615_v2  ;;  %v6623_v37 = vmax.f32 %v6621_v0, %v6622_v47  ;;  %v6630_v45 = vmax.f32 %v6628_v26, %v6629_v34 }
 0x455   : > { %v13991_v20 = vpop.f32.mrb[108].mxu0  ;;  %v8418_v2 = vrot.slane %v13895_v11, 2 }
 0x456   : > { %v6745_v46 = vsub.f32 %v13943_v59, %v6609_v19  ;;  %v6746_v14 = vsub.f32 %v13937_v39, %v6609_v19  ;;  %v6617_v56 = vrot.slane %v6616_v25, 1  ;;  %v6624_v7 = vrot.slane %v6623_v37, 2  ;;  %v13999_v63 = vpop.f32.mrb[109].mxu0 }
 0x457   : > { %v6631_v49 = vrot.slane %v6630_v45, 4  ;;  %v6638_v0 = vsel %vm3688_vm3, %v13991_v20, -inf  ;;  %v6637_v58 = vsel %vm3688_vm3, %v13999_v63, -inf  ;;  %8631 = vrot.lane.b32.xlu1 %v8608_v5, %s12331_s12  ;;  %8441 = vrot.lane.b32.xlu0 %v8417_v48, %s12328_s9 }
 0x458   : > { %v6777_v59 = vmul.f32 1.442695, %v6745_v46  ;;  %v6779_v47 = vmul.f32 1.442695, %v6746_v14  ;;  %v6618_v39 = vmax.f32 %v6616_v25, %v6617_v56  ;;  %v6625_v34 = vmax.f32 %v6623_v37, %v6624_v7 }
 0x459   : > { %v6632_v26 = vmax.f32 %v6630_v45, %v6631_v49  ;;  %v6639_v19 = vmax.f32 %v6637_v58, %v6638_v0  ;;  %v14008_v27 = vpop.f32.mrb[92].mxu1 }
 0x45a   : > { %12218 = vpow2.f32 %v6777_v59  ;;  %v6747_v24 = vsub.f32 %v13955_v4, %v6618_v39  ;;  %v6748_v5 = vsub.f32 %v13949_v30, %v6618_v39  ;;  %v6626_v48 = vrot.slane %v6625_v34, 1  ;;  %v14014_v28 = vpop.f32.mrb[93].mxu1 }
 0x45b   : > { %12220 = vpow2.f32 %v6779_v47  ;;  %v6633_v46 = vrot.slane %v6632_v26, 2  ;;  %v6640_v25 = vrot.slane %v6639_v19, 4  ;;  %v6647_v7 = vsel %vm3688_vm3, %v14008_v27, -inf  ;;  %8695 = vrot.lane.b32.xlu1 %v8672_v53, %s12332_s13  ;;  %8505 = vrot.lane.b32.xlu0 %v8481_v16, %s12329_s10 }
 0x45c   : > { %v6781_v37 = vmul.f32 1.442695, %v6747_v24  ;;  %v6783_v45 = vmul.f32 1.442695, %v6748_v5  ;;  %v6627_v14 = vmax.f32 %v6625_v34, %v6626_v48  ;;  %v6646_v4 = vsel %vm3688_vm3, %v14014_v28, -inf }
 0x45d   : > { %v6634_v30 = vmax.f32 %v6632_v26, %v6633_v46  ;;  %v6641_v56 = vmax.f32 %v6639_v19, %v6640_v25  ;;  %v6648_v49 = vmax.f32 %v6646_v4, %v6647_v7  ;;  %v14022_v0 = vpop.f32.mrb[110].mxu0  ;;  %v16415_v26 = vrot.slane %v13875_v29, 7 }
 0x45e   : > { %12222 = vpow2.f32 %v6781_v37  ;;  %v6749_v59 = vsub.f32 %v13967_v23, %v6627_v14  ;;  %v6750_v53 = vsub.f32 %v13961_v21, %v6627_v14  ;;  %v6656_v16 = vsel %vm3688_vm3, %v14022_v0, -inf  ;;  %v14029_v24 = vpop.f32.mrb[111].mxu0 }
 0x45f   : > { %12224 = vpow2.f32 %v6783_v45  ;;  %v6635_v47 = vrot.slane %v6634_v30, 1  ;;  %v6642_v39 = vrot.slane %v6641_v56, 2  ;;  %v6649_v34 = vrot.slane %v6648_v49, 4  ;;  %8759 = vrot.lane.b32.xlu1 %v16415_v26, %s12333_s14  ;;  %8569 = vrot.lane.b32.xlu0 %v8545_v40, %s12330_s11 }
 0x460   : > { %v6785_v19 = vmul.f32 1.442695, %v6749_v59  ;;  %v6787_v5 = vmul.f32 1.442695, %v6750_v53  ;;  %v6655_v21 = vsel %vm3688_vm3, %v14029_v24, -inf  ;;  %v16417_v53 = vrot.slane %v13895_v11, 1 }
 0x461   : > { %v6636_v48 = vmax.f32 %v6634_v30, %v6635_v47  ;;  %v6643_v46 = vmax.f32 %v6641_v56, %v6642_v39  ;;  %v6650_v25 = vmax.f32 %v6648_v49, %v6649_v34  ;;  %v6657_v7 = vmax.f32 %v6655_v21, %v6656_v16  ;;  %v14038_v37 = vpop.f32.mrb[94].mxu1 }
 0x462   : > { %12226 = vpow2.f32 %v6785_v19  ;;  %v6665_v45 = vsel %vm3688_vm3, %v14038_v37, -inf  ;;  %v14042_v14 = vpop.f32.mrb[95].mxu1  ;;  %v16416_v49 = vrot.slane %v13885_v35, 5 }
 0x463   : > { %12228 = vpow2.f32 %v6787_v5  ;;  %v6751_v59 = vsub.f32 %v13982_v51, %v6636_v48  ;;  %v6752_v30 = vsub.f32 %v13974_v36, %v6636_v48  ;;  %v6644_v56 = vrot.slane %v6643_v46, 1  ;;  %8379 = vrot.lane.b32.xlu1 %v16417_v53, %s12327_s30 }
 0x464   : > { %8633 = vrot.lane.b32.xlu0 %v16416_v49, %s12331_s12  ;;  %v14054_v16 = vpop.eup %12218  ;;  %v6651_v47 = vrot.slane %v6650_v25, 2  ;;  %v6658_v39 = vrot.slane %v6657_v7, 4  ;;  %v6664_v34 = vsel %vm3688_vm3, %v14042_v14, -inf }
 0x465   : > { %v14059_v26 = vpop.eup %12220  ;;  %v6841_v36 = vsel %vm3688_vm3, %v14054_v16, 0.0  ;;  %v6789_v19 = vmul.f32 1.442695, %v6751_v59  ;;  %v6791_v5 = vmul.f32 1.442695, %v6752_v30  ;;  %v6645_v21 = vmax.f32 %v6643_v46, %v6644_v56  ;;  %v14063_v48 = vpop.f32.mrb[112].mxu0 }
 0x466   : > { %v6842_v49 = vsel %vm3688_vm3, %v14059_v26, 0.0  ;;  %v6652_v53 = vmax.f32 %v6650_v25, %v6651_v47  ;;  %v6659_v4 = vmax.f32 %v6657_v7, %v6658_v39  ;;  %v6666_v23 = vmax.f32 %v6664_v34, %v6665_v45  ;;  %v14067_v58 = vpop.f32.mrb[113].mxu0 }
 0x467   : > { %v14069_v40 = vadd.f32 %v6842_v49, %v6841_v36  ;;  %12230 = vpow2.f32 %v6789_v19  ;;  %v6753_v51 = vsub.f32 %v13999_v63, %v6645_v21  ;;  %v6754_v1 = vsub.f32 %v13991_v20, %v6645_v21  ;;  %8443 = vrot.lane.b32.xlu1 %v8418_v2, %s12328_s9 }
 0x468   : > { %v16418_v46 = vrot.slane %v13885_v35, 6  ;;  %v14079_v25 = vpop.eup %12222  ;;  %12232 = vpow2.f32 %v6791_v5  ;;  %v6653_v7 = vrot.slane %v6652_v53, 1  ;;  %v6660_v45 = vrot.slane %v6659_v4, 2 }
 0x469   : > { %v6667_v59 = vrot.slane %v6666_v23, 4  ;;  %v14081_v30 = vpop.eup %12224  ;;  %v6850_v63 = vsel %vm3688_vm3, %v14079_v25, 0.0  ;;  %v6793_v20 = vmul.f32 1.442695, %v6753_v51  ;;  %v6795_v56 = vmul.f32 1.442695, %v6754_v1 }
 0x46a   : > { %8697 = vrot.lane.b32.xlu0 %v16418_v46, %s12332_s13  ;;  %v6851_v39 = vsel %vm3688_vm3, %v14081_v30, 0.0  ;;  %v6654_v34 = vmax.f32 %v6652_v53, %v6653_v7  ;;  %v6661_v2 = vmax.f32 %v6659_v4, %v6660_v45  ;;  %v14088_v19 = vpop.f32.mrb[96].mxu1  ;;  %v16419_v49 = vrot.slane %v13885_v35, 7 }
 0x46b   : > { %v6668_v36 = vmax.f32 %v6666_v23, %v6667_v59  ;;  %v14090_v5 = vadd.f32 %v6851_v39, %v6850_v63  ;;  %12234 = vpow2.f32 %v6793_v20  ;;  %v14092_v21 = vpop.f32.mrb[97].mxu1  ;;  %8507 = vrot.lane.b32.xlu1 %v8482_v54, %s12329_s10  ;;  %v16420_v1 = vrot.slane %v13895_v11, 4 }
 0x46c   : > { %v14102_v23 = vpop.eup %12226  ;;  %12236 = vpow2.f32 %v6795_v56  ;;  %v6755_v51 = vsub.f32 %v14014_v28, %v6654_v34  ;;  %v6756_v53 = vsub.f32 %v14008_v27, %v6654_v34  ;;  %v6662_v46 = vrot.slane %v6661_v2, 1 }
 0x46d   : > { %v14106_v7 = vpop.eup %12228  ;;  %v6859_v45 = vsel %vm3688_vm3, %v14102_v23, 0.0  ;;  %v6669_v59 = vrot.slane %v6668_v36, 2  ;;  %v14110_v63 = vpop.f32.mrb[114].mxu0  ;;  %v16423_v35 = vrot.slane %v13901_v17, 2  ;;  %v16424_v54 = vrot.slane %v13895_v11, 6 }
 0x46e   : > { %8761 = vrot.lane.b32.xlu0 %v16419_v49, %s12333_s14  ;;  %v6860_v56 = vsel %vm3688_vm3, %v14106_v7, 0.0  ;;  %v6797_v39 = vmul.f32 1.442695, %v6755_v51  ;;  %v6799_v28 = vmul.f32 1.442695, %v6756_v53  ;;  %v6663_v49 = vmax.f32 %v6661_v2, %v6662_v46  ;;  %v14116_v27 = vpop.f32.mrb[115].mxu0 }
 0x46f   : > { %v14118_v34 = vadd.f32 %v6860_v56, %v6859_v45  ;;  %v6670_v4 = vmax.f32 %v6668_v36, %v6669_v59  ;;  %8571 = vrot.lane.b32.xlu1 %v16420_v1, %s12330_s11  ;;  %v16421_v2 = vrot.slane %v13901_v17, 1  ;;  %v6674_v1 = vsel %vm3688_vm3, %v14063_v48, -inf }
 0x470   : > { %12238 = vpow2.f32 %v6797_v39  ;;  %v6757_v20 = vsub.f32 %v14029_v24, %v6663_v49  ;;  %v6758_v51 = vsub.f32 %v14022_v0, %v6663_v49  ;;  %v16422_v45 = vrot.slane %v13895_v11, 5 }
 0x471   : > { %v14131_v36 = vpop.eup %12230  ;;  %12240 = vpow2.f32 %v6799_v28  ;;  %v14135_v46 = vpop.f32.mrb[98].mxu1  ;;  %v6671_v49 = vrot.slane %v6670_v4, 1  ;;  %v6682_v62 = vsel %vm3688_vm3, %v14092_v21, -inf  ;;  %v16428_v24 = vrot.slane %v13895_v11, 7 }
 0x472   : > { %8381 = vrot.lane.b32.xlu0 %v16421_v2, %s12327_s30  ;;  %v14139_v59 = vpop.eup %12232  ;;  %v6868_v0 = vsel %vm3688_vm3, %v14131_v36, 0.0  ;;  %v6801_v56 = vmul.f32 1.442695, %v6757_v20  ;;  %v6803_v39 = vmul.f32 1.442695, %v6758_v51  ;;  %v6673_v2 = vsel %vm3688_vm3, %v14067_v58, -inf }
 0x473   : > { %v6869_v28 = vsel %vm3688_vm3, %v14139_v59, 0.0  ;;  %v14147_v53 = vpop.f32.mrb[99].mxu1  ;;  %8635 = vrot.lane.b32.xlu1 %v16422_v45, %s12331_s12  ;;  %v6672_v20 = vmax.f32 %v6670_v4, %v6671_v49  ;;  %v6675_v51 = vmax.f32 %v6673_v2, %v6674_v1  ;;  %v6844_v4 = vrot.slane %v14069_v40, 4 }
 0x474   : > { %v14154_v47 = vadd.f32 %v6869_v28, %v6868_v0  ;;  %12242 = vpow2.f32 %v6801_v56  ;;  %v6683_v2 = vsel %vm3688_vm3, %v14088_v19, -inf  ;;  %v6692_v8 = vsel %vm3688_vm3, %v14110_v63, -inf }
 0x475   : > { %v14159_v29 = vpop.eup %12234  ;;  %12244 = vpow2.f32 %v6803_v39  ;;  %v14161_v41 = vpop.f32.mrb[116].mxu0  ;;  %v6760_v56 = vsub.f32 %v14038_v37, %v6672_v20  ;;  %v6676_v28 = vrot.slane %v6675_v51, 4  ;;  %v16425_v37 = vrot.slane %v13901_v17, 3 }
 0x476   : > { %8445 = vrot.lane.b32.xlu0 %v16423_v35, %s12328_s9  ;;  %v14166_v0 = vpop.eup %12236  ;;  %v6877_v1 = vsel %vm3688_vm3, %v14159_v29, 0.0  ;;  %v6759_v35 = vsub.f32 %v14042_v14, %v6672_v20  ;;  %v14173_v39 = vpop.f32.mrb[117].mxu0 }
 0x477   : > { %v6878_v49 = vsel %vm3688_vm3, %v14166_v0, 0.0  ;;  %8699 = vrot.lane.b32.xlu1 %v16424_v54, %s12332_s13  ;;  %v6807_v12 = vmul.f32 1.442695, %v6760_v56  ;;  %v6677_v33 = vmax.f32 %v6675_v51, %v6676_v28  ;;  %v6684_v56 = vmax.f32 %v6682_v62, %v6683_v2 }
 0x478   : > { %v14183_v45 = vadd.f32 %v6878_v49, %v6877_v1  ;;  %v6805_v14 = vmul.f32 1.442695, %v6759_v35  ;;  %v6845_v35 = vadd.f32 %v6844_v4, %v14069_v40  ;;  %v6853_v28 = vrot.slane %v14090_v5, 4 }
 0x479   : > { %v14191_v6 = vpop.f32.mrb[100].mxu1  ;;  %v6678_v54 = vrot.slane %v6677_v33, 2  ;;  %v6685_v40 = vrot.slane %v6684_v56, 4  ;;  %v16429_v4 = vrot.slane %v13901_v17, 4 }
 0x47a   : > { %8509 = vrot.lane.b32.xlu0 %v16425_v37, %s12329_s10  ;;  %v14195_v1 = vpop.eup %12238  ;;  %12246 = vpow2.f32 %v6805_v14  ;;  %v14198_v49 = vpop.f32.mrb[101].mxu1  ;;  %v6846_v60 = vrot.slane %v6845_v35, 2 }
 0x47b   : > { %16426 = vst [vmem:[#allocation24_spill] sm:$0xff] %v14195_v1  ;;  %v14201_v51 = vpop.eup %12240  ;;  %v6886_v20 = vsel %vm3688_vm3, %v14195_v1, 0.0  ;;  %12248 = vpow2.f32 %v6807_v12  ;;  %8763 = vrot.lane.b32.xlu1 %v16428_v24, %s12333_s14  ;;  %v6679_v12 = vmax.f32 %v6677_v33, %v6678_v54  ;;  %v6686_v15 = vmax.f32 %v6684_v56, %v6685_v40 }
 0x47c   : > { %16427 = vst [vmem:[#allocation7_spill] sm:$0xff] %v14201_v51  ;;  %v6887_v62 = vsel %vm3688_vm3, %v14201_v51, 0.0  ;;  %v6854_v33 = vadd.f32 %v6853_v28, %v14090_v5  ;;  %v6862_v56 = vrot.slane %v14118_v34, 4 }
 0x47d   : > { %v14216_v37 = vadd.f32 %v6887_v62, %v6886_v20  ;;  %v14220_v11 = vpop.f32.mrb[118].mxu0  ;;  %v6680_v14 = vrot.slane %v6679_v12, 1  ;;  %v6687_v31 = vrot.slane %v6686_v15, 2  ;;  %v16433_v20 = vrot.slane %v13901_v17, 5 }
 0x47e   : > { %8573 = vrot.lane.b32.xlu0 %v16429_v4, %s12330_s11  ;;  %v14223_v22 = vpop.eup %12242  ;;  %v6691_v4 = vsel %vm3688_vm3, %v14116_v27, -inf  ;;  %v14227_v2 = vpop.f32.mrb[119].mxu0  ;;  %v6855_v5 = vrot.slane %v6854_v33, 2 }
 0x47f   : > { %16430 = vst [vmem:[#allocation29_spill] sm:$0xff] %v14223_v22  ;;  %v14230_v62 = vpop.eup %12244  ;;  %v6895_v54 = vsel %vm3688_vm3, %v14223_v22, 0.0  ;;  %v6693_v24 = vmax.f32 %v6691_v4, %v6692_v8  ;;  %8383 = vrot.lane.b32.xlu1 %v16432_v50, %s12327_s30  ;;  %v6681_v55 = vmax.f32 %v6679_v12, %v6680_v14  ;;  %v6688_v22 = vmax.f32 %v6686_v15, %v6687_v31 }
 0x480   : > { %16431 = vst [vmem:[#allocation26_spill] sm:$0xff] %v14230_v62  ;;  %v6896_v40 = vsel %vm3688_vm3, %v14230_v62, 0.0  ;;  %v16434_v12 = vrot.slane %v13907_v32, 2  ;;  %v6863_v15 = vadd.f32 %v6862_v56, %v14118_v34  ;;  %v6700_v34 = vsel %vm3688_vm3, %v14147_v53, -inf }
 0x481   : > { %v14245_v28 = vadd.f32 %v6896_v40, %v6895_v54  ;;  %v6694_v8 = vrot.slane %v6693_v24, 4  ;;  %v14247_v4 = vpop.f32.mrb[102].mxu1  ;;  %v6761_v54 = vsub.f32 %v14067_v58, %v6681_v55  ;;  %v6762_v14 = vsub.f32 %v14063_v48, %v6681_v55 }
 0x482   : > { %8637 = vrot.lane.b32.xlu0 %v16433_v20, %s12331_s12  ;;  %v14250_v10 = vpop.f32.mrb[103].mxu1  ;;  %v14255_v20 = vadd.f32 %v6846_v60, %v6845_v35  ;;  %v6871_v40 = vrot.slane %v14154_v47, 4  ;;  %v6689_v50 = vrot.slane %v6688_v22, 1  ;;  %v16436_v60 = vrot.slane %v13901_v17, 6 }
 0x483   : > { %8447 = vrot.lane.b32.xlu1 %v16434_v12, %s12328_s9  ;;  %v6695_v18 = vmax.f32 %v6693_v24, %v6694_v8  ;;  %v6809_v58 = vmul.f32 1.442695, %v6761_v54  ;;  %v6701_v48 = vsel %vm3688_vm3, %v14135_v46, -inf  ;;  %v6811_v24 = vmul.f32 1.442695, %v6762_v14 }
 0x484   : > { %v14262_v31 = vpop.eup %12246  ;;  %v6690_v8 = vmax.f32 %v6688_v22, %v6689_v50  ;;  %v16438_v54 = vrot.slane %v13907_v32, 3  ;;  %v16439_v22 = vrot.slane %v13901_v17, 7  ;;  %v14291_v50 = vadd.f32 %v6855_v5, %v6854_v33 }
 0x485   : > { %16435 = vst [vmem:[#allocation31_spill] sm:$0xff] %v14262_v31  ;;  %v14269_v35 = vpop.eup %12248  ;;  %v6904_v55 = vsel %vm3688_vm3, %v14262_v31, 0.0  ;;  %v6696_v12 = vrot.slane %v6695_v18, 2  ;;  %12250 = vpow2.f32 %v6809_v58  ;;  %v6864_v14 = vrot.slane %v6863_v15, 2 }
 0x486   : > { %8701 = vrot.lane.b32.xlu0 %v16436_v60, %s12332_s13  ;;  %16437 = vst [vmem:[#allocation28_spill] sm:$0xff] %v14269_v35  ;;  %v6905_v56 = vsel %vm3688_vm3, %v14269_v35, 0.0  ;;  %12252 = vpow2.f32 %v6811_v24  ;;  %v6763_v31 = vsub.f32 %v14092_v21, %v6690_v8  ;;  %v6764_v1 = vsub.f32 %v14088_v19, %v6690_v8 }
 0x487   : > { %v14280_v51 = vadd.f32 %v6905_v56, %v6904_v55  ;;  %8511 = vrot.lane.b32.xlu1 %v16438_v54, %s12329_s10  ;;  %v6697_v35 = vmax.f32 %v6695_v18, %v6696_v12  ;;  %v6702_v55 = vmax.f32 %v6700_v34, %v6701_v48  ;;  %v6710_v58 = vsel %vm3688_vm3, %v14161_v41, -inf }
 0x488   : > { %v6872_v56 = vadd.f32 %v6871_v40, %v14154_v47  ;;  %v6813_v54 = vmul.f32 1.442695, %v6763_v31  ;;  %v6815_v24 = vmul.f32 1.442695, %v6764_v1  ;;  %v6880_v21 = vrot.slane %v14183_v45, 4 }
 0x489   : > { %v6698_v62 = vrot.slane %v6697_v35, 1  ;;  %v6889_v18 = vrot.slane %v14216_v37, 4  ;;  %v6703_v19 = vrot.slane %v6702_v55, 4  ;;  %v6709_v8 = vsel %vm3688_vm3, %v14173_v39, -inf }
 0x48a   : > { %8765 = vrot.lane.b32.xlu0 %v16439_v22, %s12333_s14  ;;  %v16440_v33 = vrot.slane %v13907_v32, 4  ;;  %12254 = vpow2.f32 %v6813_v54  ;;  %v6711_v48 = vmax.f32 %v6709_v8, %v6710_v58  ;;  %v6719_v47 = vsel %vm3688_vm3, %v14191_v6, -inf }
 0x48b   : > { %v6699_v5 = vmax.f32 %v6697_v35, %v6698_v62  ;;  %v16441_v1 = vrot.slane %v13913_v44, 1  ;;  %v14309_v40 = vadd.f32 %v6864_v14, %v6863_v15  ;;  %12256 = vpow2.f32 %v6815_v24 }
 0x48c   : > { %8575 = vrot.lane.b32.xlu1 %v16440_v33, %s12330_s11  ;;  %v6704_v34 = vmax.f32 %v6702_v55, %v6703_v19  ;;  %v6712_v54 = vrot.slane %v6711_v48, 4  ;;  %v6718_v62 = vsel %vm3688_vm3, %v14198_v49, -inf  ;;  %v6873_v35 = vrot.slane %v6872_v56, 2 }
 0x48d   : > { %v6765_v12 = vsub.f32 %v14116_v27, %v6699_v5  ;;  %v6766_v22 = vsub.f32 %v14110_v63, %v6699_v5  ;;  %v6881_v58 = vadd.f32 %v6880_v21, %v14183_v45  ;;  %v6720_v33 = vmax.f32 %v6718_v62, %v6719_v47 }
 0x48e   : > { %8385 = vrot.lane.b32.xlu0 %v16441_v1, %s12327_s30  ;;  %v6705_v8 = vrot.slane %v6704_v34, 2  ;;  %v16442_v1 = vrot.slane %v13907_v32, 5  ;;  %v6890_v15 = vadd.f32 %v6889_v18, %v14216_v37  ;;  %v6713_v27 = vmax.f32 %v6711_v48, %v6712_v54 }
 0x48f   : > { %v6817_v14 = vmul.f32 1.442695, %v6765_v12  ;;  %v6819_v55 = vmul.f32 1.442695, %v6766_v22  ;;  %v16443_v63 = vrot.slane %v13913_v44, 2  ;;  %v14323_v24 = vpop.eup %12250  ;;  %v6898_v19 = vrot.slane %v14245_v28, 4 }
 0x490   : > { %8639 = vrot.lane.b32.xlu1 %v16442_v1, %s12331_s12  ;;  %v6706_v45 = vmax.f32 %v6704_v34, %v6705_v8  ;;  %v6721_v21 = vrot.slane %v6720_v33, 4  ;;  %v6728_v5 = vsel %vm3688_vm3, %v14220_v11, -inf  ;;  %v14328_v47 = vpop.eup %12252  ;;  %v6913_v37 = vsel %vm3688_vm3, %v14323_v24, 0.0 }
 0x491   : > { %16444 = vst [vmem:[#allocation33_spill] sm:$0xff] %v14328_v47  ;;  %12258 = vpow2.f32 %v6817_v14  ;;  %v6714_v18 = vrot.slane %v6713_v27, 2  ;;  %v6727_v48 = vsel %vm3688_vm3, %v14227_v2, -inf  ;;  %v6914_v12 = vsel %vm3688_vm3, %v14328_v47, 0.0 }
 0x492   : > { %8449 = vrot.lane.b32.xlu0 %v16443_v63, %s12328_s9  ;;  %12260 = vpow2.f32 %v6819_v55  ;;  %v6707_v22 = vrot.slane %v6706_v45, 1  ;;  %v6722_v34 = vmax.f32 %v6720_v33, %v6721_v21  ;;  %v16445_v54 = vrot.slane %v13907_v32, 6 }
 0x493   : > { %v6882_v62 = vrot.slane %v6881_v58, 2  ;;  %v14339_v8 = vadd.f32 %v6914_v12, %v6913_v37  ;;  %v6715_v1 = vmax.f32 %v6713_v27, %v6714_v18  ;;  %v6729_v63 = vmax.f32 %v6727_v48, %v6728_v5 }
 0x494   : > { %8703 = vrot.lane.b32.xlu1 %v16445_v54, %s12332_s13  ;;  %v16446_v14 = vrot.slane %v13913_v44, 3  ;;  %v6866_v31 = vrot.slane %v14309_v40, 1  ;;  %v14345_v60 = vadd.f32 %v6873_v35, %v6872_v56  ;;  %v6708_v55 = vmax.f32 %v6706_v45, %v6707_v22  ;;  %v14347_v33 = vpop.eup %12254 }
 0x495   : > { %v6723_v17 = vrot.slane %v6722_v34, 2  ;;  %v6891_v21 = vrot.slane %v6890_v15, 2  ;;  %v6899_v54 = vadd.f32 %v6898_v19, %v14245_v28  ;;  %v6716_v47 = vrot.slane %v6715_v1, 1  ;;  %v14350_v12 = vpop.eup %12256 }
 0x496   : > { %8513 = vrot.lane.b32.xlu0 %v16446_v14, %s12329_s10  ;;  %v6730_v37 = vrot.slane %v6729_v63, 4  ;;  %v6922_v27 = vsel %vm3688_vm3, %v14347_v33, 0.0  ;;  %v6767_v5 = vsub.f32 %v14147_v53, %v6708_v55  ;;  %v6768_v18 = vsub.f32 %v14135_v46, %v6708_v55 }
 0x497   : > { %v6724_v56 = vmax.f32 %v6722_v34, %v6723_v17  ;;  %v16447_v35 = vrot.slane %v13907_v32, 7  ;;  %v14359_v45 = vadd.f32 %v6882_v62, %v6881_v58  ;;  %v6923_v28 = vsel %vm3688_vm3, %v14350_v12, 0.0 }
 0x498   : > { %v6717_v19 = vmax.f32 %v6715_v1, %v6716_v47  ;;  %v6731_v48 = vmax.f32 %v6729_v63, %v6730_v37  ;;  %v16448_v22 = vrot.slane %v13913_v44, 4  ;;  %v14366_v14 = vadd.f32 %v6923_v28, %v6922_v27 }
 0x499   : > { %8767 = vrot.lane.b32.xlu1 %v16447_v35, %s12333_s14  ;;  %v6821_v53 = vmul.f32 1.442695, %v6767_v5  ;;  %v6823_v46 = vmul.f32 1.442695, %v6768_v18  ;;  %v6725_v17 = vrot.slane %v6724_v56, 1  ;;  %v14368_v34 = vadd.f32 %v6891_v21, %v6890_v15 }
 0x49a   : > { %8577 = vrot.lane.b32.xlu0 %v16448_v22, %s12330_s11  ;;  %v6769_v55 = vsub.f32 %v14173_v39, %v6717_v19  ;;  %v6770_v58 = vsub.f32 %v14161_v41, %v6717_v19  ;;  %v6732_v62 = vrot.slane %v6731_v48, 2  ;;  %v6900_v35 = vrot.slane %v6899_v54, 2 }
 0x49b   : > { %v6907_v47 = vrot.slane %v14280_v51, 4  ;;  %12262 = vpow2.f32 %v6821_v53  ;;  %v6726_v1 = vmax.f32 %v6724_v56, %v6725_v17  ;;  %v16449_v63 = vrot.slane %v13919_v13, 1  ;;  %v14376_v37 = vpop.eup %12258 }
 0x49c   : > { %12264 = vpow2.f32 %v6823_v46  ;;  %v6825_v27 = vmul.f32 1.442695, %v6769_v55  ;;  %v6827_v15 = vmul.f32 1.442695, %v6770_v58  ;;  %v16450_v39 = vrot.slane %v14255_v20, 1  ;;  %v14384_v5 = vpop.eup %12260 }
 0x49d   : > { %8387 = vrot.lane.b32.xlu1 %v16449_v63, %s12327_s30  ;;  %v16451_v41 = vrot.slane %v13913_v44, 5  ;;  %v6931_v18 = vsel %vm3688_vm3, %v14376_v37, 0.0  ;;  %v6771_v56 = vsub.f32 %v14198_v49, %v6726_v1  ;;  %v6772_v28 = vsub.f32 %v14191_v6, %v6726_v1 }
 0x49e   : > { %v6849_v21 = vadd.f32 %v16450_v39, %v14255_v20  ;;  %v6737_v19 = vsel %vm3688_vm3, %v14247_v4, -inf  ;;  %v6916_v22 = vrot.slane %v14339_v8, 4  ;;  %v6932_v20 = vsel %vm3688_vm3, %v14384_v5, 0.0 }
 0x49f   : > { %8641 = vrot.lane.b32.xlu0 %v16451_v41, %s12331_s12  ;;  %12266 = vpow2.f32 %v6825_v27  ;;  %v6733_v53 = vmax.f32 %v6731_v48, %v6732_v62  ;;  %v6908_v46 = vadd.f32 %v6907_v47, %v14280_v51  ;;  %v6933_v17 = vadd.f32 %v6932_v20, %v6931_v18 }
 0x4a0   : > { %12268 = vpow2.f32 %v6827_v15  ;;  %v6829_v55 = vmul.f32 1.442695, %v6771_v56  ;;  %v16452_v49 = vrot.slane %v13919_v13, 2  ;;  %v6831_v6 = vmul.f32 1.442695, %v6772_v28 }
 0x4a1   : > { %v6734_v58 = vrot.slane %v6733_v53, 1  ;;  %12270 = vrcp.f32 %v6849_v21  ;;  %v6736_v1 = vsel %vm3688_vm3, %v14250_v10, -inf  ;;  %v16453_v63 = vrot.slane %v13913_v44, 6 }
 0x4a2   : > { %8451 = vrot.lane.b32.xlu1 %v16452_v49, %s12328_s9  ;;  %v6875_v48 = vrot.slane %v14345_v60, 1  ;;  %v14405_v51 = vadd.f32 %v6900_v35, %v6899_v54  ;;  %12272 = vpow2.f32 %v6829_v55  ;;  %v6738_v62 = vmax.f32 %v6736_v1, %v6737_v19  ;;  %v14416_v35 = vpop.permute.xlu1 %8363 }
 0x4a3   : > { %8705 = vrot.lane.b32.xlu0 %v16453_v63, %s12332_s13  ;;  %v6917_v47 = vadd.f32 %v6916_v22, %v14339_v8  ;;  %12274 = vpow2.f32 %v6831_v6  ;;  %v6735_v27 = vmax.f32 %v6733_v53, %v6734_v58  ;;  %v16454_v15 = vrot.slane %v14291_v50, 1 }
 0x4a4   : > { %v6884_v21 = vrot.slane %v14359_v45, 1  ;;  %v6893_v41 = vrot.slane %v14368_v34, 1  ;;  %v6909_v18 = vrot.slane %v6908_v46, 2  ;;  %v6739_v56 = vrot.slane %v6738_v62, 4 }
 0x4a5   : > { %v6858_v39 = vadd.f32 %v16454_v15, %v14291_v50  ;;  %v16455_v54 = vrot.slane %v13919_v13, 3  ;;  %v6925_v8 = vrot.slane %v14366_v14, 4  ;;  %v6773_v28 = vsub.f32 %v14227_v2, %v6735_v27  ;;  %v14424_v22 = vpop.eup %12262  ;;  %v14432_v2 = vpop.permute.xlu0 %8361 }
 0x4a6   : > { %v6774_v19 = vsub.f32 %v14220_v11, %v6735_v27  ;;  %v16456_v50 = vrot.slane %v13913_v44, 7  ;;  %v6902_v20 = vrot.slane %v14405_v51, 1  ;;  %v6934_v53 = vrot.slane %v6933_v17, 4  ;;  %v14430_v6 = vpop.eup %12264 }
 0x4a7   : > { %8515 = vrot.lane.b32.xlu1 %v16455_v54, %s12329_s10  ;;  %12276 = vrcp.f32 %v6858_v39  ;;  %v6740_v55 = vmax.f32 %v6738_v62, %v6739_v56  ;;  %v6867_v49 = vadd.f32 %v6866_v31, %v14309_v40  ;;  %v6918_v11 = vrot.slane %v6917_v47, 2 }
 0x4a8   : > { %8769 = vrot.lane.b32.xlu0 %v16456_v50, %s12333_s14  ;;  %v6940_v58 = vsel %vm3688_vm3, %v14424_v22, 0.0  ;;  %v6833_v1 = vmul.f32 1.442695, %v6773_v28  ;;  %v6835_v63 = vmul.f32 1.442695, %v6774_v19  ;;  %v14436_v27 = vadd.f32 %v6909_v18, %v6908_v46 }
 0x4a9   : > { %v6941_v15 = vsel %vm3688_vm3, %v14430_v6, 0.0  ;;  %v6741_v62 = vrot.slane %v6740_v55, 2  ;;  %12278 = vrcp.f32 %v6867_v49  ;;  %v16457_v31 = vrot.slane %v13919_v13, 4  ;;  %v14443_v40 = vpop.eup %12266 }
 0x4aa   : > { %v6926_v39 = vadd.f32 %v6925_v8, %v14366_v14  ;;  %v6942_v56 = vadd.f32 %v6941_v15, %v6940_v58  ;;  %12280 = vpow2.f32 %v6833_v1  ;;  %v6876_v54 = vadd.f32 %v6875_v48, %v14345_v60  ;;  %v14450_v18 = vpop.eup %12268 }
 0x4ab   : > { %8579 = vrot.lane.b32.xlu1 %v16457_v31, %s12330_s11  ;;  %v16458_v46 = vrot.slane %v13925_v9, 1  ;;  %v6935_v28 = vadd.f32 %v6934_v53, %v6933_v17  ;;  %v6949_v19 = vsel %vm3688_vm3, %v14443_v40, 0.0  ;;  %12282 = vpow2.f32 %v6835_v63  ;;  %v12271_v49 = vpop.eup %12270  ;;  %v14454_v31 = vpop.permute.xlu1 %8427 }
 0x4ac   : > { %v6742_v50 = vmax.f32 %v6740_v55, %v6741_v62  ;;  %v14456_v14 = vadd.f32 %v6918_v11, %v6917_v47  ;;  %v6943_v8 = vrot.slane %v6942_v56, 4  ;;  %v6950_v60 = vsel %vm3688_vm3, %v14450_v18, 0.0  ;;  %v14460_v48 = vpop.eup %12272  ;;  %v14469_v47 = vpop.permute.xlu0 %8425 }
 0x4ad   : > { %8389 = vrot.lane.b32.xlu0 %v16458_v46, %s12327_s30  ;;  %12284 = vrcp.f32 %v6876_v54  ;;  %v6951_v58 = vadd.f32 %v6950_v60, %v6949_v19  ;;  %v7001_v17 = vmul.f32 %v12271_v49, %v14054_v16  ;;  %v7002_v1 = vmul.f32 %v12271_v49, %v14059_v26  ;;  %v14467_v63 = vpop.eup %12274 }
 0x4ae   : > { %v6743_v53 = vrot.slane %v6742_v50, 1  ;;  %v16459_v55 = vrot.slane %v13919_v13, 5  ;;  %v6927_v11 = vrot.slane %v6926_v39, 2  ;;  %v6944_v15 = vadd.f32 %v6943_v8, %v6942_v56 }
 0x4af   : > { %v6958_v62 = vsel %vm3688_vm3, %v14460_v48, 0.0  ;;  %v6885_v54 = vadd.f32 %v6884_v21, %v14359_v45  ;;  %v16460_v16 = vrot.slane %v13925_v9, 2  ;;  %v6936_v26 = vrot.slane %v6935_v28, 2  ;;  %11570 = vmatprep.mubr.msk.f32.mxu0 %vm3688_vm3, %v7001_v17 }
 0x4b0   : > { %8643 = vrot.lane.b32.xlu1 %v16459_v55, %s12331_s12  ;;  %v6952_v46 = vrot.slane %v6951_v58, 4  ;;  %v6959_v19 = vsel %vm3688_vm3, %v14467_v63, 0.0  ;;  %v6744_v49 = vmax.f32 %v6742_v50, %v6743_v53  ;;  %v6945_v55 = vrot.slane %v6944_v15, 2  ;;  %11571 = vmatmul.mubr.msk.f32.vlgmr.msra.gmra.mrb[120].mxu0 %vm3688_vm3, %v7002_v1  ;;  %v14489_v53 = vpop.permute.xlu1 %8491 }
 0x4b1   : > { %8453 = vrot.lane.b32.xlu0 %v16460_v16, %s12328_s9  ;;  %v12277_v60 = vpop.eup %12276  ;;  %v6960_v56 = vadd.f32 %v6959_v19, %v6958_v62  ;;  %12286 = vrcp.f32 %v6885_v54  ;;  %v6894_v45 = vadd.f32 %v6893_v41, %v14368_v34  ;;  %12009 = vmatpush3.bf16.msra.mxu0 %v16354_v43  ;;  %v6911_v50 = vrot.slane %v14436_v27, 1 }
 0x4b2   : > { %v6953_v21 = vadd.f32 %v6952_v46, %v6951_v58  ;;  %v6775_v8 = vsub.f32 %v14250_v10, %v6744_v49  ;;  %v6776_v16 = vsub.f32 %v14247_v4, %v6744_v49  ;;  %v7003_v17 = vmul.f32 %v12277_v60, %v14079_v25  ;;  %12015 = vmatprep.subr.bf16.mxu0 %v16360_v52 }
 0x4b3   : > { %v6961_v62 = vrot.slane %v6960_v56, 4  ;;  %v7004_v1 = vmul.f32 %v12277_v60, %v14081_v30  ;;  %12288 = vrcp.f32 %v6894_v45  ;;  %v16461_v34 = vrot.slane %v13919_v13, 6  ;;  %v12279_v10 = vpop.eup %12278  ;;  %v14503_v30 = vpop.permute.xlu0 %8489 }
 0x4b4   : > { %v6920_v4 = vrot.slane %v14456_v14, 1  ;;  %v6928_v43 = vadd.f32 %v6927_v11, %v6926_v39  ;;  %v6837_v41 = vmul.f32 1.442695, %v6775_v8  ;;  %v6839_v25 = vmul.f32 1.442695, %v6776_v16  ;;  %11577 = vmatprep.mubr.msk.f32.mxu1 %vm3688_vm3, %v7003_v17  ;;  %v14501_v54 = vpop.eup %12280 }
 0x4b5   : > { %8707 = vrot.lane.b32.xlu1 %v16461_v34, %s12332_s13  ;;  %v16462_v58 = vrot.slane %v13925_v9, 3  ;;  %v6954_v46 = vrot.slane %v6953_v21, 2  ;;  %v6962_v19 = vadd.f32 %v6961_v62, %v6960_v56  ;;  %11578 = vmatmul.mubr.msk.f32.vlgmr.msra.gmra.mrb[104].mxu1 %vm3688_vm3, %v7004_v1  ;;  %v7005_v49 = vmul.f32 %v12279_v10, %v14102_v23  ;;  %v14508_v11 = vpop.eup %12282 }
 0x4b6   : > { %v7006_v39 = vmul.f32 %v12279_v10, %v14106_v7  ;;  %v6937_v60 = vadd.f32 %v6936_v26, %v6935_v28  ;;  %v6946_v45 = vadd.f32 %v6945_v55, %v6944_v15  ;;  %v6967_v8 = vsel %vm3688_vm3, %v14501_v54, 0.0  ;;  %12013 = vmatpush3.bf16.msra.mxu1 %v16357_v57  ;;  %v14526_v55 = vpop.permute.xlu1 %8555 }
 0x4b7   : > { %8517 = vrot.lane.b32.xlu0 %v16462_v58, %s12329_s10  ;;  %12290 = vpow2.f32 %v6837_v41  ;;  %v12285_v16 = vpop.eup %12284  ;;  %v6963_v17 = vrot.slane %v6962_v19, 2  ;;  %v6968_v56 = vsel %vm3688_vm3, %v14508_v11, 0.0  ;;  %12019 = vmatprep.subr.bf16.mxu1 %v16363_v61  ;;  %v6903_v23 = vadd.f32 %v6902_v20, %v14405_v51 }
 0x4b8   : > { %12292 = vpow2.f32 %v6839_v25  ;;  %11584 = vmatprep.mubr.msk.f32.mxu0 %vm3688_vm3, %v7005_v49  ;;  %v6969_v7 = vadd.f32 %v6968_v56, %v6967_v8  ;;  %v7007_v28 = vmul.f32 %v12285_v16, %v14131_v36  ;;  %v7008_v57 = vmul.f32 %v12285_v16, %v14139_v59 }
 0x4b9   : > { %11585 = vmatmul.mubr.msk.f32.vlgmr.msra.gmra.mrb[122].mxu0 %vm3688_vm3, %v7006_v39  ;;  %v16463_v15 = vrot.slane %v13919_v13, 7  ;;  %v6929_v26 = vrot.slane %v6928_v43, 1  ;;  %v6955_v62 = vadd.f32 %v6954_v46, %v6953_v21  ;;  %v6964_v1 = vadd.f32 %v6963_v17, %v6962_v19  ;;  %v14536_v21 = vpop.permute.xlu0 %8553 }
 0x4ba   : > { %12017 = vmatpush3.bf16.msra.mxu0 %v16360_v52  ;;  %12294 = vrcp.f32 %v6903_v23  ;;  %v16464_v51 = vrot.slane %v13925_v9, 4  ;;  %v6938_v20 = vrot.slane %v6937_v60, 1  ;;  %v6970_v36 = vrot.slane %v6969_v7, 4  ;;  %11591 = vmatprep.mubr.msk.f32.mxu1 %vm3688_vm3, %v7007_v28  ;;  %v14550_v16 = vpop.permute.xlu1 %8619 }
 0x4bb   : > { %8771 = vrot.lane.b32.xlu1 %v16463_v15, %s12333_s14  ;;  %12023 = vmatprep.subr.bf16.mxu0 %v16366_v42  ;;  %v6912_v59 = vadd.f32 %v6911_v50, %v14436_v27  ;;  %v8360_v34 = vrot.slane %v13931_v38, 1  ;;  %v12287_v10 = vpop.eup %12286  ;;  %v6947_v41 = vrot.slane %v6946_v45, 1  ;;  %v6921_v52 = vadd.f32 %v6920_v4, %v14456_v14 }
 0x4bc   : > { %8581 = vrot.lane.b32.xlu0 %v16464_v51, %s12330_s11  ;;  %11592 = vmatmul.mubr.msk.f32.vlgmr.msra.gmra.mrb[106].mxu1 %vm3688_vm3, %v7008_v57  ;;  %v8615_v25 = vrot.slane %v13925_v9, 5  ;;  %v6971_v58 = vadd.f32 %v6970_v36, %v6969_v7  ;;  %v7009_v46 = vmul.f32 %v12287_v10, %v14159_v29  ;;  %v7010_v19 = vmul.f32 %v12287_v10, %v14166_v0  ;;  %v16466_v29 = vld [vmem:[#allocation7_spill] sm:$0xff]  ;;  %v16467_v57 = vld [vmem:[#allocation8_spill] sm:$0xff] }
 0x4bd   : > { %12021 = vmatpush3.bf16.msra.mxu1 %v16363_v61  ;;  %12296 = vrcp.f32 %v6912_v59  ;;  %v12289_v27 = vpop.eup %12288  ;;  %v6956_v50 = vrot.slane %v6955_v62, 1  ;;  %v6965_v49 = vrot.slane %v6964_v1, 1  ;;  %v6930_v39 = vadd.f32 %v6929_v26, %v6928_v43  ;;  %v16465_v61 = vld [vmem:[#allocation24_spill] sm:$0xff]  ;;  %v14560_v28 = vpop.permute.xlu0 %8617  ;;  %v16468_v59 = vld [vmem:[#allocation9_spill] sm:$0xff] }
 0x4be   : > { %12027 = vmatprep.subr.bf16.mxu1 %v16369_v3  ;;  %12298 = vrcp.f32 %v6921_v52  ;;  %v6972_v14 = vrot.slane %v6971_v58, 2  ;;  %11598 = vmatprep.mubr.msk.f32.mxu0 %vm3688_vm3, %v7009_v46  ;;  %v7011_v4 = vmul.f32 %v12289_v27, %v16465_v61  ;;  %v7012_v8 = vmul.f32 %v12289_v27, %v16466_v29  ;;  %v16473_v29 = vld [vmem:[#allocation33_spill] sm:$0xff] }
 0x4bf   : > { %8391 = vrot.lane.b32.xlu1 %v8360_v34, %s12327_s30  ;;  %v6939_v0 = vadd.f32 %v6938_v20, %v6937_v60  ;;  %11599 = vmatmul.mubr.msk.f32.vlgmr.msra.gmra.mrb[124].mxu0 %vm3688_vm3, %v7010_v19  ;;  %12300 = vrcp.f32 %v6930_v39  ;;  %v6948_v17 = vadd.f32 %v6947_v41, %v6946_v45  ;;  %v8424_v43 = vrot.slane %v13931_v38, 2  ;;  %v16469_v34 = vld [vmem:[#allocation29_spill] sm:$0xff]  ;;  %v16470_v41 = vld [vmem:[#allocation26_spill] sm:$0xff] }
 0x4c0   : > { %8645 = vrot.lane.b32.xlu0 %v8615_v25, %s12331_s12  ;;  %v6973_v23 = vadd.f32 %v6972_v14, %v6971_v58  ;;  %12025 = vmatpush3.bf16.msra.mxu0 %v16366_v42  ;;  %v6957_v45 = vadd.f32 %v6956_v50, %v6955_v62  ;;  %v8679_v42 = vrot.slane %v13925_v9, 6  ;;  %v6966_v51 = vadd.f32 %v6965_v49, %v6964_v1  ;;  %v14576_v58 = vpop.permute.xlu1 %8683  ;;  %v16471_v49 = vld [vmem:[#allocation31_spill] sm:$0xff]  ;;  %v16472_v14 = vld [vmem:[#allocation28_spill] sm:$0xff] }
 0x4c1   : > { %v14553_v56 = vpop.eup %12290  ;;  %11605 = vmatprep.mubr.msk.f32.mxu1 %vm3688_vm3, %v7011_v4  ;;  %12302 = vrcp.f32 %v6939_v0  ;;  %12031 = vmatprep.subr.bf16.mxu0 %v16467_v57  ;;  %v8488_v62 = vrot.slane %v13931_v38, 3  ;;  %v8743_v1 = vrot.slane %v13925_v9, 7  ;;  %v14581_v27 = vpop.permute.xlu0 %8681 }
 0x4c2   : > { %v14558_v7 = vpop.eup %12292  ;;  %v6976_v60 = vsel %vm3688_vm3, %v14553_v56, 0.0  ;;  %11606 = vmatmul.mubr.msk.f32.vlgmr.msra.gmra.mrb[108].mxu1 %vm3688_vm3, %v7012_v8  ;;  %12304 = vrcp.f32 %v6948_v17  ;;  %v6974_v15 = vrot.slane %v6973_v23, 1 }
 0x4c3   : > { %v6977_v26 = vsel %vm3688_vm3, %v14558_v7, 0.0  ;;  %12029 = vmatpush3.bf16.msra.mxu1 %v16369_v3  ;;  %8455 = vrot.lane.b32.xlu1 %v8424_v43, %s12328_s9  ;;  %12306 = vrcp.f32 %v6957_v45 }
 0x4c4   : > { %v12295_v20 = vpop.eup %12294  ;;  %v6978_v36 = vadd.f32 %v6977_v26, %v6976_v60  ;;  %12035 = vmatprep.subr.bf16.mxu1 %v16468_v59  ;;  %8709 = vrot.lane.b32.xlu0 %v8679_v42, %s12332_s13  ;;  %12308 = vrcp.f32 %v6966_v51  ;;  %v6975_v25 = vadd.f32 %v6974_v15, %v6973_v23  ;;  %v16474_v23 = vld [vmem:[#allocation10_spill] sm:$0xff]  ;;  %v14596_v42 = vpop.permute.xlu1 %8747  ;;  %v16475_v51 = vld [vmem:[#allocation11_spill] sm:$0xff] }
 0x4c5   : > { %v7013_v10 = vmul.f32 %v12295_v20, %v16469_v34  ;;  %v7014_v52 = vmul.f32 %v12295_v20, %v16470_v41  ;;  %v16477_v41 = vld [vmem:[#allocation13_spill] sm:$0xff] }
 0x4c6   : > { %v6979_v3 = vrot.slane %v6978_v36, 4  ;;  %12310 = vrcp.f32 %v6975_v25  ;;  %v16478_v25 = vld [vmem:[#allocation14_spill] sm:$0xff] }
 0x4c7   : > { %v12297_v46 = vpop.eup %12296  ;;  %11612 = vmatprep.mubr.msk.f32.mxu0 %vm3688_vm3, %v7013_v10  ;;  %8519 = vrot.lane.b32.xlu1 %v8488_v62, %s12329_s10  ;;  %v16476_v62 = vld [vmem:[#allocation12_spill] sm:$0xff] }
 0x4c8   : > { %v12299_v19 = vpop.eup %12298  ;;  %v6980_v50 = vadd.f32 %v6979_v3, %v6978_v36  ;;  %11613 = vmatmul.mubr.msk.f32.vlgmr.msra.gmra.mrb[126].mxu0 %vm3688_vm3, %v7014_v52  ;;  %v7015_v39 = vmul.f32 %v12297_v46, %v16471_v49  ;;  %v7016_v61 = vmul.f32 %v12297_v46, %v16472_v14  ;;  %8773 = vrot.lane.b32.xlu0 %v8743_v1, %s12333_s14  ;;  %v14618_v52 = vpop.permute.xlu1 %8365  ;;  %v8552_v3 = vrot.slane %v13931_v38, 4 }
 0x4c9   : > { %12033 = vmatpush3.bf16.msra.mxu0 %v16467_v57  ;;  %v7017_v4 = vmul.f32 %v12299_v19, %v14323_v24  ;;  %v7018_v8 = vmul.f32 %v12299_v19, %v16473_v29  ;;  %v12301_v0 = vpop.eup %12300  ;;  %v8680_v49 = vrot.slane %v13931_v38, 6 }
 0x4ca   : > { %v6981_v17 = vrot.slane %v6980_v50, 2  ;;  %12039 = vmatprep.subr.bf16.mxu0 %v16474_v23  ;;  %11619 = vmatprep.mubr.msk.f32.mxu1 %vm3688_vm3, %v7015_v39  ;;  %v7019_v60 = vmul.f32 %v12301_v0, %v14347_v33  ;;  %v7020_v45 = vmul.f32 %v12301_v0, %v14350_v12 }
 0x4cb   : > { %v12303_v43 = vpop.eup %12302  ;;  %11620 = vmatmul.mubr.msk.f32.vlgmr.msra.gmra.mrb[110].mxu1 %vm3688_vm3, %v7016_v61  ;;  %11626 = vmatprep.mubr.msk.f32.mxu0 %vm3688_vm3, %v7017_v4  ;;  %v8744_v61 = vrot.slane %v13931_v38, 7 }
 0x4cc   : > { %v12305_v57 = vpop.eup %12304  ;;  %v6982_v24 = vadd.f32 %v6981_v17, %v6980_v50  ;;  %12037 = vmatpush3.bf16.msra.mxu1 %v16468_v59  ;;  %11627 = vmatmul.mubr.msk.f32.vlgmr.msra.gmra.mrb[128].mxu0 %vm3688_vm3, %v7018_v8  ;;  %v7021_v15 = vmul.f32 %v12303_v43, %v14376_v37  ;;  %v7022_v26 = vmul.f32 %v12303_v43, %v14384_v5 }
 0x4cd   : > { %12043 = vmatprep.subr.bf16.mxu1 %v16475_v51  ;;  %12041 = vmatpush3.bf16.msra.mxu0 %v16474_v23  ;;  %v7023_v33 = vmul.f32 %v12305_v57, %v14424_v22  ;;  %v7024_v12 = vmul.f32 %v12305_v57, %v14430_v6  ;;  %v12307_v20 = vpop.eup %12306 }
 0x4ce   : > { %v6983_v36 = vrot.slane %v6982_v24, 1  ;;  %12047 = vmatprep.subr.bf16.mxu0 %v16476_v62  ;;  %11633 = vmatprep.mubr.msk.f32.mxu1 %vm3688_vm3, %v7019_v60  ;;  %v12309_v59 = vpop.eup %12308  ;;  %v7025_v37 = vmul.f32 %v12307_v20, %v14443_v40  ;;  %v7026_v5 = vmul.f32 %v12307_v20, %v14450_v18 }
 0x4cf   : > { %11634 = vmatmul.mubr.msk.f32.vlgmr.msra.gmra.mrb[112].mxu1 %vm3688_vm3, %v7020_v45  ;;  %11640 = vmatprep.mubr.msk.f32.mxu0 %vm3688_vm3, %v7021_v15  ;;  %v7027_v22 = vmul.f32 %v12309_v59, %v14460_v48  ;;  %v7028_v6 = vmul.f32 %v12309_v59, %v14467_v63  ;;  %v14626_v48 = vpop.permute.xlu0 %8745  ;;  %v16479_v63 = vld [vmem:[#allocation15_spill] sm:$0xff] }
 0x4d0   : > { %12045 = vmatpush3.bf16.msra.mxu1 %v16475_v51  ;;  %11641 = vmatmul.mubr.msk.f32.vlgmr.msra.gmra.mrb[130].mxu0 %vm3688_vm3, %v7022_v26  ;;  %v6984_v34 = vadd.f32 %v6983_v36, %v6982_v24  ;;  %v12311_v10 = vpop.eup %12310 }
 0x4d1   : > { %12051 = vmatprep.subr.bf16.mxu1 %v16477_v41  ;;  %12049 = vmatpush3.bf16.msra.mxu0 %v16476_v62  ;;  %v7029_v40 = vmul.f32 %v12311_v10, %v14501_v54  ;;  %v7030_v18 = vmul.f32 %v12311_v10, %v14508_v11  ;;  %v14637_v54 = vpop.permute.xlu1 %8367  ;;  %v8616_v11 = vrot.slane %v13931_v38, 5 }
 0x4d2   : > { %12055 = vmatprep.subr.bf16.mxu0 %v16478_v25  ;;  %11647 = vmatprep.mubr.msk.f32.mxu1 %vm3688_vm3, %v7023_v33  ;;  %12312 = vrcp.f32 %v6984_v34 }
 0x4d3   : > { %11648 = vmatmul.mubr.msk.f32.vlgmr.msra.gmra.mrb[114].mxu1 %vm3688_vm3, %v7024_v12  ;;  %11654 = vmatprep.mubr.msk.f32.mxu0 %vm3688_vm3, %v7025_v37  ;;  %v14642_v1 = vpop.permute.xlu0 %8429 }
 0x4d4   : > { %12053 = vmatpush3.bf16.msra.mxu1 %v16477_v41  ;;  %11655 = vmatmul.mubr.msk.f32.vlgmr.msra.gmra.mrb[132].mxu0 %vm3688_vm3, %v7026_v5 }
 0x4d5   : > { %12059 = vmatprep.subr.bf16.mxu1 %v16479_v63  ;;  %12057 = vmatpush3.bf16.msra.mxu0 %v16478_v25  ;;  %v14648_v39 = vpop.permute.xlu1 %8431 }
 0x4d6   : > { %11661 = vmatprep.mubr.msk.f32.mxu1 %vm3688_vm3, %v7027_v22  ;;  %11668 = vmatprep.mubr.msk.f32.mxu0 %vm3688_vm3, %v7029_v40  ;;  %16480 = vst [vmem:[#allocation30_spill] sm:$0xff] %v14648_v39 }
 0x4d7   : > { %11662 = vmatmul.mubr.msk.f32.vlgmr.msra.gmra.mrb[116].mxu1 %vm3688_vm3, %v7028_v6  ;;  %8583 = vrot.lane.b32.xlu1 %v8552_v3, %s12330_s11  ;;  %v14652_v14 = vpop.permute.xlu0 %8493 }
 0x4d8   : > { %12061 = vmatpush3.bf16.msra.mxu1 %v16479_v63  ;;  %11669 = vmatmul.mubr.msk.f32.vlgmr.msra.gmra.mrb[134].mxu0 %vm3688_vm3, %v7030_v18 }
 0x4d9   : > { %v14657_v4 = vpop.permute.xlu1 %8495 }
 0x4da   : > { %16481 = vst [vmem:[#allocation35_spill] sm:$0xff] %v14657_v4 }
 0x4db   : > { %8647 = vrot.lane.b32.xlu1 %v8616_v11, %s12331_s12 }
 0x4dc   : > { %v12313_v46 = vpop.eup %12312 }
 0x4dd   : > { %v7031_v19 = vmul.f32 %v12313_v46, %v14553_v56  ;;  %v7032_v50 = vmul.f32 %v12313_v46, %v14558_v7  ;;  %v14659_v56 = vpop.permute.xlu0 %8557  ;;  %v14661_v7 = vpop.permute.xlu1 %8559 }
 0x4de   : > { %16482 = vst [vmem:[#allocation32_spill] sm:$0xff] %v14661_v7 }
 0x4df   : > { %11675 = vmatprep.mubr.msk.f32.mxu1 %vm3688_vm3, %v7031_v19  ;;  %8711 = vrot.lane.b32.xlu1 %v8680_v49, %s12332_s13 }
 0x4e0   : > { %11676 = vmatmul.mubr.msk.f32.vlgmr.msra.gmra.mrb[118].mxu1 %vm3688_vm3, %v7032_v50 }
 0x4e1   : > { %v14663_v29 = vpop.permute.xlu0 %8621  ;;  %v14665_v8 = vpop.permute.xlu1 %8623 }
 0x4e2   : > { %16483 = vst [vmem:[#allocation37_spill] sm:$0xff] %v14665_v8 }
 0x4e3   : > { %8775 = vrot.lane.b32.xlu1 %v8744_v61, %s12333_s14 }
 0x4e5   : > { %v14667_v0 = vpop.permute.xlu0 %8685  ;;  %v14669_v17 = vpop.permute.xlu1 %8687 }
 0x4e6   : > { %16484 = vst [vmem:[#allocation34_spill] sm:$0xff] %v14667_v0  ;;  %16485 = vst [vmem:[#allocation39_spill] sm:$0xff] %v14669_v17 }
 0x4e9   : > { %v14671_v23 = vpop.permute.xlu0 %8749  ;;  %v14673_v43 = vpop.permute.xlu1 %8751 }
 0x4ea   : > { %16486 = vst [vmem:[#allocation36_spill] sm:$0xff] %v14671_v23  ;;  %16487 = vst [vmem:[#allocation41_spill] sm:$0xff] %v14673_v43 }
 0x4ed   : > { %v14675_v60 = vpop.permute.xlu0 %8369  ;;  %v14677_v45 = vpop.permute.xlu1 %8371 }
 0x4ee   : > { %16488 = vst [vmem:[#allocation38_spill] sm:$0xff] %v14675_v60  ;;  %16489 = vst [vmem:[#allocation43_spill] sm:$0xff] %v14677_v45 }
 0x4f1   : > { %v14679_v57 = vpop.permute.xlu0 %8433  ;;  %v14681_v24 = vpop.permute.xlu1 %8435 }
 0x4f2   : > { %16490 = vst [vmem:[#allocation40_spill] sm:$0xff] %v14679_v57  ;;  %16491 = vst [vmem:[#allocation45_spill] sm:$0xff] %v14681_v24 }
 0x4f5   : > { %v14683_v15 = vpop.permute.xlu0 %8497  ;;  %v14685_v26 = vpop.permute.xlu1 %8499 }
 0x4f6   : > { %16492 = vst [vmem:[#allocation42_spill] sm:$0xff] %v14683_v15  ;;  %16493 = vst [vmem:[#allocation47_spill] sm:$0xff] %v14685_v26 }
 0x4f9   : > { %v14687_v51 = vpop.permute.xlu0 %8561  ;;  %v14689_v33 = vpop.permute.xlu1 %8563 }
 0x4fa   : > { %16494 = vst [vmem:[#allocation44_spill] sm:$0xff] %v14687_v51  ;;  %16495 = vst [vmem:[#allocation46_spill] sm:$0xff] %v14689_v33 }
 0x4fd   : > { %v14691_v12 = vpop.permute.xlu0 %8625  ;;  %v14693_v20 = vpop.permute.xlu1 %8627 }
 0x4fe   : > { %16496 = vst [vmem:[#allocation24_spill] sm:$0xff] %v14691_v12  ;;  %16497 = vst [vmem:[#allocation7_spill] sm:$0xff] %v14693_v20 }
 0x501   : > { %v14695_v36 = vpop.permute.xlu0 %8689  ;;  %v14697_v62 = vpop.permute.xlu1 %8691 }
 0x502   : > { %16498 = vst [vmem:[#allocation8_spill] sm:$0xff] %v14695_v36  ;;  %16499 = vst [vmem:[#allocation9_spill] sm:$0xff] %v14697_v62 }
 0x505   : > { %v14699_v59 = vpop.permute.xlu0 %8753  ;;  %v14701_v37 = vpop.permute.xlu1 %8755 }
 0x506   : > { %16500 = vst [vmem:[#allocation29_spill] sm:$0xff] %v14699_v59  ;;  %16501 = vst [vmem:[#allocation26_spill] sm:$0xff] %v14701_v37 }
 0x509   : > { %v14703_v5 = vpop.permute.xlu0 %8373  ;;  %v14705_v22 = vpop.permute.xlu1 %8375 }
 0x50a   : > { %16502 = vst [vmem:[#allocation31_spill] sm:$0xff] %v14703_v5  ;;  %16503 = vst [vmem:[#allocation28_spill] sm:$0xff] %v14705_v22 }
 0x50d   : > { %v14707_v6 = vpop.permute.xlu0 %8437  ;;  %v14709_v34 = vpop.permute.xlu1 %8439 }
 0x50e   : > { %16504 = vst [vmem:[#allocation33_spill] sm:$0xff] %v14707_v6  ;;  %16505 = vst [vmem:[#allocation10_spill] sm:$0xff] %v14709_v34 }
 0x511   : > { %v14711_v10 = vpop.permute.xlu0 %8501  ;;  %v14713_v41 = vpop.permute.xlu1 %8503 }
 0x512   : > { %16506 = vst [vmem:[#allocation11_spill] sm:$0xff] %v14711_v10  ;;  %16507 = vst [vmem:[#allocation12_spill] sm:$0xff] %v14713_v41 }
 0x515   : > { %v14715_v25 = vpop.permute.xlu0 %8565  ;;  %v14717_v40 = vpop.permute.xlu1 %8567 }
 0x516   : > { %16508 = vst [vmem:[#allocation13_spill] sm:$0xff] %v14715_v25  ;;  %16509 = vst [vmem:[#allocation14_spill] sm:$0xff] %v14717_v40 }
 0x519   : > { %v14719_v18 = vpop.permute.xlu0 %8629  ;;  %v14721_v63 = vpop.permute.xlu1 %8631 }
 0x51a   : > { %16510 = vst [vmem:[#allocation15_spill] sm:$0xff] %v14719_v18  ;;  %16511 = vst [vmem:[#allocation49_spill] sm:$0xff] %v14721_v63 }
 0x51d   : > { %v14723_v3 = vpop.permute.xlu0 %8693  ;;  %v14725_v11 = vpop.permute.xlu1 %8695 }
 0x51e   : > { %16512 = vst [vmem:[#allocation50_spill] sm:$0xff] %v14723_v3  ;;  %16513 = vst [vmem:[#allocation51_spill] sm:$0xff] %v14725_v11 }
 0x521   : > { %v14727_v46 = vpop.permute.xlu0 %8757  ;;  %v14729_v19 = vpop.permute.xlu1 %8759 }
 0x522   : > { %16514 = vst [vmem:[#allocation52_spill] sm:$0xff] %v14727_v46  ;;  %16515 = vst [vmem:[#allocation53_spill] sm:$0xff] %v14729_v19 }
 0x525   : > { %v14731_v50 = vpop.permute.xlu0 %8377  ;;  %v14733_v49 = vpop.permute.xlu1 %8379 }
 0x526   : > { %16516 = vst [vmem:[#allocation54_spill] sm:$0xff] %v14731_v50  ;;  %16517 = vst [vmem:[#allocation55_spill] sm:$0xff] %v14733_v49 }
 0x529   : > { %v14735_v61 = vpop.permute.xlu0 %8441  ;;  %v14737_v38 = vpop.permute.xlu1 %8443 }
 0x52a   : > { %16518 = vst [vmem:[#allocation56_spill] sm:$0xff] %v14735_v61  ;;  %16519 = vst [vmem:[#allocation57_spill] sm:$0xff] %v14737_v38 }
 0x52d   : > { %v14739_v9 = vpop.permute.xlu0 %8505  ;;  %v14741_v13 = vpop.permute.xlu1 %8507 }
 0x52e   : > { %16520 = vst [vmem:[#allocation58_spill] sm:$0xff] %v14739_v9  ;;  %16521 = vst [vmem:[#allocation59_spill] sm:$0xff] %v14741_v13 }
 0x531   : > { %v14743_v44 = vpop.permute.xlu0 %8569  ;;  %v14745_v32 = vpop.permute.xlu1 %8571 }
 0x532   : > { %16522 = vst [vmem:[#allocation60_spill] sm:$0xff] %v14743_v44  ;;  %16523 = vst [vmem:[#allocation61_spill] sm:$0xff] %v14745_v32 }
 0x535   : > { %v14747_v11 = vpop.permute.xlu0 %8633  ;;  %v14749_v63 = vpop.permute.xlu1 %8635 }
 0x536   : > { %16524 = vst [vmem:[#allocation62_spill] sm:$0xff] %v14747_v11  ;;  %16525 = vst [vmem:[#allocation63_spill] sm:$0xff] %v14749_v63 }
 0x539   : > { %v14751_v19 = vpop.permute.xlu0 %8697  ;;  %v14753_v50 = vpop.permute.xlu1 %8699 }
 0x53a   : > { %16526 = vst [vmem:[#allocation64_spill] sm:$0xff] %v14751_v19  ;;  %16527 = vst [vmem:[#allocation65_spill] sm:$0xff] %v14753_v50 }
 0x53d   : > { %v14755_v49 = vpop.permute.xlu0 %8761  ;;  %v14757_v61 = vpop.permute.xlu1 %8763 }
 0x53e   : > { %16528 = vst [vmem:[#allocation66_spill] sm:$0xff] %v14755_v49  ;;  %16529 = vst [vmem:[#allocation67_spill] sm:$0xff] %v14757_v61 }
 0x541   : > { %v14759_v38 = vpop.permute.xlu0 %8381  ;;  %v14761_v9 = vpop.permute.xlu1 %8383 }
 0x542   : > { %16530 = vst [vmem:[#allocation68_spill] sm:$0xff] %v14759_v38  ;;  %16531 = vst [vmem:[#allocation69_spill] sm:$0xff] %v14761_v9 }
 0x545   : > { %v14763_v13 = vpop.permute.xlu0 %8445  ;;  %v14765_v32 = vpop.permute.xlu1 %8447 }
 0x546   : > { %16532 = vst [vmem:[#allocation70_spill] sm:$0xff] %v14763_v13  ;;  %16533 = vst [vmem:[#allocation71_spill] sm:$0xff] %v14765_v32 }
 0x549   : > { %v14770_v63 = vpop.permute.xlu0 %8509  ;;  %v14776_v9 = vpop.permute.xlu1 %8511 }
 0x54a   : > { %16534 = vst [vmem:[#allocation72_spill] sm:$0xff] %v14770_v63  ;;  %16535 = vst [vmem:[#allocation73_spill] sm:$0xff] %v14776_v9 }
 0x54d   : > { %v14782_v40 = vpop.permute.xlu0 %8573  ;;  %v14790_v3 = vpop.permute.xlu1 %8575 }
 0x54e   : > { %16536 = vst [vmem:[#allocation74_spill] sm:$0xff] %v14782_v40  ;;  %16537 = vst [vmem:[#allocation75_spill] sm:$0xff] %v14790_v3 }
 0x551   : > { %v14796_v40 = vpop.permute.xlu0 %8637 }
 0x552   : > { %16538 = vst [vmem:[#allocation76_spill] sm:$0xff] %v14796_v40 }
 0x555   : > { %v14808_v25 = vpop.permute.xlu0 %8701 }
 0x556   : > { %16540 = vst [vmem:[#allocation78_spill] sm:$0xff] %v14808_v25 }
 0x559   : > { %v14826_v5 = vpop.permute.xlu0 %8765 }
 0x55a   : > { %16543 = vst [vmem:[#allocation81_spill] sm:$0xff] %v14826_v5 }
 0x583   : > { %v11572_v44 = vpop.f32.mrb[120].mxu0 }
 0x584   : > { %v14767_v11 = vpop.f32.mrb[121].mxu0  ;;  %9391 = vrot.lane.b32.xlu0 %v11572_v44, %s12330_s11  ;;  %v9439_v50 = vrot.slane %v11572_v44, 1  ;;  %v9503_v38 = vrot.slane %v11572_v44, 2  ;;  %v9631_v34 = vrot.slane %v11572_v44, 4  ;;  %v9759_v6 = vrot.slane %v11572_v44, 6 }
 0x585   : > { %v9823_v37 = vrot.slane %v11572_v44, 7  ;;  %v8927_v5 = vrot.slane %v14767_v11, 1 }
 0x588   : > { %v11579_v19 = vpop.f32.mrb[104].mxu1  ;;  %9455 = vrot.lane.b32.xlu0 %v9439_v50, %s12334_s15  ;;  %v9567_v50 = vrot.slane %v11572_v44, 3 }
 0x589   : > { %9393 = vrot.lane.b32.xlu1 %v11579_v19, %s12330_s11  ;;  %v14773_v61 = vpop.f32.mrb[105].mxu1  ;;  %v9440_v32 = vrot.slane %v11579_v19, 1  ;;  %v9504_v46 = vrot.slane %v11579_v19, 2  ;;  %v9632_v22 = vrot.slane %v11579_v19, 4  ;;  %v9824_v33 = vrot.slane %v11579_v19, 7 }
 0x58c   : > { %v14778_v13 = vpop.f32.mrb[122].mxu0  ;;  %9519 = vrot.lane.b32.xlu0 %v9503_v38, %s12331_s12  ;;  %v9568_v38 = vrot.slane %v11579_v19, 3 }
 0x58d   : > { %v14780_v49 = vpop.f32.mrb[123].mxu0  ;;  %9457 = vrot.lane.b32.xlu1 %v9440_v32, %s12334_s15 }
 0x58f   : > { %v14786_v63 = vpop.f32.mrb[106].mxu1 }
 0x590   : > { %v14788_v41 = vpop.f32.mrb[107].mxu1  ;;  %9583 = vrot.lane.b32.xlu0 %v9567_v50, %s12335_s16  ;;  %v9695_v50 = vrot.slane %v11572_v44, 5  ;;  %v14843_v44 = vpop.permute.xlu0 %8385 }
 0x591   : > { %9521 = vrot.lane.b32.xlu1 %v9504_v46, %s12331_s12  ;;  %v14806_v46 = vpop.permute.xlu1 %8639  ;;  %16550 = vst [vmem:[#allocation88_spill] sm:$0xff] %v14843_v44 }
 0x592   : > { %v14794_v9 = vpop.f32.mrb[124].mxu0  ;;  %16539 = vst [vmem:[#allocation77_spill] sm:$0xff] %v14806_v46 }
 0x593   : > { %v14798_v32 = vpop.f32.mrb[125].mxu0 }
 0x594   : > { %9647 = vrot.lane.b32.xlu0 %v9631_v34, %s12332_s13  ;;  %v8931_v17 = vrot.slane %v14798_v32, 1  ;;  %v9123_v23 = vrot.slane %v14798_v32, 4  ;;  %v9187_v0 = vrot.slane %v14798_v32, 5 }
 0x595   : > { %v14800_v18 = vpop.f32.mrb[108].mxu1  ;;  %9585 = vrot.lane.b32.xlu1 %v9568_v38, %s12335_s16  ;;  %v9696_v38 = vrot.slane %v11579_v19, 5  ;;  %v14816_v34 = vpop.permute.xlu1 %8703 }
 0x596   : > { %v14804_v3 = vpop.f32.mrb[109].mxu1  ;;  %16541 = vst [vmem:[#allocation79_spill] sm:$0xff] %v14816_v34  ;;  %v9828_v43 = vrot.slane %v14800_v18, 7 }
 0x597   : > { %v8932_v8 = vrot.slane %v14804_v3, 1  ;;  %v9060_v7 = vrot.slane %v14804_v3, 3  ;;  %v9124_v4 = vrot.slane %v14804_v3, 4 }
 0x598   : > { %9711 = vrot.lane.b32.xlu0 %v9695_v50, %s12336_s17  ;;  %v9760_v50 = vrot.slane %v11579_v19, 6  ;;  %v8991_v19 = vrot.slane %v14767_v11, 2 }
 0x599   : > { %9649 = vrot.lane.b32.xlu1 %v9632_v22, %s12332_s13  ;;  %v14838_v20 = vpop.permute.xlu1 %8767 }
 0x59a   : > { %16548 = vst [vmem:[#allocation86_spill] sm:$0xff] %v14838_v20  ;;  %v8928_v20 = vrot.slane %v14773_v61, 1 }
 0x59b   : > { %v14812_v40 = vpop.f32.mrb[126].mxu0 }
 0x59c   : > { %v14814_v10 = vpop.f32.mrb[127].mxu0  ;;  %9775 = vrot.lane.b32.xlu0 %v9759_v6, %s12333_s14 }
 0x59d   : > { %9713 = vrot.lane.b32.xlu1 %v9696_v38, %s12336_s17 }
 0x59e   : > { %v14820_v46 = vpop.f32.mrb[110].mxu1 }
 0x59f   : > { %v14822_v25 = vpop.f32.mrb[111].mxu1  ;;  %v14824_v22 = vpop.f32.mrb[128].mxu0 }
 0x5a0   : > { %16542 = vst [vmem:[#allocation80_spill] sm:$0xff] %v14824_v22  ;;  %v14828_v62 = vpop.f32.mrb[129].mxu0  ;;  %9839 = vrot.lane.b32.xlu0 %v9823_v37, %s12337_s18  ;;  %v9059_v22 = vrot.slane %v14798_v32, 3 }
 0x5a1   : > { %16544 = vst [vmem:[#allocation82_spill] sm:$0xff] %v14828_v62  ;;  %9777 = vrot.lane.b32.xlu1 %v9760_v50, %s12333_s14  ;;  %v9764_v62 = vrot.slane %v14800_v18, 6 }
 0x5a2   : > { %v14832_v38 = vpop.f32.mrb[112].mxu1 }
 0x5a3   : > { %16545 = vst [vmem:[#allocation83_spill] sm:$0xff] %v14832_v38  ;;  %v14834_v6 = vpop.f32.mrb[113].mxu1  ;;  %v14836_v34 = vpop.f32.mrb[130].mxu0 }
 0x5a4   : > { %16546 = vst [vmem:[#allocation84_spill] sm:$0xff] %v14834_v6  ;;  %16547 = vst [vmem:[#allocation85_spill] sm:$0xff] %v14836_v34  ;;  %v14841_v59 = vpop.f32.mrb[131].mxu0  ;;  %8943 = vrot.lane.b32.xlu0 %v8927_v5, %s12338_s19 }
 0x5a5   : > { %16549 = vst [vmem:[#allocation87_spill] sm:$0xff] %v14841_v59  ;;  %9841 = vrot.lane.b32.xlu1 %v9824_v33, %s12337_s18  ;;  %v14857_v59 = vpop.permute.xlu1 %8387 }
 0x5a6   : > { %v14847_v37 = vpop.f32.mrb[114].mxu1  ;;  %16555 = vst [vmem:[#allocation93_spill] sm:$0xff] %v14857_v59  ;;  %v9119_v59 = vrot.slane %v14767_v11, 4 }
 0x5a7   : > { %16551 = vst [vmem:[#allocation89_spill] sm:$0xff] %v14847_v37  ;;  %v14849_v50 = vpop.f32.mrb[115].mxu1  ;;  %v14851_v26 = vpop.f32.mrb[132].mxu0  ;;  %v9055_v37 = vrot.slane %v14767_v11, 3 }
 0x5a8   : > { %16552 = vst [vmem:[#allocation90_spill] sm:$0xff] %v14849_v50  ;;  %16553 = vst [vmem:[#allocation91_spill] sm:$0xff] %v14851_v26  ;;  %v14855_v34 = vpop.f32.mrb[133].mxu0  ;;  %9007 = vrot.lane.b32.xlu0 %v8991_v19, %s12327_s30  ;;  %v14867_v50 = vpop.permute.xlu0 %8449  ;;  %v8992_v26 = vrot.slane %v14773_v61, 2  ;;  %v9056_v19 = vrot.slane %v14773_v61, 3 }
 0x5a9   : > { %16554 = vst [vmem:[#allocation92_spill] sm:$0xff] %v14855_v34  ;;  %8945 = vrot.lane.b32.xlu1 %v8928_v20, %s12338_s19  ;;  %16559 = vst [vmem:[#allocation97_spill] sm:$0xff] %v14867_v50  ;;  %v14875_v20 = vpop.permute.xlu1 %8451 }
 0x5aa   : > { %v14861_v33 = vpop.f32.mrb[116].mxu1  ;;  %16561 = vst [vmem:[#allocation99_spill] sm:$0xff] %v14875_v20 }
 0x5ab   : > { %16556 = vst [vmem:[#allocation94_spill] sm:$0xff] %v14861_v33  ;;  %v14863_v5 = vpop.f32.mrb[117].mxu1  ;;  %v14865_v44 = vpop.f32.mrb[134].mxu0  ;;  %v9508_v33 = vrot.slane %v14800_v18, 2 }
 0x5ac   : > { %16557 = vst [vmem:[#allocation95_spill] sm:$0xff] %v14863_v5  ;;  %16558 = vst [vmem:[#allocation96_spill] sm:$0xff] %v14865_v44  ;;  %v14871_v36 = vpop.f32.mrb[135].mxu0  ;;  %9071 = vrot.lane.b32.xlu0 %v9055_v37, %s12339_s20  ;;  %v14879_v44 = vpop.permute.xlu0 %8513 }
 0x5ad   : > { %16560 = vst [vmem:[#allocation98_spill] sm:$0xff] %v14871_v36  ;;  %9009 = vrot.lane.b32.xlu1 %v8992_v26, %s12327_s30  ;;  %16562 = vst [vmem:[#allocation100_spill] sm:$0xff] %v14879_v44  ;;  %v9120_v36 = vrot.slane %v14773_v61, 4  ;;  %v9183_v26 = vrot.slane %v14767_v11, 5  ;;  %v14889_v37 = vpop.permute.xlu1 %8515 }
 0x5ae   : > { %16565 = vst [vmem:[#allocation103_spill] sm:$0xff] %v14889_v37  ;;  %v9311_v37 = vrot.slane %v14767_v11, 7 }
 0x5b0   : > { %9135 = vrot.lane.b32.xlu0 %v9119_v59, %s12328_s9  ;;  %v14893_v20 = vpop.permute.xlu0 %8577  ;;  %v9247_v59 = vrot.slane %v14767_v11, 6 }
 0x5b1   : > { %9073 = vrot.lane.b32.xlu1 %v9056_v19, %s12339_s20  ;;  %16566 = vst [vmem:[#allocation104_spill] sm:$0xff] %v14893_v20  ;;  %v9184_v19 = vrot.slane %v14773_v61, 5  ;;  %v14899_v44 = vpop.permute.xlu1 %8579 }
 0x5b2   : > { %16567 = vst [vmem:[#allocation105_spill] sm:$0xff] %v14899_v44 }
 0x5b3   : > { %v14883_v50 = vpop.f32.mrb[118].mxu1 }
 0x5b4   : > { %16563 = vst [vmem:[#allocation101_spill] sm:$0xff] %v14883_v50  ;;  %v14887_v5 = vpop.f32.mrb[119].mxu1  ;;  %9199 = vrot.lane.b32.xlu0 %v9183_v26, %s12340_s21  ;;  %v9312_v26 = vrot.slane %v14773_v61, 7 }
 0x5b5   : > { %16564 = vst [vmem:[#allocation102_spill] sm:$0xff] %v14887_v5  ;;  %9137 = vrot.lane.b32.xlu1 %v9120_v36, %s12328_s9  ;;  %v9248_v5 = vrot.slane %v14773_v61, 6  ;;  %v14903_v36 = vpop.permute.xlu0 %8641  ;;  %v14908_v20 = vpop.permute.xlu1 %8643 }
 0x5b6   : > { %16568 = vst [vmem:[#allocation106_spill] sm:$0xff] %v14903_v36  ;;  %16569 = vst [vmem:[#allocation107_spill] sm:$0xff] %v14908_v20  ;;  %v9505_v20 = vrot.slane %v14778_v13, 2 }
 0x5b8   : > { %9263 = vrot.lane.b32.xlu0 %v9247_v59, %s12329_s10  ;;  %v9441_v59 = vrot.slane %v14778_v13, 1 }
 0x5b9   : > { %9201 = vrot.lane.b32.xlu1 %v9184_v19, %s12340_s21  ;;  %v14913_v19 = vpop.permute.xlu0 %8705 }
 0x5ba   : > { %16570 = vst [vmem:[#allocation108_spill] sm:$0xff] %v14913_v19  ;;  %v9569_v19 = vrot.slane %v14778_v13, 3 }
 0x5bc   : > { %9327 = vrot.lane.b32.xlu0 %v9311_v37, %s12341_s22  ;;  %v9442_v37 = vrot.slane %v14786_v63, 1 }
 0x5bd   : > { %9265 = vrot.lane.b32.xlu1 %v9248_v5, %s12329_s10  ;;  %v14919_v5 = vpop.permute.xlu1 %8707  ;;  %v14923_v44 = vpop.permute.xlu0 %8769 }
 0x5be   : > { %16571 = vst [vmem:[#allocation109_spill] sm:$0xff] %v14919_v5  ;;  %16572 = vst [vmem:[#allocation110_spill] sm:$0xff] %v14923_v44  ;;  %v9570_v5 = vrot.slane %v14786_v63, 3  ;;  %v9633_v44 = vrot.slane %v14778_v13, 4 }
 0x5c0   : > { %9395 = vrot.lane.b32.xlu0 %v14778_v13, %s12330_s11 }
 0x5c1   : > { %9329 = vrot.lane.b32.xlu1 %v9312_v26, %s12341_s22  ;;  %v9506_v26 = vrot.slane %v14786_v63, 2  ;;  %v14929_v36 = vpop.permute.xlu1 %8771 }
 0x5c2   : > { %16573 = vst [vmem:[#allocation111_spill] sm:$0xff] %v14929_v36  ;;  %v9697_v36 = vrot.slane %v14778_v13, 5 }
 0x5c4   : > { %9459 = vrot.lane.b32.xlu0 %v9441_v59, %s12334_s15  ;;  %v14933_v59 = vpop.permute.xlu0 %8389 }
 0x5c5   : > { %9397 = vrot.lane.b32.xlu1 %v14786_v63, %s12330_s11  ;;  %16574 = vst [vmem:[#allocation112_spill] sm:$0xff] %v14933_v59 }
 0x5c8   : > { %9523 = vrot.lane.b32.xlu0 %v9505_v20, %s12331_s12  ;;  %v14939_v20 = vpop.permute.xlu1 %8391  ;;  %v14943_v50 = vpop.permute.xlu0 %8453 }
 0x5c9   : > { %9461 = vrot.lane.b32.xlu1 %v9442_v37, %s12334_s15  ;;  %16575 = vst [vmem:[#allocation113_spill] sm:$0xff] %v14939_v20  ;;  %v9634_v37 = vrot.slane %v14786_v63, 4  ;;  %16576 = vst [vmem:[#allocation114_spill] sm:$0xff] %v14943_v50  ;;  %v9825_v20 = vrot.slane %v14778_v13, 7 }
 0x5cc   : > { %9587 = vrot.lane.b32.xlu0 %v9569_v19, %s12335_s16  ;;  %v9698_v19 = vrot.slane %v14786_v63, 5  ;;  %v14949_v59 = vpop.permute.xlu1 %8455 }
 0x5cd   : > { %9525 = vrot.lane.b32.xlu1 %v9506_v26, %s12331_s12  ;;  %v9761_v26 = vrot.slane %v14778_v13, 6  ;;  %16577 = vst [vmem:[#allocation115_spill] sm:$0xff] %v14949_v59  ;;  %v8929_v59 = vrot.slane %v14780_v49, 1  ;;  %v8993_v13 = vrot.slane %v14780_v49, 2 }
 0x5d0   : > { %9651 = vrot.lane.b32.xlu0 %v9633_v44, %s12332_s13  ;;  %v14953_v44 = vpop.permute.xlu0 %8517 }
 0x5d1   : > { %9589 = vrot.lane.b32.xlu1 %v9570_v5, %s12335_s16  ;;  %16578 = vst [vmem:[#allocation116_spill] sm:$0xff] %v14953_v44  ;;  %v9762_v5 = vrot.slane %v14786_v63, 6 }
 0x5d4   : > { %9715 = vrot.lane.b32.xlu0 %v9697_v36, %s12336_s17  ;;  %v14959_v36 = vpop.permute.xlu1 %8519  ;;  %v14963_v50 = vpop.permute.xlu0 %8581 }
 0x5d5   : > { %9653 = vrot.lane.b32.xlu1 %v9634_v37, %s12332_s13  ;;  %16579 = vst [vmem:[#allocation117_spill] sm:$0xff] %v14959_v36  ;;  %v9826_v37 = vrot.slane %v14786_v63, 7  ;;  %16580 = vst [vmem:[#allocation118_spill] sm:$0xff] %v14963_v50  ;;  %v8994_v63 = vrot.slane %v14788_v41, 2  ;;  %v9507_v50 = vrot.slane %v14794_v9, 2 }
 0x5d8   : > { %9779 = vrot.lane.b32.xlu0 %v9761_v26, %s12333_s14  ;;  %v14969_v26 = vpop.permute.xlu1 %8583 }
 0x5d9   : > { %9717 = vrot.lane.b32.xlu1 %v9698_v19, %s12336_s17  ;;  %v8930_v19 = vrot.slane %v14788_v41, 1  ;;  %16581 = vst [vmem:[#allocation119_spill] sm:$0xff] %v14969_v26  ;;  %v9121_v26 = vrot.slane %v14780_v49, 4 }
 0x5dc   : > { %9843 = vrot.lane.b32.xlu0 %v9825_v20, %s12337_s18  ;;  %v14973_v20 = vpop.permute.xlu0 %8645 }
 0x5dd   : > { %9781 = vrot.lane.b32.xlu1 %v9762_v5, %s12333_s14  ;;  %16582 = vst [vmem:[#allocation120_spill] sm:$0xff] %v14973_v20  ;;  %v9057_v5 = vrot.slane %v14780_v49, 3 }
 0x5e0   : > { %8947 = vrot.lane.b32.xlu0 %v8929_v59, %s12338_s19  ;;  %v14979_v59 = vpop.permute.xlu1 %8647  ;;  %v14983_v36 = vpop.permute.xlu0 %8709 }
 0x5e1   : > { %9845 = vrot.lane.b32.xlu1 %v9826_v37, %s12337_s18  ;;  %16583 = vst [vmem:[#allocation121_spill] sm:$0xff] %v14979_v59  ;;  %v9058_v37 = vrot.slane %v14788_v41, 3  ;;  %16584 = vst [vmem:[#allocation122_spill] sm:$0xff] %v14983_v36  ;;  %v9249_v59 = vrot.slane %v14780_v49, 6  ;;  %v9443_v36 = vrot.slane %v14794_v9, 1 }
 0x5e4   : > { %9011 = vrot.lane.b32.xlu0 %v8993_v13, %s12327_s30  ;;  %v9185_v13 = vrot.slane %v14780_v49, 5  ;;  %v14989_v20 = vpop.permute.xlu1 %8711 }
 0x5e5   : > { %8949 = vrot.lane.b32.xlu1 %v8930_v19, %s12338_s19  ;;  %v9122_v19 = vrot.slane %v14788_v41, 4  ;;  %16585 = vst [vmem:[#allocation123_spill] sm:$0xff] %v14989_v20  ;;  %v9250_v20 = vrot.slane %v14788_v41, 6 }
 0x5e8   : > { %9075 = vrot.lane.b32.xlu0 %v9057_v5, %s12339_s20  ;;  %v9186_v5 = vrot.slane %v14788_v41, 5 }
 0x5e9   : > { %9013 = vrot.lane.b32.xlu1 %v8994_v63, %s12327_s30  ;;  %v14993_v63 = vpop.permute.xlu0 %8773 }
 0x5ea   : > { %16586 = vst [vmem:[#allocation124_spill] sm:$0xff] %v14993_v63 }
 0x5ec   : > { %9139 = vrot.lane.b32.xlu0 %v9121_v26, %s12328_s9  ;;  %v14999_v26 = vpop.permute.xlu1 %8775 }
 0x5ed   : > { %9077 = vrot.lane.b32.xlu1 %v9058_v37, %s12339_s20  ;;  %16587 = vst [vmem:[#allocation125_spill] sm:$0xff] %v14999_v26 }
 0x5f0   : > { %9203 = vrot.lane.b32.xlu0 %v9185_v13, %s12340_s21 }
 0x5f1   : > { %9141 = vrot.lane.b32.xlu1 %v9122_v19, %s12328_s9  ;;  %v9313_v19 = vrot.slane %v14780_v49, 7 }
 0x5f4   : > { %9267 = vrot.lane.b32.xlu0 %v9249_v59, %s12329_s10 }
 0x5f5   : > { %9205 = vrot.lane.b32.xlu1 %v9186_v5, %s12340_s21  ;;  %v9314_v5 = vrot.slane %v14788_v41, 7 }
 0x5f6   : > { %v15001_v37 = vpop.permute.xlu0 %9391 }
 0x5f8   : > { %9331 = vrot.lane.b32.xlu0 %v9313_v19, %s12341_s22 }
 0x5f9   : > { %9269 = vrot.lane.b32.xlu1 %v9250_v20, %s12329_s10 }
 0x5fa   : > { %v15009_v63 = vpop.permute.xlu0 %9455 }
 0x5fb   : > { %v15007_v13 = vpop.permute.xlu1 %9393 }
 0x5fc   : > { %9399 = vrot.lane.b32.xlu0 %v14794_v9, %s12330_s11 }
 0x5fd   : > { %9333 = vrot.lane.b32.xlu1 %v9314_v5, %s12341_s22  ;;  %v9444_v5 = vrot.slane %v14800_v18, 1 }
 0x5fe   : > { %v15017_v26 = vpop.permute.xlu0 %9519 }
 0x5ff   : > { %v15015_v59 = vpop.permute.xlu1 %9457 }
 0x600   : > { %9463 = vrot.lane.b32.xlu0 %v9443_v36, %s12334_s15  ;;  %v9571_v36 = vrot.slane %v14794_v9, 3 }
 0x601   : > { %9401 = vrot.lane.b32.xlu1 %v14800_v18, %s12330_s11 }
 0x602   : > { %v15025_v19 = vpop.permute.xlu0 %9583 }
 0x603   : > { %v15023_v20 = vpop.permute.xlu1 %9521 }
 0x604   : > { %9527 = vrot.lane.b32.xlu0 %v9507_v50, %s12331_s12  ;;  %v9635_v50 = vrot.slane %v14794_v9, 4 }
 0x605   : > { %9465 = vrot.lane.b32.xlu1 %v9444_v5, %s12334_s15  ;;  %v9572_v5 = vrot.slane %v14800_v18, 3 }
 0x606   : > { %v15033_v34 = vpop.permute.xlu0 %9647 }
 0x607   : > { %v15031_v44 = vpop.permute.xlu1 %9585 }
 0x608   : > { %9591 = vrot.lane.b32.xlu0 %v9571_v36, %s12335_s16  ;;  %v9699_v36 = vrot.slane %v14794_v9, 5 }
 0x609   : > { %9529 = vrot.lane.b32.xlu1 %v9508_v33, %s12331_s12  ;;  %v9636_v33 = vrot.slane %v14800_v18, 4 }
 0x60a   : > { %v15041_v12 = vpop.permute.xlu0 %9711 }
 0x60b   : > { %v15039_v24 = vpop.permute.xlu1 %9649 }
 0x60c   : > { %9655 = vrot.lane.b32.xlu0 %v9635_v50, %s12332_s13  ;;  %v9763_v50 = vrot.slane %v14794_v9, 6 }
 0x60d   : > { %9593 = vrot.lane.b32.xlu1 %v9572_v5, %s12335_s16  ;;  %v9700_v5 = vrot.slane %v14800_v18, 5  ;;  %v8996_v18 = vrot.slane %v14804_v3, 2 }
 0x60e   : > { %v15049_v51 = vpop.permute.xlu0 %9775 }
 0x60f   : > { %v15047_v45 = vpop.permute.xlu1 %9713 }
 0x610   : > { %9719 = vrot.lane.b32.xlu0 %v9699_v36, %s12336_s17 }
 0x611   : > { %9657 = vrot.lane.b32.xlu1 %v9636_v33, %s12332_s13  ;;  %v9827_v33 = vrot.slane %v14794_v9, 7  ;;  %v8995_v9 = vrot.slane %v14798_v32, 2 }
 0x612   : > { %v15057_v57 = vpop.permute.xlu0 %9839 }
 0x613   : > { %v15055_v15 = vpop.permute.xlu1 %9777 }
 0x614   : > { %9783 = vrot.lane.b32.xlu0 %v9763_v50, %s12333_s14 }
 0x615   : > { %9721 = vrot.lane.b32.xlu1 %v9700_v5, %s12336_s17 }
 0x616   : > { %v8944_v6 = vpop.permute.xlu0 %8943 }
 0x617   : > { %v15063_v60 = vpop.permute.xlu1 %9841 }
 0x618   : > { %9847 = vrot.lane.b32.xlu0 %v9827_v33, %s12337_s18 }
 0x619   : > { %9785 = vrot.lane.b32.xlu1 %v9764_v62, %s12333_s14 }
 0x61a   : > { %v9008_v38 = vpop.permute.xlu0 %9007 }
 0x61b   : > { %v8946_v36 = vpop.permute.xlu1 %8945 }
 0x61c   : > { %8951 = vrot.lane.b32.xlu0 %v8931_v17, %s12338_s19 }
 0x61d   : > { %9849 = vrot.lane.b32.xlu1 %v9828_v43, %s12337_s18 }
 0x61e   : > { %v9072_v50 = vpop.permute.xlu0 %9071 }
 0x61f   : > { %v9010_v5 = vpop.permute.xlu1 %9009 }
 0x620   : > { %9015 = vrot.lane.b32.xlu0 %v8995_v9, %s12327_s30 }
 0x621   : > { %8953 = vrot.lane.b32.xlu1 %v8932_v8, %s12338_s19  ;;  %v9887_v8 = vsel %vm347_vm0, %v14767_v11, %v8944_v6 }
 0x622   : > { %v9136_v33 = vpop.permute.xlu0 %9135  ;;  %v9903_v9 = vsel %vm3688_vm3, %v9887_v8, %v9008_v38  ;;  %v9188_v38 = vrot.slane %v14804_v3, 5 }
 0x623   : > { %v9074_v62 = vpop.permute.xlu1 %9073  ;;  %v9920_v39 = vsel %vm9919_vm5, %v9903_v9, %v9072_v50  ;;  %v9251_v50 = vrot.slane %v14798_v32, 6 }
 0x624   : > { %9079 = vrot.lane.b32.xlu0 %v9059_v22, %s12339_s20 }
 0x625   : > { %9017 = vrot.lane.b32.xlu1 %v8996_v18, %s12327_s30 }
 0x626   : > { %v9200_v43 = vpop.permute.xlu0 %9199 }
 0x627   : > { %v9138_v17 = vpop.permute.xlu1 %9137 }
 0x628   : > { %9143 = vrot.lane.b32.xlu0 %v9123_v23, %s12328_s9  ;;  %v9888_v23 = vsel %vm347_vm0, %v14773_v61, %v8946_v36  ;;  %v16588_v36 = vld [vmem:[#allocation17_spill] sm:$0xff] }
 0x629   : > { %9081 = vrot.lane.b32.xlu1 %v9060_v7, %s12339_s20  ;;  %v9936_v7 = vsel %vm8809_vm7, %v9920_v39, %v9136_v33  ;;  %v9904_v6 = vsel %vm3688_vm3, %v9888_v23, %v9010_v5 }
 0x62a   : > { %v9264_v22 = vpop.permute.xlu0 %9263  ;;  %v9953_v11 = vsel %vm9952_vm6, %v9936_v7, %v9200_v43  ;;  %v9921_v33 = vsel %vm9919_vm5, %v9904_v6, %v9074_v62  ;;  %v8793_v43 = vsel %vm3688_vm3, %v16588_v36, %v14432_v2  ;;  %v9445_v36 = vrot.slane %v14812_v40, 1 }
 0x62b   : > { %v9202_v18 = vpop.permute.xlu1 %9201  ;;  %v9969_v39 = vsel %vm8826_vm8, %v9953_v11, %v9264_v22  ;;  %v9937_v5 = vsel %vm8809_vm7, %v9921_v33, %v9138_v17  ;;  %v8810_v62 = vsel %vm8809_vm7, %v8793_v43, %v14469_v47  ;;  %v9252_v17 = vrot.slane %v14804_v3, 6  ;;  %v16589_v47 = vld [vmem:[#allocation48_spill] sm:$0xff] }
 0x62c   : > { %9207 = vrot.lane.b32.xlu0 %v9187_v0, %s12340_s21  ;;  %v9954_v9 = vsel %vm9952_vm6, %v9937_v5, %v9202_v18  ;;  %v9315_v11 = vrot.slane %v14798_v32, 7  ;;  %v8794_v18 = vsel %vm3688_vm3, %v16589_v47, %v14416_v35  ;;  %v9446_v5 = vrot.slane %v14820_v46, 1 }
 0x62d   : > { %9145 = vrot.lane.b32.xlu1 %v9124_v4, %s12328_s9  ;;  %v9638_v47 = vrot.slane %v14820_v46, 4 }
 0x62e   : > { %v9328_v0 = vpop.permute.xlu0 %9327 }
 0x62f   : > { %v9266_v4 = vpop.permute.xlu1 %9265  ;;  %v9986_v61 = vsel %vm9985_vm10, %v9969_v39, %v9328_v0 }
 0x630   : > { %v10002_v8 = vsel %vm8843_vm9, %v9986_v61, %v15001_v37  ;;  %9271 = vrot.lane.b32.xlu0 %v9251_v50, %s12329_s10  ;;  %v9970_v22 = vsel %vm8826_vm8, %v9954_v9, %v9266_v4  ;;  %v9573_v9 = vrot.slane %v14812_v40, 3 }
 0x631   : > { %9209 = vrot.lane.b32.xlu1 %v9188_v38, %s12340_s21  ;;  %v10019_v2 = vsel %vm10018_vm12, %v10002_v8, %v15009_v63  ;;  %v8827_v63 = vsel %vm8826_vm8, %v8810_v62, %v14503_v30  ;;  %v8811_v30 = vsel %vm8809_vm7, %v8794_v18, %v14454_v31  ;;  %v9509_v8 = vrot.slane %v14812_v40, 2 }
 0x632   : > { %v10035_v37 = vsel %vm8860_vm11, %v10019_v2, %v15017_v26  ;;  %v15125_v23 = vpop.permute.xlu0 %9395  ;;  %v8844_v26 = vsel %vm8843_vm9, %v8827_v63, %v14536_v21  ;;  %v9510_v62 = vrot.slane %v14820_v46, 2  ;;  %v9701_v18 = vrot.slane %v14812_v40, 5 }
 0x633   : > { %v9330_v7 = vpop.permute.xlu1 %9329  ;;  %v10052_v38 = vsel %vm10051_vm15, %v10035_v37, %v15025_v19  ;;  %v8861_v19 = vsel %vm8860_vm11, %v8844_v26, %v14560_v28  ;;  %v9316_v28 = vrot.slane %v14804_v3, 7  ;;  %v9637_v37 = vrot.slane %v14812_v40, 4 }
 0x634   : > { %v9987_v6 = vsel %vm9985_vm10, %v9970_v22, %v9330_v7  ;;  %v10068_v39 = vsel %vm8877_vm13, %v10052_v38, %v15033_v34  ;;  %9335 = vrot.lane.b32.xlu0 %v9315_v11, %s12341_s22  ;;  %v8878_v34 = vsel %vm8877_vm13, %v8861_v19, %v14581_v27  ;;  %v9574_v22 = vrot.slane %v14820_v46, 3 }
 0x635   : > { %v10003_v35 = vsel %vm8843_vm9, %v9987_v6, %v15007_v13  ;;  %9273 = vrot.lane.b32.xlu1 %v9252_v17, %s12329_s10  ;;  %v10085_v21 = vsel %vm10084_vm1, %v10068_v39, %v15041_v12  ;;  %v8828_v12 = vsel %vm8826_vm8, %v8811_v30, %v14489_v53  ;;  %v9702_v6 = vrot.slane %v14820_v46, 5 }
 0x636   : > { %v10020_v4 = vsel %vm10018_vm12, %v10003_v35, %v15015_v59  ;;  %v10101_v13 = vsel %vm8894_vm14, %v10085_v21, %v15049_v51  ;;  %v15163_v31 = vpop.permute.xlu0 %9459  ;;  %v8895_v59 = vsel %vm8894_vm14, %v8878_v34, %v14626_v48  ;;  %v9765_v26 = vrot.slane %v14812_v40, 6 }
 0x637   : > { %v10036_v0 = vsel %vm8860_vm11, %v10020_v4, %v15023_v20  ;;  %v15161_v50 = vpop.permute.xlu1 %9397  ;;  %v10118_v27 = vsel %vm10117_vm2, %v10101_v13, %v15057_v57  ;;  %v8845_v20 = vsel %vm8843_vm9, %v8828_v12, %v14526_v55  ;;  %v9766_v30 = vrot.slane %v14820_v46, 6 }
 0x638   : > { %v10053_v51 = vsel %vm10051_vm15, %v10036_v0, %v15031_v44  ;;  %v10134_v33 = vadd.f32 %v10118_v27, %v8895_v59  ;;  %9403 = vrot.lane.b32.xlu0 %v14812_v40, %s12330_s11  ;;  %v8862_v48 = vsel %vm8860_vm11, %v8845_v20, %v14550_v16  ;;  %v9829_v19 = vrot.slane %v14812_v40, 7 }
 0x639   : > { %v10069_v53 = vsel %vm8877_vm13, %v10053_v51, %v15039_v24  ;;  %9337 = vrot.lane.b32.xlu1 %v9316_v28, %s12341_s22  ;;  %v8879_v44 = vsel %vm8877_vm13, %v8862_v48, %v14576_v58  ;;  %v9830_v34 = vrot.slane %v14820_v46, 7  ;;  %v8933_v13 = vrot.slane %v14814_v10, 1 }
 0x63a   : > { %v10086_v57 = vsel %vm10084_vm1, %v10069_v53, %v15047_v45  ;;  %10150 = vst [vmem:[%s15173_s25] sm:$0x1] %v10134_v33  ;;  %v15197_v61 = vpop.permute.xlu0 %9523  ;;  %v8896_v43 = vsel %vm8894_vm14, %v8879_v44, %v14596_v42  ;;  %v8934_v12 = vrot.slane %v14822_v25, 1  ;;  %v8997_v40 = vrot.slane %v14814_v10, 2 }
 0x63b   : > { %v10102_v55 = vsel %vm8894_vm14, %v10086_v57, %v15055_v15  ;;  %v15195_v24 = vpop.permute.xlu1 %9461  ;;  %v9061_v51 = vrot.slane %v14814_v10, 3  ;;  %v9062_v53 = vrot.slane %v14822_v25, 3  ;;  %v9125_v48 = vrot.slane %v14814_v10, 4  ;;  %v16590_v57 = vld [vmem:[#allocation2_spill] sm:$0xff] }
 0x63c   : > { %v10119_v16 = vsel %vm10117_vm2, %v10102_v55, %v15063_v60  ;;  %9467 = vrot.lane.b32.xlu0 %v9445_v36, %s12334_s15  ;;  %v8795_v44 = vsel %vm3688_vm3, %v16590_v57, %v14618_v52  ;;  %v9318_v57 = vrot.slane %v14822_v25, 7 }
 0x63d   : > { %v10135_v45 = vadd.f32 %v10119_v16, %v8896_v43  ;;  %9405 = vrot.lane.b32.xlu1 %v14820_v46, %s12330_s11  ;;  %v8998_v46 = vrot.slane %v14822_v25, 2  ;;  %v8812_v36 = vsel %vm8809_vm7, %v8795_v44, %v14642_v1 }
 0x63e   : > { %v15210_v15 = vpop.permute.xlu0 %9587 }
 0x63f   : > { %10151 = vst [vmem:[%s15173_s25 + $0x1] sm:$0x1] %v10135_v45  ;;  %v15208_v58 = vpop.permute.xlu1 %9525 }
 0x640   : > { %9531 = vrot.lane.b32.xlu0 %v9509_v8, %s12331_s12  ;;  %v9189_v8 = vrot.slane %v14814_v10, 5 }
 0x641   : > { %9469 = vrot.lane.b32.xlu1 %v9446_v5, %s12334_s15  ;;  %v9126_v5 = vrot.slane %v14822_v25, 4 }
 0x642   : > { %v15218_v60 = vpop.permute.xlu0 %9651 }
 0x643   : > { %v15216_v42 = vpop.permute.xlu1 %9589 }
 0x644   : > { %9595 = vrot.lane.b32.xlu0 %v9573_v9, %s12335_s16 }
 0x645   : > { %9533 = vrot.lane.b32.xlu1 %v9510_v62, %s12331_s12 }
 0x646   : > { %v15226_v17 = vpop.permute.xlu0 %9715 }
 0x647   : > { %v15224_v2 = vpop.permute.xlu1 %9653 }
 0x648   : > { %9659 = vrot.lane.b32.xlu0 %v9637_v37, %s12332_s13 }
 0x649   : > { %9597 = vrot.lane.b32.xlu1 %v9574_v22, %s12335_s16 }
 0x64a   : > { %v15234_v11 = vpop.permute.xlu0 %9779 }
 0x64b   : > { %v15232_v7 = vpop.permute.xlu1 %9717 }
 0x64c   : > { %9723 = vrot.lane.b32.xlu0 %v9701_v18, %s12336_s17 }
 0x64d   : > { %9661 = vrot.lane.b32.xlu1 %v9638_v47, %s12332_s13 }
 0x64e   : > { %v15242_v38 = vpop.permute.xlu0 %9843 }
 0x64f   : > { %v15240_v63 = vpop.permute.xlu1 %9781 }
 0x650   : > { %9787 = vrot.lane.b32.xlu0 %v9765_v26, %s12333_s14  ;;  %v9253_v26 = vrot.slane %v14814_v10, 6 }
 0x651   : > { %9725 = vrot.lane.b32.xlu1 %v9702_v6, %s12336_s17  ;;  %v9190_v6 = vrot.slane %v14822_v25, 5 }
 0x652   : > { %v8948_v35 = vpop.permute.xlu0 %8947 }
 0x653   : > { %v15248_v39 = vpop.permute.xlu1 %9845  ;;  %v9889_v55 = vsel %vm347_vm0, %v14780_v49, %v8948_v35  ;;  %v8829_v49 = vsel %vm8826_vm8, %v8812_v36, %v14652_v14 }
 0x654   : > { %9851 = vrot.lane.b32.xlu0 %v9829_v19, %s12337_s18  ;;  %v8846_v19 = vsel %vm8843_vm9, %v8829_v49, %v14659_v56 }
 0x655   : > { %9789 = vrot.lane.b32.xlu1 %v9766_v30, %s12333_s14 }
 0x656   : > { %v9012_v4 = vpop.permute.xlu0 %9011 }
 0x657   : > { %v8950_v21 = vpop.permute.xlu1 %8949  ;;  %v9905_v43 = vsel %vm3688_vm3, %v9889_v55, %v9012_v4 }
 0x658   : > { %8955 = vrot.lane.b32.xlu0 %v8933_v13, %s12338_s19  ;;  %v9890_v1 = vsel %vm347_vm0, %v14788_v41, %v8950_v21 }
 0x659   : > { %9853 = vrot.lane.b32.xlu1 %v9830_v34, %s12337_s18 }
 0x65a   : > { %v9076_v28 = vpop.permute.xlu0 %9075 }
 0x65b   : > { %v9014_v0 = vpop.permute.xlu1 %9013  ;;  %v9922_v52 = vsel %vm9919_vm5, %v9905_v43, %v9076_v28 }
 0x65c   : > { %9019 = vrot.lane.b32.xlu0 %v8997_v40, %s12327_s30  ;;  %v9906_v22 = vsel %vm3688_vm3, %v9890_v1, %v9014_v0 }
 0x65d   : > { %8957 = vrot.lane.b32.xlu1 %v8934_v12, %s12338_s19  ;;  %v9317_v12 = vrot.slane %v14814_v10, 7 }
 0x65e   : > { %v9140_v27 = vpop.permute.xlu0 %9139 }
 0x65f   : > { %v9078_v59 = vpop.permute.xlu1 %9077  ;;  %v9938_v62 = vsel %vm8809_vm7, %v9922_v52, %v9140_v27 }
 0x660   : > { %9083 = vrot.lane.b32.xlu0 %v9061_v51, %s12339_s20  ;;  %v9923_v35 = vsel %vm9919_vm5, %v9906_v22, %v9078_v59  ;;  %v16591_v59 = vld [vmem:[#allocation19_spill] sm:$0xff]  ;;  %v16600_v22 = vld [vmem:[#allocation41_spill] sm:$0xff] }
 0x661   : > { %9021 = vrot.lane.b32.xlu1 %v8998_v46, %s12327_s30  ;;  %v8863_v46 = vsel %vm8860_vm11, %v8846_v19, %v14663_v29 }
 0x662   : > { %v9204_v33 = vpop.permute.xlu0 %9203 }
 0x663   : > { %v9142_v20 = vpop.permute.xlu1 %9141  ;;  %v9955_v9 = vsel %vm9952_vm6, %v9938_v62, %v9204_v33 }
 0x664   : > { %9147 = vrot.lane.b32.xlu0 %v9125_v48, %s12328_s9  ;;  %v9939_v14 = vsel %vm8809_vm7, %v9923_v35, %v9142_v20 }
 0x665   : > { %9085 = vrot.lane.b32.xlu1 %v9062_v53, %s12339_s20 }
 0x666   : > { %v9268_v45 = vpop.permute.xlu0 %9267 }
 0x667   : > { %v9206_v16 = vpop.permute.xlu1 %9205  ;;  %v9971_v37 = vsel %vm8826_vm8, %v9955_v9, %v9268_v45 }
 0x668   : > { %9211 = vrot.lane.b32.xlu0 %v9189_v8, %s12340_s21  ;;  %v9956_v21 = vsel %vm9952_vm6, %v9939_v14, %v9206_v16  ;;  %v16598_v8 = vld [vmem:[#allocation37_spill] sm:$0xff] }
 0x669   : > { %9149 = vrot.lane.b32.xlu1 %v9126_v5, %s12328_s9  ;;  %v16597_v5 = vld [vmem:[#allocation80_spill] sm:$0xff] }
 0x66a   : > { %v9332_v18 = vpop.permute.xlu0 %9331  ;;  %v9447_v9 = vrot.slane %v16597_v5, 1  ;;  %v9511_v35 = vrot.slane %v16597_v5, 2 }
 0x66b   : > { %v9270_v47 = vpop.permute.xlu1 %9269  ;;  %v9988_v30 = vsel %vm9985_vm10, %v9971_v37, %v9332_v18  ;;  %v16601_v18 = vld [vmem:[#allocation83_spill] sm:$0xff] }
 0x66c   : > { %v10004_v41 = vsel %vm8843_vm9, %v9988_v30, %v15125_v23  ;;  %9275 = vrot.lane.b32.xlu0 %v9253_v26, %s12329_s10  ;;  %v9972_v34 = vsel %vm8826_vm8, %v9956_v21, %v9270_v47  ;;  %v9254_v23 = vrot.slane %v14822_v25, 6  ;;  %v9448_v26 = vrot.slane %v16601_v18, 1 }
 0x66d   : > { %9213 = vrot.lane.b32.xlu1 %v9190_v6, %s12340_s21  ;;  %v10021_v4 = vsel %vm10018_vm12, %v10004_v41, %v15163_v31  ;;  %v8796_v31 = vsel %vm3688_vm3, %v16591_v59, %v14637_v54  ;;  %v9512_v14 = vrot.slane %v16601_v18, 2  ;;  %v9575_v41 = vrot.slane %v16597_v5, 3 }
 0x66e   : > { %v10037_v13 = vsel %vm8860_vm11, %v10021_v4, %v15197_v61  ;;  %v15308_v28 = vpop.permute.xlu0 %9399  ;;  %v9576_v4 = vrot.slane %v16601_v18, 3  ;;  %v9704_v59 = vrot.slane %v16601_v18, 5 }
 0x66f   : > { %v9334_v0 = vpop.permute.xlu1 %9333  ;;  %v10054_v56 = vsel %vm10051_vm15, %v10037_v13, %v15210_v15  ;;  %v16592_v15 = vld [vmem:[#allocation30_spill] sm:$0xff] }
 0x670   : > { %v9989_v40 = vsel %vm9985_vm10, %v9972_v34, %v9334_v0  ;;  %v10070_v27 = vsel %vm8877_vm13, %v10054_v56, %v15218_v60  ;;  %9339 = vrot.lane.b32.xlu0 %v9317_v12, %s12341_s22  ;;  %v8813_v51 = vsel %vm8809_vm7, %v8796_v31, %v16592_v15  ;;  %v16593_v60 = vld [vmem:[#allocation34_spill] sm:$0xff]  ;;  %v9639_v34 = vrot.slane %v16597_v5, 4 }
 0x671   : > { %v10005_v61 = vsel %vm8843_vm9, %v9989_v40, %v15161_v50  ;;  %9277 = vrot.lane.b32.xlu1 %v9254_v23, %s12329_s10  ;;  %v10087_v20 = vsel %vm10084_vm1, %v10070_v27, %v15226_v17  ;;  %v8880_v33 = vsel %vm8877_vm13, %v8863_v46, %v16593_v60  ;;  %v16594_v17 = vld [vmem:[#allocation35_spill] sm:$0xff]  ;;  %v9640_v23 = vrot.slane %v16601_v18, 4  ;;  %v16602_v60 = vld [vmem:[#allocation82_spill] sm:$0xff] }
 0x672   : > { %v10022_v54 = vsel %vm10018_vm12, %v10005_v61, %v15195_v24  ;;  %v10103_v50 = vsel %vm8894_vm14, %v10087_v20, %v15234_v11  ;;  %v15340_v48 = vpop.permute.xlu0 %9463  ;;  %v8830_v44 = vsel %vm8826_vm8, %v8813_v51, %v16594_v17  ;;  %v16595_v24 = vld [vmem:[#allocation36_spill] sm:$0xff]  ;;  %v9703_v12 = vrot.slane %v16597_v5, 5 }
 0x673   : > { %v10038_v53 = vsel %vm8860_vm11, %v10022_v54, %v15208_v58  ;;  %v15338_v29 = vpop.permute.xlu1 %9401  ;;  %v8897_v55 = vsel %vm8894_vm14, %v8880_v33, %v16595_v24  ;;  %v10120_v36 = vsel %vm10117_vm2, %v10103_v50, %v15242_v38  ;;  %v16596_v58 = vld [vmem:[#allocation32_spill] sm:$0xff]  ;;  %v9767_v31 = vrot.slane %v16597_v5, 6 }
 0x674   : > { %v10055_v11 = vsel %vm10051_vm15, %v10038_v53, %v15216_v42  ;;  %v8847_v43 = vsel %vm8843_vm9, %v8830_v44, %v16596_v58  ;;  %v10136_v16 = vadd.f32 %v10120_v36, %v8897_v55  ;;  %9407 = vrot.lane.b32.xlu0 %v16597_v5, %s12330_s11  ;;  %v16599_v42 = vld [vmem:[#allocation39_spill] sm:$0xff]  ;;  %v9768_v46 = vrot.slane %v16601_v18, 6 }
 0x675   : > { %v10071_v45 = vsel %vm8877_vm13, %v10055_v11, %v15224_v2  ;;  %9341 = vrot.lane.b32.xlu1 %v9318_v57, %s12341_s22  ;;  %v8864_v52 = vsel %vm8860_vm11, %v8847_v43, %v16598_v8  ;;  %v9831_v15 = vrot.slane %v16597_v5, 7  ;;  %v9832_v54 = vrot.slane %v16601_v18, 7  ;;  %v16603_v57 = vld [vmem:[#allocation84_spill] sm:$0xff] }
 0x676   : > { %v10088_v38 = vsel %vm10084_vm1, %v10071_v45, %v15232_v7  ;;  %v8881_v62 = vsel %vm8877_vm13, %v8864_v52, %v16599_v42  ;;  %10152 = vst [vmem:[%s15173_s25 + $0x2] sm:$0x1] %v10136_v16  ;;  %v15369_v1 = vpop.permute.xlu0 %9527  ;;  %v8935_v33 = vrot.slane %v16602_v60, 1  ;;  %v8936_v17 = vrot.slane %v16603_v57, 1 }
 0x677   : > { %v10104_v49 = vsel %vm8894_vm14, %v10088_v38, %v15240_v63  ;;  %v15367_v2 = vpop.permute.xlu1 %9465  ;;  %v8898_v37 = vsel %vm8894_vm14, %v8881_v62, %v16600_v22  ;;  %v8999_v44 = vrot.slane %v16602_v60, 2  ;;  %v9000_v36 = vrot.slane %v16603_v57, 2 }
 0x678   : > { %v10121_v47 = vsel %vm10117_vm2, %v10104_v49, %v15248_v39  ;;  %9471 = vrot.lane.b32.xlu0 %v9447_v9, %s12334_s15  ;;  %v9063_v11 = vrot.slane %v16602_v60, 3  ;;  %v9064_v16 = vrot.slane %v16603_v57, 3  ;;  %v9127_v45 = vrot.slane %v16602_v60, 4 }
 0x679   : > { %v10137_v7 = vadd.f32 %v10121_v47, %v8898_v37  ;;  %9409 = vrot.lane.b32.xlu1 %v16601_v18, %s12330_s11  ;;  %v9128_v42 = vrot.slane %v16603_v57, 4  ;;  %v9191_v62 = vrot.slane %v16602_v60, 5 }
 0x67a   : > { %v15382_v6 = vpop.permute.xlu0 %9591 }
 0x67b   : > { %10153 = vst [vmem:[%s15173_s25 + $0x3] sm:$0x1] %v10137_v7  ;;  %v15380_v63 = vpop.permute.xlu1 %9529 }
 0x67c   : > { %9535 = vrot.lane.b32.xlu0 %v9511_v35, %s12331_s12  ;;  %v9255_v35 = vrot.slane %v16602_v60, 6 }
 0x67d   : > { %9473 = vrot.lane.b32.xlu1 %v9448_v26, %s12334_s15  ;;  %v9192_v26 = vrot.slane %v16603_v57, 5 }
 0x67e   : > { %v15390_v30 = vpop.permute.xlu0 %9655 }
 0x67f   : > { %v15388_v39 = vpop.permute.xlu1 %9593 }
 0x680   : > { %9599 = vrot.lane.b32.xlu0 %v9575_v41, %s12335_s16  ;;  %v16605_v41 = vld [vmem:[#allocation16_spill] sm:$0xff] }
 0x681   : > { %9537 = vrot.lane.b32.xlu1 %v9512_v14, %s12331_s12  ;;  %v16604_v14 = vld [vmem:[#allocation38_spill] sm:$0xff] }
 0x682   : > { %v15398_v21 = vpop.permute.xlu0 %9719 }
 0x683   : > { %v15396_v19 = vpop.permute.xlu1 %9657 }
 0x684   : > { %9663 = vrot.lane.b32.xlu0 %v9639_v34, %s12332_s13 }
 0x685   : > { %9601 = vrot.lane.b32.xlu1 %v9576_v4, %s12335_s16  ;;  %v8797_v4 = vsel %vm3688_vm3, %v16605_v41, %v16604_v14 }
 0x686   : > { %v15406_v0 = vpop.permute.xlu0 %9783 }
 0x687   : > { %v15404_v13 = vpop.permute.xlu1 %9721 }
 0x688   : > { %9727 = vrot.lane.b32.xlu0 %v9703_v12, %s12336_s17 }
 0x689   : > { %9665 = vrot.lane.b32.xlu1 %v9640_v23, %s12332_s13  ;;  %v16606_v23 = vld [vmem:[#allocation40_spill] sm:$0xff] }
 0x68a   : > { %v15414_v40 = vpop.permute.xlu0 %9847  ;;  %v8814_v12 = vsel %vm8809_vm7, %v8797_v4, %v16606_v23 }
 0x68b   : > { %v15412_v56 = vpop.permute.xlu1 %9785 }
 0x68c   : > { %9791 = vrot.lane.b32.xlu0 %v9767_v31, %s12333_s14 }
 0x68d   : > { %9729 = vrot.lane.b32.xlu1 %v9704_v59, %s12336_s17 }
 0x68e   : > { %v8952_v61 = vpop.permute.xlu0 %8951 }
 0x68f   : > { %v15420_v27 = vpop.permute.xlu1 %9849  ;;  %v9891_v5 = vsel %vm347_vm0, %v14798_v32, %v8952_v61  ;;  %v16607_v61 = vld [vmem:[#allocation42_spill] sm:$0xff] }
 0x690   : > { %9855 = vrot.lane.b32.xlu0 %v9831_v15, %s12337_s18 }
 0x691   : > { %9793 = vrot.lane.b32.xlu1 %v9768_v46, %s12333_s14  ;;  %v8831_v46 = vsel %vm8826_vm8, %v8814_v12, %v16607_v61 }
 0x692   : > { %v9016_v20 = vpop.permute.xlu0 %9015 }
 0x693   : > { %v8954_v51 = vpop.permute.xlu1 %8953  ;;  %v9907_v8 = vsel %vm3688_vm3, %v9891_v5, %v9016_v20 }
 0x694   : > { %8959 = vrot.lane.b32.xlu0 %v8935_v33, %s12338_s19  ;;  %v9892_v22 = vsel %vm347_vm0, %v14804_v3, %v8954_v51 }
 0x695   : > { %9857 = vrot.lane.b32.xlu1 %v9832_v54, %s12337_s18 }
 0x696   : > { %v9080_v53 = vpop.permute.xlu0 %9079 }
 0x697   : > { %v9018_v50 = vpop.permute.xlu1 %9017  ;;  %v9924_v49 = vsel %vm9919_vm5, %v9907_v8, %v9080_v53  ;;  %v9319_v53 = vrot.slane %v16602_v60, 7 }
 0x698   : > { %9023 = vrot.lane.b32.xlu0 %v8999_v44, %s12327_s30  ;;  %v9908_v37 = vsel %vm3688_vm3, %v9892_v22, %v9018_v50 }
 0x699   : > { %8961 = vrot.lane.b32.xlu1 %v8936_v17, %s12338_s19  ;;  %v16608_v17 = vld [vmem:[#allocation44_spill] sm:$0xff] }
 0x69a   : > { %v9144_v55 = vpop.permute.xlu0 %9143  ;;  %v8848_v44 = vsel %vm8843_vm9, %v8831_v46, %v16608_v17 }
 0x69b   : > { %v9082_v24 = vpop.permute.xlu1 %9081  ;;  %v9940_v9 = vsel %vm8809_vm7, %v9924_v49, %v9144_v55  ;;  %v16609_v55 = vld [vmem:[#allocation43_spill] sm:$0xff]  ;;  %v9320_v49 = vrot.slane %v16603_v57, 7 }
 0x69c   : > { %9087 = vrot.lane.b32.xlu0 %v9063_v11, %s12339_s20  ;;  %v9925_v34 = vsel %vm9919_vm5, %v9908_v37, %v9082_v24 }
 0x69d   : > { %9025 = vrot.lane.b32.xlu1 %v9000_v36, %s12327_s30  ;;  %v16610_v36 = vld [vmem:[#allocation3_spill] sm:$0xff] }
 0x69e   : > { %v9208_v43 = vpop.permute.xlu0 %9207  ;;  %v8798_v11 = vsel %vm3688_vm3, %v16610_v36, %v16609_v55 }
 0x69f   : > { %v9146_v58 = vpop.permute.xlu1 %9145  ;;  %v9957_v32 = vsel %vm9952_vm6, %v9940_v9, %v9208_v43  ;;  %v16611_v43 = vld [vmem:[#allocation24_spill] sm:$0xff] }
 0x6a0   : > { %9151 = vrot.lane.b32.xlu0 %v9127_v45, %s12328_s9  ;;  %v9941_v59 = vsel %vm8809_vm7, %v9925_v34, %v9146_v58 }
 0x6a1   : > { %9089 = vrot.lane.b32.xlu1 %v9064_v16, %s12339_s20  ;;  %v8865_v16 = vsel %vm8860_vm11, %v8848_v44, %v16611_v43 }
 0x6a2   : > { %v9272_v38 = vpop.permute.xlu0 %9271 }
 0x6a3   : > { %v9210_v52 = vpop.permute.xlu1 %9209  ;;  %v9973_v47 = vsel %vm8826_vm8, %v9957_v32, %v9272_v38 }
 0x6a4   : > { %9215 = vrot.lane.b32.xlu0 %v9191_v62, %s12340_s21  ;;  %v9958_v15 = vsel %vm9952_vm6, %v9941_v59, %v9210_v52  ;;  %v16621_v59 = vld [vmem:[#allocation89_spill] sm:$0xff] }
 0x6a5   : > { %9153 = vrot.lane.b32.xlu1 %v9128_v42, %s12328_s9  ;;  %v9450_v61 = vrot.slane %v16621_v59, 1 }
 0x6a6   : > { %v9336_v18 = vpop.permute.xlu0 %9335 }
 0x6a7   : > { %v9274_v7 = vpop.permute.xlu1 %9273  ;;  %v9990_v3 = vsel %vm9985_vm10, %v9973_v47, %v9336_v18  ;;  %v16617_v18 = vld [vmem:[#allocation85_spill] sm:$0xff] }
 0x6a8   : > { %v10006_v31 = vsel %vm8843_vm9, %v9990_v3, %v15308_v28  ;;  %9279 = vrot.lane.b32.xlu0 %v9255_v35, %s12329_s10  ;;  %v9974_v20 = vsel %vm8826_vm8, %v9958_v15, %v9274_v7  ;;  %v9256_v28 = vrot.slane %v16603_v57, 6  ;;  %v9449_v34 = vrot.slane %v16617_v18, 1  ;;  %v16620_v3 = vld [vmem:[#allocation26_spill] sm:$0xff] }
 0x6a9   : > { %9217 = vrot.lane.b32.xlu1 %v9192_v26, %s12340_s21  ;;  %v10023_v51 = vsel %vm10018_vm12, %v10006_v31, %v15340_v48  ;;  %v16618_v26 = vld [vmem:[#allocation7_spill] sm:$0xff]  ;;  %v9513_v46 = vrot.slane %v16617_v18, 2 }
 0x6aa   : > { %v10039_v54 = vsel %vm8860_vm11, %v10023_v51, %v15369_v1  ;;  %v15478_v50 = vpop.permute.xlu0 %9403  ;;  %v9514_v51 = vrot.slane %v16621_v59, 2 }
 0x6ab   : > { %v9338_v33 = vpop.permute.xlu1 %9337  ;;  %v10056_v24 = vsel %vm10051_vm15, %v10039_v54, %v15382_v6  ;;  %v16612_v6 = vld [vmem:[#allocation45_spill] sm:$0xff] }
 0x6ac   : > { %v9991_v48 = vsel %vm9985_vm10, %v9974_v20, %v9338_v33  ;;  %v10072_v1 = vsel %vm8877_vm13, %v10056_v24, %v15390_v30  ;;  %9343 = vrot.lane.b32.xlu0 %v9319_v53, %s12341_s22  ;;  %v8815_v45 = vsel %vm8809_vm7, %v8798_v11, %v16612_v6  ;;  %v16613_v30 = vld [vmem:[#allocation8_spill] sm:$0xff]  ;;  %v9577_v20 = vrot.slane %v16617_v18, 3 }
 0x6ad   : > { %v10007_v58 = vsel %vm8843_vm9, %v9991_v48, %v15338_v29  ;;  %9281 = vrot.lane.b32.xlu1 %v9256_v28, %s12329_s10  ;;  %v10089_v5 = vsel %vm10084_vm1, %v10072_v1, %v15398_v21  ;;  %v8882_v52 = vsel %vm8877_vm13, %v8865_v16, %v16613_v30  ;;  %v16614_v21 = vld [vmem:[#allocation47_spill] sm:$0xff]  ;;  %v9578_v28 = vrot.slane %v16621_v59, 3 }
 0x6ae   : > { %v10024_v8 = vsel %vm10018_vm12, %v10007_v58, %v15367_v2  ;;  %v10105_v29 = vsel %vm8894_vm14, %v10089_v5, %v15406_v0  ;;  %v15512_v62 = vpop.permute.xlu0 %9467  ;;  %v8832_v9 = vsel %vm8826_vm8, %v8815_v45, %v16614_v21  ;;  %v16615_v2 = vld [vmem:[#allocation29_spill] sm:$0xff]  ;;  %v9641_v53 = vrot.slane %v16617_v18, 4  ;;  %v16622_v30 = vld [vmem:[#allocation87_spill] sm:$0xff] }
 0x6af   : > { %v10040_v38 = vsel %vm8860_vm11, %v10024_v8, %v15380_v63  ;;  %v15510_v42 = vpop.permute.xlu1 %9405  ;;  %v8899_v22 = vsel %vm8894_vm14, %v8882_v52, %v16615_v2  ;;  %v10122_v32 = vsel %vm10117_vm2, %v10105_v29, %v15414_v40  ;;  %v16616_v63 = vld [vmem:[#allocation46_spill] sm:$0xff]  ;;  %v9642_v24 = vrot.slane %v16621_v59, 4 }
 0x6b0   : > { %v10057_v0 = vsel %vm10051_vm15, %v10040_v38, %v15388_v39  ;;  %v8849_v37 = vsel %vm8843_vm9, %v8832_v9, %v16616_v63  ;;  %v10138_v47 = vadd.f32 %v10122_v32, %v8899_v22  ;;  %9411 = vrot.lane.b32.xlu0 %v16617_v18, %s12330_s11  ;;  %v16619_v39 = vld [vmem:[#allocation9_spill] sm:$0xff]  ;;  %v9705_v48 = vrot.slane %v16617_v18, 5 }
 0x6b1   : > { %v10073_v7 = vsel %vm8877_vm13, %v10057_v0, %v15396_v19  ;;  %9345 = vrot.lane.b32.xlu1 %v9320_v49, %s12341_s22  ;;  %v8866_v35 = vsel %vm8860_vm11, %v8849_v37, %v16618_v26  ;;  %v9706_v11 = vrot.slane %v16621_v59, 5  ;;  %v9769_v1 = vrot.slane %v16617_v18, 6  ;;  %v16623_v49 = vld [vmem:[#allocation90_spill] sm:$0xff] }
 0x6b2   : > { %v10090_v40 = vsel %vm10084_vm1, %v10073_v7, %v15404_v13  ;;  %v8883_v14 = vsel %vm8877_vm13, %v8866_v35, %v16619_v39  ;;  %10154 = vst [vmem:[%s15173_s25 + $0x4] sm:$0x1] %v10138_v47  ;;  %v15541_v4 = vpop.permute.xlu0 %9531  ;;  %v9770_v16 = vrot.slane %v16621_v59, 6  ;;  %v9833_v6 = vrot.slane %v16617_v18, 7 }
 0x6b3   : > { %v10106_v41 = vsel %vm8894_vm14, %v10090_v40, %v15412_v56  ;;  %v15539_v19 = vpop.permute.xlu1 %9469  ;;  %v8900_v23 = vsel %vm8894_vm14, %v8883_v14, %v16620_v3  ;;  %v9834_v8 = vrot.slane %v16621_v59, 7  ;;  %v8937_v52 = vrot.slane %v16622_v30, 1 }
 0x6b4   : > { %v10123_v12 = vsel %vm10117_vm2, %v10106_v41, %v15420_v27  ;;  %9475 = vrot.lane.b32.xlu0 %v9449_v34, %s12334_s15  ;;  %v8938_v21 = vrot.slane %v16623_v49, 1  ;;  %v9001_v9 = vrot.slane %v16622_v30, 2  ;;  %v9002_v32 = vrot.slane %v16623_v49, 2 }
 0x6b5   : > { %v10139_v13 = vadd.f32 %v10123_v12, %v8900_v23  ;;  %9413 = vrot.lane.b32.xlu1 %v16621_v59, %s12330_s11  ;;  %v9065_v0 = vrot.slane %v16622_v30, 3  ;;  %v9066_v47 = vrot.slane %v16623_v49, 3  ;;  %v9129_v7 = vrot.slane %v16622_v30, 4 }
 0x6b6   : > { %v15554_v31 = vpop.permute.xlu0 %9595  ;;  %v9130_v39 = vrot.slane %v16623_v49, 4  ;;  %v9193_v14 = vrot.slane %v16622_v30, 5 }
 0x6b7   : > { %10155 = vst [vmem:[%s15173_s25 + $0x5] sm:$0x1] %v10139_v13  ;;  %v15552_v56 = vpop.permute.xlu1 %9533 }
 0x6b8   : > { %9539 = vrot.lane.b32.xlu0 %v9513_v46, %s12331_s12  ;;  %v9257_v46 = vrot.slane %v16622_v30, 6 }
 0x6b9   : > { %9477 = vrot.lane.b32.xlu1 %v9450_v61, %s12334_s15  ;;  %v9194_v61 = vrot.slane %v16623_v49, 5 }
 0x6ba   : > { %v15562_v15 = vpop.permute.xlu0 %9659 }
 0x6bb   : > { %v15560_v27 = vpop.permute.xlu1 %9597 }
 0x6bc   : > { %9603 = vrot.lane.b32.xlu0 %v9577_v20, %s12335_s16  ;;  %v16625_v20 = vld [vmem:[#allocation21_spill] sm:$0xff] }
 0x6bd   : > { %9541 = vrot.lane.b32.xlu1 %v9514_v51, %s12331_s12  ;;  %v16624_v51 = vld [vmem:[#allocation31_spill] sm:$0xff] }
 0x6be   : > { %v15570_v33 = vpop.permute.xlu0 %9723 }
 0x6bf   : > { %v15568_v54 = vpop.permute.xlu1 %9661 }
 0x6c0   : > { %9667 = vrot.lane.b32.xlu0 %v9641_v53, %s12332_s13 }
 0x6c1   : > { %9605 = vrot.lane.b32.xlu1 %v9578_v28, %s12335_s16  ;;  %v8799_v28 = vsel %vm3688_vm3, %v16625_v20, %v16624_v51 }
 0x6c2   : > { %v15578_v44 = vpop.permute.xlu0 %9787 }
 0x6c3   : > { %v15576_v17 = vpop.permute.xlu1 %9725 }
 0x6c4   : > { %9731 = vrot.lane.b32.xlu0 %v9705_v48, %s12336_s17 }
 0x6c5   : > { %9669 = vrot.lane.b32.xlu1 %v9642_v24, %s12332_s13  ;;  %v16626_v24 = vld [vmem:[#allocation33_spill] sm:$0xff] }
 0x6c6   : > { %v15586_v36 = vpop.permute.xlu0 %9851  ;;  %v8816_v48 = vsel %vm8809_vm7, %v8799_v28, %v16626_v24 }
 0x6c7   : > { %v15584_v55 = vpop.permute.xlu1 %9789 }
 0x6c8   : > { %9795 = vrot.lane.b32.xlu0 %v9769_v1, %s12333_s14 }
 0x6c9   : > { %9733 = vrot.lane.b32.xlu1 %v9706_v11, %s12336_s17 }
 0x6ca   : > { %v8956_v43 = vpop.permute.xlu0 %8955 }
 0x6cb   : > { %v15592_v58 = vpop.permute.xlu1 %9853  ;;  %v9893_v18 = vsel %vm347_vm0, %v14814_v10, %v8956_v43  ;;  %v16627_v43 = vld [vmem:[#allocation11_spill] sm:$0xff] }
 0x6cc   : > { %9859 = vrot.lane.b32.xlu0 %v9833_v6, %s12337_s18 }
 0x6cd   : > { %9797 = vrot.lane.b32.xlu1 %v9770_v16, %s12333_s14  ;;  %v8833_v16 = vsel %vm8826_vm8, %v8816_v48, %v16627_v43 }
 0x6ce   : > { %v9020_v5 = vpop.permute.xlu0 %9019 }
 0x6cf   : > { %v8958_v45 = vpop.permute.xlu1 %8957  ;;  %v9909_v26 = vsel %vm3688_vm3, %v9893_v18, %v9020_v5 }
 0x6d0   : > { %8963 = vrot.lane.b32.xlu0 %v8937_v52, %s12338_s19  ;;  %v9894_v3 = vsel %vm347_vm0, %v14822_v25, %v8958_v45 }
 0x6d1   : > { %9861 = vrot.lane.b32.xlu1 %v9834_v8, %s12337_s18 }
 0x6d2   : > { %v9084_v38 = vpop.permute.xlu0 %9083 }
 0x6d3   : > { %v9022_v29 = vpop.permute.xlu1 %9021  ;;  %v9926_v41 = vsel %vm9919_vm5, %v9909_v26, %v9084_v38  ;;  %v9321_v38 = vrot.slane %v16622_v30, 7 }
 0x6d4   : > { %9027 = vrot.lane.b32.xlu0 %v9001_v9, %s12327_s30  ;;  %v9910_v23 = vsel %vm3688_vm3, %v9894_v3, %v9022_v29 }
 0x6d5   : > { %8965 = vrot.lane.b32.xlu1 %v8938_v21, %s12338_s19  ;;  %v16628_v21 = vld [vmem:[#allocation13_spill] sm:$0xff] }
 0x6d6   : > { %v9148_v22 = vpop.permute.xlu0 %9147  ;;  %v8850_v9 = vsel %vm8843_vm9, %v8833_v16, %v16628_v21 }
 0x6d7   : > { %v9086_v2 = vpop.permute.xlu1 %9085  ;;  %v9942_v34 = vsel %vm8809_vm7, %v9926_v41, %v9148_v22  ;;  %v16629_v22 = vld [vmem:[#allocation28_spill] sm:$0xff]  ;;  %v9322_v41 = vrot.slane %v16623_v49, 7 }
 0x6d8   : > { %9091 = vrot.lane.b32.xlu0 %v9065_v0, %s12339_s20  ;;  %v9927_v53 = vsel %vm9919_vm5, %v9910_v23, %v9086_v2 }
 0x6d9   : > { %9029 = vrot.lane.b32.xlu1 %v9002_v32, %s12327_s30  ;;  %v16630_v32 = vld [vmem:[#allocation18_spill] sm:$0xff] }
 0x6da   : > { %v9212_v37 = vpop.permute.xlu0 %9211  ;;  %v8800_v0 = vsel %vm3688_vm3, %v16630_v32, %v16629_v22 }
 0x6db   : > { %v9150_v63 = vpop.permute.xlu1 %9149  ;;  %v9959_v10 = vsel %vm9952_vm6, %v9942_v34, %v9212_v37  ;;  %v16631_v37 = vld [vmem:[#allocation15_spill] sm:$0xff] }
 0x6dc   : > { %9155 = vrot.lane.b32.xlu0 %v9129_v7, %s12328_s9  ;;  %v9943_v11 = vsel %vm8809_vm7, %v9927_v53, %v9150_v63 }
 0x6dd   : > { %9093 = vrot.lane.b32.xlu1 %v9066_v47, %s12339_s20  ;;  %v8867_v47 = vsel %vm8860_vm11, %v8850_v9, %v16631_v37 }
 0x6de   : > { %v9276_v40 = vpop.permute.xlu0 %9275 }
 0x6df   : > { %v9214_v35 = vpop.permute.xlu1 %9213  ;;  %v9975_v12 = vsel %vm8826_vm8, %v9959_v10, %v9276_v40 }
 0x6e0   : > { %9219 = vrot.lane.b32.xlu0 %v9193_v14, %s12340_s21  ;;  %v9960_v6 = vsel %vm9952_vm6, %v9943_v11, %v9214_v35  ;;  %v16641_v11 = vld [vmem:[#allocation94_spill] sm:$0xff] }
 0x6e1   : > { %9157 = vrot.lane.b32.xlu1 %v9130_v39, %s12328_s9  ;;  %v9452_v43 = vrot.slane %v16641_v11, 1 }
 0x6e2   : > { %v9340_v59 = vpop.permute.xlu0 %9339 }
 0x6e3   : > { %v9278_v13 = vpop.permute.xlu1 %9277  ;;  %v9992_v25 = vsel %vm9985_vm10, %v9975_v12, %v9340_v59  ;;  %v16637_v59 = vld [vmem:[#allocation91_spill] sm:$0xff] }
 0x6e4   : > { %v10008_v1 = vsel %vm8843_vm9, %v9992_v25, %v15478_v50  ;;  %9283 = vrot.lane.b32.xlu0 %v9257_v46, %s12329_s10  ;;  %v9976_v5 = vsel %vm8826_vm8, %v9960_v6, %v9278_v13  ;;  %v9258_v50 = vrot.slane %v16623_v49, 6  ;;  %v9451_v53 = vrot.slane %v16637_v59, 1  ;;  %v16640_v25 = vld [vmem:[#allocation53_spill] sm:$0xff] }
 0x6e5   : > { %9221 = vrot.lane.b32.xlu1 %v9194_v61, %s12340_s21  ;;  %v10025_v45 = vsel %vm10018_vm12, %v10008_v1, %v15512_v62  ;;  %v16638_v61 = vld [vmem:[#allocation49_spill] sm:$0xff]  ;;  %v9515_v16 = vrot.slane %v16637_v59, 2 }
 0x6e6   : > { %v10041_v8 = vsel %vm8860_vm11, %v10025_v45, %v15541_v4  ;;  %v15650_v29 = vpop.permute.xlu0 %9407  ;;  %v9516_v45 = vrot.slane %v16641_v11, 2 }
 0x6e7   : > { %v9342_v52 = vpop.permute.xlu1 %9341  ;;  %v10058_v2 = vsel %vm10051_vm15, %v10041_v8, %v15554_v31  ;;  %v16632_v31 = vld [vmem:[#allocation10_spill] sm:$0xff] }
 0x6e8   : > { %v9993_v62 = vsel %vm9985_vm10, %v9976_v5, %v9342_v52  ;;  %v10074_v4 = vsel %vm8877_vm13, %v10058_v2, %v15562_v15  ;;  %9347 = vrot.lane.b32.xlu0 %v9321_v38, %s12341_s22  ;;  %v8817_v7 = vsel %vm8809_vm7, %v8800_v0, %v16632_v31  ;;  %v16633_v15 = vld [vmem:[#allocation50_spill] sm:$0xff]  ;;  %v9579_v5 = vrot.slane %v16637_v59, 3  ;;  %v16642_v31 = vld [vmem:[#allocation92_spill] sm:$0xff] }
 0x6e9   : > { %v10009_v63 = vsel %vm8843_vm9, %v9993_v62, %v15510_v42  ;;  %9285 = vrot.lane.b32.xlu1 %v9258_v50, %s12329_s10  ;;  %v10091_v18 = vsel %vm10084_vm1, %v10074_v4, %v15570_v33  ;;  %v8884_v35 = vsel %vm8877_vm13, %v8867_v47, %v16633_v15  ;;  %v16634_v33 = vld [vmem:[#allocation12_spill] sm:$0xff]  ;;  %v9580_v50 = vrot.slane %v16641_v11, 3  ;;  %v16643_v15 = vld [vmem:[#allocation95_spill] sm:$0xff] }
 0x6ea   : > { %v10026_v26 = vsel %vm10018_vm12, %v10009_v63, %v15539_v19  ;;  %v10107_v42 = vsel %vm8894_vm14, %v10091_v18, %v15578_v44  ;;  %v15684_v14 = vpop.permute.xlu0 %9471  ;;  %v8834_v34 = vsel %vm8826_vm8, %v8817_v7, %v16634_v33  ;;  %v16635_v19 = vld [vmem:[#allocation52_spill] sm:$0xff]  ;;  %v9643_v38 = vrot.slane %v16637_v59, 4 }
 0x6eb   : > { %v10042_v40 = vsel %vm8860_vm11, %v10026_v26, %v15552_v56  ;;  %v15682_v39 = vpop.permute.xlu1 %9409  ;;  %v8901_v3 = vsel %vm8894_vm14, %v8884_v35, %v16635_v19  ;;  %v10124_v10 = vsel %vm10117_vm2, %v10107_v42, %v15586_v36  ;;  %v16636_v56 = vld [vmem:[#allocation14_spill] sm:$0xff]  ;;  %v9644_v2 = vrot.slane %v16641_v11, 4 }
 0x6ec   : > { %v10059_v44 = vsel %vm10051_vm15, %v10042_v40, %v15560_v27  ;;  %v8851_v23 = vsel %vm8843_vm9, %v8834_v34, %v16636_v56  ;;  %v10140_v12 = vadd.f32 %v10124_v10, %v8901_v3  ;;  %9415 = vrot.lane.b32.xlu0 %v16637_v59, %s12330_s11  ;;  %v16639_v27 = vld [vmem:[#allocation51_spill] sm:$0xff]  ;;  %v9707_v62 = vrot.slane %v16637_v59, 5 }
 0x6ed   : > { %v10075_v13 = vsel %vm8877_vm13, %v10059_v44, %v15568_v54  ;;  %9349 = vrot.lane.b32.xlu1 %v9322_v41, %s12341_s22  ;;  %v8868_v46 = vsel %vm8860_vm11, %v8851_v23, %v16638_v61  ;;  %v9708_v0 = vrot.slane %v16641_v11, 5  ;;  %v9771_v4 = vrot.slane %v16637_v59, 6 }
 0x6ee   : > { %v10092_v36 = vsel %vm10084_vm1, %v10075_v13, %v15576_v17  ;;  %v8885_v51 = vsel %vm8877_vm13, %v8868_v46, %v16639_v27  ;;  %10156 = vst [vmem:[%s15173_s25 + $0x6] sm:$0x1] %v10140_v12  ;;  %v15713_v28 = vpop.permute.xlu0 %9535  ;;  %v9772_v47 = vrot.slane %v16641_v11, 6  ;;  %v8939_v7 = vrot.slane %v16642_v31, 1 }
 0x6ef   : > { %v10108_v20 = vsel %vm8894_vm14, %v10092_v36, %v15584_v55  ;;  %v15711_v54 = vpop.permute.xlu1 %9473  ;;  %v8902_v24 = vsel %vm8894_vm14, %v8885_v51, %v16640_v25  ;;  %v8940_v35 = vrot.slane %v16643_v15, 1  ;;  %v9003_v42 = vrot.slane %v16642_v31, 2 }
 0x6f0   : > { %v10125_v48 = vsel %vm10117_vm2, %v10108_v20, %v15592_v58  ;;  %9479 = vrot.lane.b32.xlu0 %v9451_v53, %s12334_s15  ;;  %v9004_v33 = vrot.slane %v16643_v15, 2  ;;  %v9067_v34 = vrot.slane %v16642_v31, 3  ;;  %v9068_v10 = vrot.slane %v16643_v15, 3 }
 0x6f1   : > { %v10141_v17 = vadd.f32 %v10125_v48, %v8902_v24  ;;  %9417 = vrot.lane.b32.xlu1 %v16641_v11, %s12330_s11  ;;  %v9131_v44 = vrot.slane %v16642_v31, 4  ;;  %v9132_v12 = vrot.slane %v16643_v15, 4  ;;  %v9195_v13 = vrot.slane %v16642_v31, 5 }
 0x6f2   : > { %v15726_v1 = vpop.permute.xlu0 %9599  ;;  %v9196_v51 = vrot.slane %v16643_v15, 5  ;;  %v9259_v20 = vrot.slane %v16642_v31, 6 }
 0x6f3   : > { %10157 = vst [vmem:[%s15173_s25 + $0x7] sm:$0x1] %v10141_v17  ;;  %v15724_v55 = vpop.permute.xlu1 %9537 }
 0x6f4   : > { %9543 = vrot.lane.b32.xlu0 %v9515_v16, %s12331_s12 }
 0x6f5   : > { %9481 = vrot.lane.b32.xlu1 %v9452_v43, %s12334_s15 }
 0x6f6   : > { %v15734_v6 = vpop.permute.xlu0 %9663 }
 0x6f7   : > { %v15732_v58 = vpop.permute.xlu1 %9601 }
 0x6f8   : > { %9607 = vrot.lane.b32.xlu0 %v9579_v5, %s12335_s16  ;;  %v9323_v5 = vrot.slane %v16642_v31, 7 }
 0x6f9   : > { %9545 = vrot.lane.b32.xlu1 %v9516_v45, %s12331_s12  ;;  %v9260_v45 = vrot.slane %v16643_v15, 6 }
 0x6fa   : > { %v15742_v52 = vpop.permute.xlu0 %9727 }
 0x6fb   : > { %v15740_v8 = vpop.permute.xlu1 %9665 }
 0x6fc   : > { %9671 = vrot.lane.b32.xlu0 %v9643_v38, %s12332_s13 }
 0x6fd   : > { %9609 = vrot.lane.b32.xlu1 %v9580_v50, %s12335_s16 }
 0x6fe   : > { %v15750_v9 = vpop.permute.xlu0 %9791 }
 0x6ff   : > { %v15748_v21 = vpop.permute.xlu1 %9729 }
 0x700   : > { %9735 = vrot.lane.b32.xlu0 %v9707_v62, %s12336_s17  ;;  %v16645_v62 = vld [vmem:[#allocation4_spill] sm:$0xff] }
 0x701   : > { %9673 = vrot.lane.b32.xlu1 %v9644_v2, %s12332_s13  ;;  %v16644_v2 = vld [vmem:[#allocation54_spill] sm:$0xff] }
 0x702   : > { %v15758_v32 = vpop.permute.xlu0 %9855 }
 0x703   : > { %v15756_v22 = vpop.permute.xlu1 %9793 }
 0x704   : > { %9799 = vrot.lane.b32.xlu0 %v9771_v4, %s12333_s14 }
 0x705   : > { %9737 = vrot.lane.b32.xlu1 %v9708_v0, %s12336_s17 }
 0x706   : > { %v8960_v37 = vpop.permute.xlu0 %8959 }
 0x707   : > { %v15764_v63 = vpop.permute.xlu1 %9857  ;;  %v9895_v61 = vsel %vm347_vm0, %v16602_v60, %v8960_v37  ;;  %v16646_v37 = vld [vmem:[#allocation56_spill] sm:$0xff] }
 0x708   : > { %8967 = vrot.lane.b32.xlu0 %v8939_v7, %s12338_s19 }
 0x709   : > { %9801 = vrot.lane.b32.xlu1 %v9772_v47, %s12333_s14 }
 0x70a   : > { %v9024_v26 = vpop.permute.xlu0 %9023 }
 0x70b   : > { %v8962_v18 = vpop.permute.xlu1 %8961  ;;  %v9911_v46 = vsel %vm3688_vm3, %v9895_v61, %v9024_v26  ;;  %v16647_v26 = vld [vmem:[#allocation58_spill] sm:$0xff]  ;;  %v16653_v61 = vld [vmem:[#allocation57_spill] sm:$0xff] }
 0x70c   : > { %9031 = vrot.lane.b32.xlu0 %v9003_v42, %s12327_s30  ;;  %v9896_v24 = vsel %vm347_vm0, %v16603_v57, %v8962_v18  ;;  %v8801_v57 = vsel %vm3688_vm3, %v16645_v62, %v16644_v2 }
 0x70d   : > { %8969 = vrot.lane.b32.xlu1 %v8940_v35, %s12338_s19  ;;  %v8818_v47 = vsel %vm8809_vm7, %v8801_v57, %v16646_v37  ;;  %v16661_v37 = vld [vmem:[#allocation67_spill] sm:$0xff] }
 0x70e   : > { %v9088_v41 = vpop.permute.xlu0 %9087  ;;  %v8835_v35 = vsel %vm8826_vm8, %v8818_v47, %v16647_v26 }
 0x70f   : > { %v9026_v40 = vpop.permute.xlu1 %9025  ;;  %v9928_v53 = vsel %vm9919_vm5, %v9911_v46, %v9088_v41 }
 0x710   : > { %9095 = vrot.lane.b32.xlu0 %v9067_v34, %s12339_s20  ;;  %v9912_v48 = vsel %vm3688_vm3, %v9896_v24, %v9026_v40  ;;  %v16648_v34 = vld [vmem:[#allocation60_spill] sm:$0xff] }
 0x711   : > { %9033 = vrot.lane.b32.xlu1 %v9004_v33, %s12327_s30  ;;  %v9324_v33 = vrot.slane %v16643_v15, 7 }
 0x712   : > { %v9152_v3 = vpop.permute.xlu0 %9151 }
 0x713   : > { %v9090_v19 = vpop.permute.xlu1 %9089  ;;  %v9944_v25 = vsel %vm8809_vm7, %v9928_v53, %v9152_v3 }
 0x714   : > { %9159 = vrot.lane.b32.xlu0 %v9131_v44, %s12328_s9  ;;  %v9929_v50 = vsel %vm9919_vm5, %v9912_v48, %v9090_v19  ;;  %v8852_v19 = vsel %vm8843_vm9, %v8835_v35, %v16648_v34  ;;  %v16650_v44 = vld [vmem:[#allocation23_spill] sm:$0xff] }
 0x715   : > { %9097 = vrot.lane.b32.xlu1 %v9068_v10, %s12339_s20  ;;  %v16649_v10 = vld [vmem:[#allocation55_spill] sm:$0xff] }
 0x716   : > { %v9216_v23 = vpop.permute.xlu0 %9215 }
 0x717   : > { %v9154_v56 = vpop.permute.xlu1 %9153  ;;  %v9961_v60 = vsel %vm9952_vm6, %v9944_v25, %v9216_v23 }
 0x718   : > { %9223 = vrot.lane.b32.xlu0 %v9195_v13, %s12340_s21  ;;  %v9945_v0 = vsel %vm8809_vm7, %v9929_v50, %v9154_v56  ;;  %v8802_v56 = vsel %vm3688_vm3, %v16650_v44, %v16649_v10  ;;  %v16652_v13 = vld [vmem:[#allocation62_spill] sm:$0xff]  ;;  %v16659_v50 = vld [vmem:[#allocation63_spill] sm:$0xff] }
 0x719   : > { %9161 = vrot.lane.b32.xlu1 %v9132_v12, %s12328_s9  ;;  %v16651_v12 = vld [vmem:[#allocation96_spill] sm:$0xff]  ;;  %v8819_v46 = vsel %vm8809_vm7, %v8802_v56, %v16653_v61 }
 0x71a   : > { %v9280_v27 = vpop.permute.xlu0 %9279  ;;  %v9453_v24 = vrot.slane %v16651_v12, 1  ;;  %v9581_v35 = vrot.slane %v16651_v12, 3  ;;  %v9773_v56 = vrot.slane %v16651_v12, 6 }
 0x71b   : > { %v9218_v36 = vpop.permute.xlu1 %9217  ;;  %v9977_v17 = vsel %vm8826_vm8, %v9961_v60, %v9280_v27  ;;  %v16654_v27 = vld [vmem:[#allocation64_spill] sm:$0xff] }
 0x71c   : > { %9287 = vrot.lane.b32.xlu0 %v9259_v20, %s12329_s10  ;;  %v9962_v7 = vsel %vm9952_vm6, %v9945_v0, %v9218_v36 }
 0x71d   : > { %9225 = vrot.lane.b32.xlu1 %v9196_v51, %s12340_s21 }
 0x71e   : > { %v9344_v16 = vpop.permute.xlu0 %9343 }
 0x71f   : > { %v9282_v43 = vpop.permute.xlu1 %9281  ;;  %v9994_v38 = vsel %vm9985_vm10, %v9977_v17, %v9344_v16 }
 0x720   : > { %v10010_v4 = vsel %vm8843_vm9, %v9994_v38, %v15650_v29  ;;  %9351 = vrot.lane.b32.xlu0 %v9323_v5, %s12341_s22  ;;  %v9978_v42 = vsel %vm8826_vm8, %v9962_v7, %v9282_v43  ;;  %v16658_v5 = vld [vmem:[#allocation101_spill] sm:$0xff] }
 0x721   : > { %9289 = vrot.lane.b32.xlu1 %v9260_v45, %s12329_s10  ;;  %v10027_v18 = vsel %vm10018_vm12, %v10010_v4, %v15684_v14  ;;  %v9454_v0 = vrot.slane %v16658_v5, 1  ;;  %v9517_v4 = vrot.slane %v16651_v12, 2  ;;  %v9518_v26 = vrot.slane %v16658_v5, 2 }
 0x722   : > { %v10043_v29 = vsel %vm8860_vm11, %v10027_v18, %v15713_v28  ;;  %v15822_v41 = vpop.permute.xlu0 %9411  ;;  %v9710_v44 = vrot.slane %v16658_v5, 5 }
 0x723   : > { %v9346_v40 = vpop.permute.xlu1 %9345  ;;  %v10060_v3 = vsel %vm10051_vm15, %v10043_v29, %v15726_v1  ;;  %v8869_v1 = vsel %vm8860_vm11, %v8852_v19, %v16652_v13  ;;  %v9582_v29 = vrot.slane %v16658_v5, 3  ;;  %v9646_v19 = vrot.slane %v16658_v5, 4 }
 0x724   : > { %v9995_v14 = vsel %vm9985_vm10, %v9978_v42, %v9346_v40  ;;  %v10076_v28 = vsel %vm8877_vm13, %v10060_v3, %v15734_v6  ;;  %9419 = vrot.lane.b32.xlu0 %v16651_v12, %s12330_s11  ;;  %v9645_v40 = vrot.slane %v16651_v12, 4  ;;  %v9709_v3 = vrot.slane %v16651_v12, 5 }
 0x725   : > { %v10011_v23 = vsel %vm8843_vm9, %v9995_v14, %v15682_v39  ;;  %9353 = vrot.lane.b32.xlu1 %v9324_v33, %s12341_s22  ;;  %v10093_v36 = vsel %vm10084_vm1, %v10076_v28, %v15742_v52  ;;  %v8886_v39 = vsel %vm8877_vm13, %v8869_v1, %v16654_v27  ;;  %v16655_v52 = vld [vmem:[#allocation59_spill] sm:$0xff]  ;;  %v9774_v13 = vrot.slane %v16658_v5, 6  ;;  %v16662_v1 = vld [vmem:[#allocation98_spill] sm:$0xff] }
 0x726   : > { %v10028_v6 = vsel %vm10018_vm12, %v10011_v23, %v15711_v54  ;;  %v10109_v51 = vsel %vm8894_vm14, %v10093_v36, %v15750_v9  ;;  %v15856_v25 = vpop.permute.xlu0 %9475  ;;  %v8836_v60 = vsel %vm8826_vm8, %v8819_v46, %v16655_v52  ;;  %v16656_v54 = vld [vmem:[#allocation66_spill] sm:$0xff]  ;;  %v8941_v61 = vrot.slane %v16662_v1, 1 }
 0x727   : > { %v10044_v20 = vsel %vm8860_vm11, %v10028_v6, %v15724_v55  ;;  %v15854_v53 = vpop.permute.xlu1 %9413  ;;  %v8903_v48 = vsel %vm8894_vm14, %v8886_v39, %v16656_v54  ;;  %v10126_v17 = vsel %vm10117_vm2, %v10109_v51, %v15758_v32  ;;  %v16657_v55 = vld [vmem:[#allocation61_spill] sm:$0xff]  ;;  %v16663_v6 = vld [vmem:[#allocation102_spill] sm:$0xff]  ;;  %v9005_v39 = vrot.slane %v16662_v1, 2 }
 0x728   : > { %v10061_v9 = vsel %vm10051_vm15, %v10044_v20, %v15732_v58  ;;  %v8853_v43 = vsel %vm8843_vm9, %v8836_v60, %v16657_v55  ;;  %v10142_v16 = vadd.f32 %v10126_v17, %v8903_v48  ;;  %9483 = vrot.lane.b32.xlu0 %v9453_v24, %s12334_s15  ;;  %v16660_v58 = vld [vmem:[#allocation65_spill] sm:$0xff]  ;;  %v8942_v27 = vrot.slane %v16663_v6, 1 }
 0x729   : > { %v10077_v45 = vsel %vm8877_vm13, %v10061_v9, %v15740_v8  ;;  %9421 = vrot.lane.b32.xlu1 %v16658_v5, %s12330_s11  ;;  %v8870_v38 = vsel %vm8860_vm11, %v8853_v43, %v16659_v50  ;;  %v9006_v24 = vrot.slane %v16663_v6, 2  ;;  %v9069_v52 = vrot.slane %v16662_v1, 3 }
 0x72a   : > { %v10094_v32 = vsel %vm10084_vm1, %v10077_v45, %v15748_v21  ;;  %v8887_v2 = vsel %vm8877_vm13, %v8870_v38, %v16660_v58  ;;  %10158 = vst [vmem:[%s15173_s25 + $0x8] sm:$0x1] %v10142_v16  ;;  %v15885_v57 = vpop.permute.xlu0 %9539  ;;  %v9070_v48 = vrot.slane %v16663_v6, 3  ;;  %v9133_v17 = vrot.slane %v16662_v1, 4 }
 0x72b   : > { %v10110_v62 = vsel %vm8894_vm14, %v10094_v32, %v15756_v22  ;;  %v15883_v8 = vpop.permute.xlu1 %9477  ;;  %v8904_v47 = vsel %vm8894_vm14, %v8887_v2, %v16661_v37  ;;  %v9134_v43 = vrot.slane %v16663_v6, 4  ;;  %v9197_v16 = vrot.slane %v16662_v1, 5 }
 0x72c   : > { %v10127_v21 = vsel %vm10117_vm2, %v10110_v62, %v15764_v63  ;;  %9547 = vrot.lane.b32.xlu0 %v9517_v4, %s12331_s12  ;;  %v9198_v38 = vrot.slane %v16663_v6, 5  ;;  %v9261_v32 = vrot.slane %v16662_v1, 6  ;;  %v9262_v4 = vrot.slane %v16663_v6, 6 }
 0x72d   : > { %v10143_v7 = vadd.f32 %v10127_v21, %v8904_v47  ;;  %9485 = vrot.lane.b32.xlu1 %v9454_v0, %s12334_s15  ;;  %v9325_v37 = vrot.slane %v16662_v1, 7 }
 0x72e   : > { %v15898_v18 = vpop.permute.xlu0 %9603 }
 0x72f   : > { %10159 = vst [vmem:[%s15173_s25 + $0x9] sm:$0x1] %v10143_v7  ;;  %v15896_v22 = vpop.permute.xlu1 %9541 }
 0x730   : > { %9611 = vrot.lane.b32.xlu0 %v9581_v35, %s12335_s16 }
 0x731   : > { %9549 = vrot.lane.b32.xlu1 %v9518_v26, %s12331_s12 }
 0x732   : > { %v15906_v63 = vpop.permute.xlu0 %9667 }
 0x733   : > { %v15904_v42 = vpop.permute.xlu1 %9605 }
 0x734   : > { %9675 = vrot.lane.b32.xlu0 %v9645_v40, %s12332_s13 }
 0x735   : > { %9613 = vrot.lane.b32.xlu1 %v9582_v29, %s12335_s16 }
 0x736   : > { %v15914_v34 = vpop.permute.xlu0 %9731 }
 0x737   : > { %v15912_v33 = vpop.permute.xlu1 %9669 }
 0x738   : > { %9739 = vrot.lane.b32.xlu0 %v9709_v3, %s12336_s17  ;;  %v9835_v3 = vrot.slane %v16637_v59, 7  ;;  %v16667_v59 = vld [vmem:[#allocation72_spill] sm:$0xff] }
 0x739   : > { %9677 = vrot.lane.b32.xlu1 %v9646_v19, %s12332_s13  ;;  %v9326_v19 = vrot.slane %v16663_v6, 7 }
 0x73a   : > { %v15922_v10 = vpop.permute.xlu0 %9795 }
 0x73b   : > { %v15920_v14 = vpop.permute.xlu1 %9733 }
 0x73c   : > { %9803 = vrot.lane.b32.xlu0 %v9773_v56, %s12333_s14  ;;  %v16665_v56 = vld [vmem:[#allocation20_spill] sm:$0xff] }
 0x73d   : > { %9741 = vrot.lane.b32.xlu1 %v9710_v44, %s12336_s17  ;;  %v16664_v44 = vld [vmem:[#allocation68_spill] sm:$0xff] }
 0x73e   : > { %v15930_v23 = vpop.permute.xlu0 %9859 }
 0x73f   : > { %v15928_v28 = vpop.permute.xlu1 %9797 }
 0x740   : > { %8971 = vrot.lane.b32.xlu0 %v8941_v61, %s12338_s19 }
 0x741   : > { %9805 = vrot.lane.b32.xlu1 %v9774_v13, %s12333_s14  ;;  %v8803_v13 = vsel %vm3688_vm3, %v16665_v56, %v16664_v44 }
 0x742   : > { %v8964_v36 = vpop.permute.xlu0 %8963 }
 0x743   : > { %v15936_v46 = vpop.permute.xlu1 %9861  ;;  %v9897_v58 = vsel %vm347_vm0, %v16622_v30, %v8964_v36  ;;  %v16666_v36 = vld [vmem:[#allocation70_spill] sm:$0xff] }
 0x744   : > { %9035 = vrot.lane.b32.xlu0 %v9005_v39, %s12327_s30 }
 0x745   : > { %8973 = vrot.lane.b32.xlu1 %v8942_v27, %s12338_s19  ;;  %v8820_v27 = vsel %vm8809_vm7, %v8803_v13, %v16666_v36 }
 0x746   : > { %v9028_v20 = vpop.permute.xlu0 %9027 }
 0x747   : > { %v8966_v51 = vpop.permute.xlu1 %8965  ;;  %v9913_v2 = vsel %vm3688_vm3, %v9897_v58, %v9028_v20  ;;  %v8837_v20 = vsel %vm8826_vm8, %v8820_v27, %v16667_v59 }
 0x748   : > { %9099 = vrot.lane.b32.xlu0 %v9069_v52, %s12339_s20  ;;  %v9898_v7 = vsel %vm347_vm0, %v16623_v49, %v8966_v51 }
 0x749   : > { %9037 = vrot.lane.b32.xlu1 %v9006_v24, %s12327_s30 }
 0x74a   : > { %v9092_v54 = vpop.permute.xlu0 %9091 }
 0x74b   : > { %v9030_v60 = vpop.permute.xlu1 %9029  ;;  %v9930_v47 = vsel %vm9919_vm5, %v9913_v2, %v9092_v54 }
 0x74c   : > { %9163 = vrot.lane.b32.xlu0 %v9133_v17, %s12328_s9  ;;  %v9914_v26 = vsel %vm3688_vm3, %v9898_v7, %v9030_v60  ;;  %v16674_v7 = vld [vmem:[#allocation73_spill] sm:$0xff] }
 0x74d   : > { %9101 = vrot.lane.b32.xlu1 %v9070_v48, %s12339_s20 }
 0x74e   : > { %v9156_v55 = vpop.permute.xlu0 %9155 }
 0x74f   : > { %v9094_v9 = vpop.permute.xlu1 %9093  ;;  %v9946_v21 = vsel %vm8809_vm7, %v9930_v47, %v9156_v55  ;;  %v16668_v55 = vld [vmem:[#allocation74_spill] sm:$0xff] }
 0x750   : > { %9227 = vrot.lane.b32.xlu0 %v9197_v16, %s12340_s21  ;;  %v9931_v61 = vsel %vm9919_vm5, %v9914_v26, %v9094_v9  ;;  %v9837_v9 = vrot.slane %v16651_v12, 7  ;;  %v16671_v12 = vld [vmem:[#allocation76_spill] sm:$0xff] }
 0x751   : > { %9165 = vrot.lane.b32.xlu1 %v9134_v43, %s12328_s9  ;;  %v8854_v43 = vsel %vm8843_vm9, %v8837_v20, %v16668_v55 }
 0x752   : > { %v9220_v50 = vpop.permute.xlu0 %9219 }
 0x753   : > { %v9158_v45 = vpop.permute.xlu1 %9157  ;;  %v9963_v30 = vsel %vm9952_vm6, %v9946_v21, %v9220_v50  ;;  %v16670_v50 = vld [vmem:[#allocation5_spill] sm:$0xff]  ;;  %v9838_v21 = vrot.slane %v16658_v5, 7 }
 0x754   : > { %9291 = vrot.lane.b32.xlu0 %v9261_v32, %s12329_s10  ;;  %v9947_v39 = vsel %vm8809_vm7, %v9931_v61, %v9158_v45  ;;  %v16669_v45 = vld [vmem:[#allocation69_spill] sm:$0xff]  ;;  %v8871_v32 = vsel %vm8860_vm11, %v8854_v43, %v16671_v12  ;;  %v16679_v61 = vld [vmem:[#allocation86_spill] sm:$0xff] }
 0x755   : > { %9229 = vrot.lane.b32.xlu1 %v9198_v38, %s12340_s21  ;;  %v8804_v38 = vsel %vm3688_vm3, %v16670_v50, %v16669_v45 }
 0x756   : > { %v9284_v0 = vpop.permute.xlu0 %9283 }
 0x757   : > { %v9222_v62 = vpop.permute.xlu1 %9221  ;;  %v9979_v35 = vsel %vm8826_vm8, %v9963_v30, %v9284_v0  ;;  %v16675_v30 = vld [vmem:[#allocation81_spill] sm:$0xff] }
 0x758   : > { %9355 = vrot.lane.b32.xlu0 %v9325_v37, %s12341_s22  ;;  %v9964_v24 = vsel %vm9952_vm6, %v9947_v39, %v9222_v62 }
 0x759   : > { %9293 = vrot.lane.b32.xlu1 %v9262_v4, %s12329_s10 }
 0x75a   : > { %v9348_v40 = vpop.permute.xlu0 %9347 }
 0x75b   : > { %v9286_v29 = vpop.permute.xlu1 %9285  ;;  %v9996_v49 = vsel %vm9985_vm10, %v9979_v35, %v9348_v40  ;;  %v16676_v35 = vld [vmem:[#allocation75_spill] sm:$0xff]  ;;  %v16677_v40 = vld [vmem:[#allocation77_spill] sm:$0xff] }
 0x75c   : > { %v10012_v51 = vsel %vm8843_vm9, %v9996_v49, %v15822_v41  ;;  %9863 = vrot.lane.b32.xlu0 %v9835_v3, %s12337_s18  ;;  %v9980_v60 = vsel %vm8826_vm8, %v9964_v24, %v9286_v29  ;;  %v9836_v41 = vrot.slane %v16641_v11, 7 }
 0x75d   : > { %9357 = vrot.lane.b32.xlu1 %v9326_v19, %s12341_s22  ;;  %v10029_v52 = vsel %vm10018_vm12, %v10012_v51, %v15856_v25 }
 0x75e   : > { %v10045_v54 = vsel %vm8860_vm11, %v10029_v52, %v15885_v57  ;;  %v15994_v17 = vpop.permute.xlu0 %9415 }
 0x75f   : > { %v9350_v48 = vpop.permute.xlu1 %9349  ;;  %v10062_v16 = vsel %vm10051_vm15, %v10045_v54, %v15898_v18  ;;  %v16672_v18 = vld [vmem:[#allocation71_spill] sm:$0xff] }
 0x760   : > { %v9997_v25 = vsel %vm9985_vm10, %v9980_v60, %v9350_v48  ;;  %v10078_v57 = vsel %vm8877_vm13, %v10062_v16, %v15906_v63  ;;  %9867 = vrot.lane.b32.xlu0 %v9837_v9, %s12337_s18  ;;  %v8821_v58 = vsel %vm8809_vm7, %v8804_v38, %v16672_v18  ;;  %v16673_v63 = vld [vmem:[#allocation78_spill] sm:$0xff] }
 0x761   : > { %v10013_v11 = vsel %vm8843_vm9, %v9997_v25, %v15854_v53  ;;  %9865 = vrot.lane.b32.xlu1 %v9836_v41, %s12337_s18  ;;  %v10095_v2 = vsel %vm10084_vm1, %v10078_v57, %v15914_v34  ;;  %v8888_v0 = vsel %vm8877_vm13, %v8871_v32, %v16673_v63  ;;  %v8838_v34 = vsel %vm8826_vm8, %v8821_v58, %v16674_v7 }
 0x762   : > { %v10030_v62 = vsel %vm10018_vm12, %v10013_v11, %v15883_v8  ;;  %v10111_v53 = vsel %vm8894_vm14, %v10095_v2, %v15922_v10  ;;  %v9480_v47 = vpop.permute.xlu0 %9479  ;;  %v8905_v8 = vsel %vm8894_vm14, %v8888_v0, %v16675_v30 }
 0x763   : > { %v10046_v4 = vsel %vm8860_vm11, %v10030_v62, %v15896_v22  ;;  %v16026_v37 = vpop.permute.xlu1 %9417  ;;  %v10128_v26 = vsel %vm10117_vm2, %v10111_v53, %v15930_v23  ;;  %v8855_v22 = vsel %vm8843_vm9, %v8838_v34, %v16676_v35  ;;  %v16678_v23 = vld [vmem:[#allocation79_spill] sm:$0xff] }
 0x764   : > { %v10063_v10 = vsel %vm10051_vm15, %v10046_v4, %v15904_v42  ;;  %v10144_v29 = vadd.f32 %v10128_v26, %v8905_v8  ;;  %v8872_v19 = vsel %vm8860_vm11, %v8855_v22, %v16677_v40 }
 0x765   : > { %v10079_v5 = vsel %vm8877_vm13, %v10063_v10, %v15912_v33  ;;  %9869 = vrot.lane.b32.xlu1 %v9838_v21, %s12337_s18  ;;  %v8889_v44 = vsel %vm8877_vm13, %v8872_v19, %v16678_v23 }
 0x766   : > { %v10096_v3 = vsel %vm10084_vm1, %v10079_v5, %v15920_v14  ;;  %10160 = vst [vmem:[%s15173_s25 + $0xa] sm:$0x1] %v10144_v29  ;;  %v9544_v13 = vpop.permute.xlu0 %9543  ;;  %v8906_v33 = vsel %vm8894_vm14, %v8889_v44, %v16679_v61 }
 0x767   : > { %v10112_v42 = vsel %vm8894_vm14, %v10096_v3, %v15928_v28  ;;  %v9482_v56 = vpop.permute.xlu1 %9481 }
 0x768   : > { %v10129_v49 = vsel %vm10117_vm2, %v10112_v42, %v15936_v46 }
 0x769   : > { %v10145_v36 = vadd.f32 %v10129_v49, %v8906_v33 }
 0x76a   : > { %v9608_v39 = vpop.permute.xlu0 %9607 }
 0x76b   : > { %10161 = vst [vmem:[%s15173_s25 + $0xb] sm:$0x1] %v10145_v36  ;;  %v9546_v27 = vpop.permute.xlu1 %9545 }
 0x76e   : > { %v9672_v51 = vpop.permute.xlu0 %9671 }
 0x76f   : > { %v9610_v14 = vpop.permute.xlu1 %9609 }
 0x772   : > { %v9736_v20 = vpop.permute.xlu0 %9735 }
 0x773   : > { %v9674_v59 = vpop.permute.xlu1 %9673 }
 0x776   : > { %v9800_v52 = vpop.permute.xlu0 %9799 }
 0x777   : > { %v9738_v24 = vpop.permute.xlu1 %9737 }
 0x77a   : > { %v8968_v28 = vpop.permute.xlu0 %8967 }
 0x77b   : > { %v9802_v60 = vpop.permute.xlu1 %9801  ;;  %v9899_v54 = vsel %vm347_vm0, %v16642_v31, %v8968_v28 }
 0x77e   : > { %v9032_v41 = vpop.permute.xlu0 %9031 }
 0x77f   : > { %v8970_v48 = vpop.permute.xlu1 %8969  ;;  %v9915_v9 = vsel %vm3688_vm3, %v9899_v54, %v9032_v41  ;;  %v16680_v41 = vld [vmem:[#allocation88_spill] sm:$0xff] }
 0x780   : > { %v9900_v46 = vsel %vm347_vm0, %v16643_v15, %v8970_v48 }
 0x782   : > { %v9096_v43 = vpop.permute.xlu0 %9095 }
 0x783   : > { %v9034_v55 = vpop.permute.xlu1 %9033  ;;  %v9932_v25 = vsel %vm9919_vm5, %v9915_v9, %v9096_v43  ;;  %v16682_v43 = vld [vmem:[#allocation97_spill] sm:$0xff] }
 0x784   : > { %v9916_v16 = vsel %vm3688_vm3, %v9900_v46, %v9034_v55  ;;  %v16681_v46 = vld [vmem:[#allocation25_spill] sm:$0xff] }
 0x785   : > { %v8805_v9 = vsel %vm3688_vm3, %v16681_v46, %v16680_v41  ;;  %v16697_v46 = vld [vmem:[#allocation109_spill] sm:$0xff] }
 0x786   : > { %v9160_v50 = vpop.permute.xlu0 %9159 }
 0x787   : > { %v9098_v45 = vpop.permute.xlu1 %9097  ;;  %v9948_v32 = vsel %vm8809_vm7, %v9932_v25, %v9160_v50 }
 0x788   : > { %v9933_v38 = vsel %vm9919_vm5, %v9916_v16, %v9098_v45  ;;  %v8822_v16 = vsel %vm8809_vm7, %v8805_v9, %v16682_v43  ;;  %v16698_v43 = vld [vmem:[#allocation116_spill] sm:$0xff] }
 0x78a   : > { %v9224_v11 = vpop.permute.xlu0 %9223 }
 0x78b   : > { %v9162_v57 = vpop.permute.xlu1 %9161  ;;  %v9965_v15 = vsel %vm9952_vm6, %v9948_v32, %v9224_v11  ;;  %v16685_v32 = vld [vmem:[#allocation93_spill] sm:$0xff] }
 0x78c   : > { %v9949_v63 = vsel %vm8809_vm7, %v9933_v38, %v9162_v57  ;;  %v16683_v38 = vld [vmem:[#allocation100_spill] sm:$0xff] }
 0x78d   : > { %v8839_v57 = vsel %vm8826_vm8, %v8822_v16, %v16683_v38 }
 0x78e   : > { %v9288_v12 = vpop.permute.xlu0 %9287 }
 0x78f   : > { %v9226_v31 = vpop.permute.xlu1 %9225  ;;  %v9981_v18 = vsel %vm8826_vm8, %v9965_v15, %v9288_v12  ;;  %v16686_v15 = vld [vmem:[#allocation22_spill] sm:$0xff] }
 0x790   : > { %v9966_v53 = vsel %vm9952_vm6, %v9949_v63, %v9226_v31  ;;  %v16684_v31 = vld [vmem:[#allocation104_spill] sm:$0xff] }
 0x791   : > { %v8856_v12 = vsel %vm8843_vm9, %v8839_v57, %v16684_v31 }
 0x792   : > { %v9352_v2 = vpop.permute.xlu0 %9351 }
 0x793   : > { %v9290_v58 = vpop.permute.xlu1 %9289  ;;  %v9998_v62 = vsel %vm9985_vm10, %v9981_v18, %v9352_v2  ;;  %v8806_v18 = vsel %vm3688_vm3, %v16686_v15, %v16685_v32  ;;  %v16701_v32 = vld [vmem:[#allocation113_spill] sm:$0xff]  ;;  %v16702_v15 = vld [vmem:[#allocation27_spill] sm:$0xff] }
 0x794   : > { %v10014_v0 = vsel %vm8843_vm9, %v9998_v62, %v15994_v17  ;;  %v9982_v21 = vsel %vm8826_vm8, %v9966_v53, %v9290_v58  ;;  %v16687_v58 = vld [vmem:[#allocation106_spill] sm:$0xff]  ;;  %v16688_v62 = vld [vmem:[#allocation99_spill] sm:$0xff] }
 0x795   : > { %v10031_v4 = vsel %vm10018_vm12, %v10014_v0, %v9480_v47  ;;  %v8873_v2 = vsel %vm8860_vm11, %v8856_v12, %v16687_v58  ;;  %v8823_v63 = vsel %vm8809_vm7, %v8806_v18, %v16688_v62  ;;  %v8808_v18 = vsel %vm3688_vm3, %v16702_v15, %v16701_v32 }
 0x796   : > { %v10047_v7 = vsel %vm8860_vm11, %v10031_v4, %v9544_v13  ;;  %v16075_v30 = vpop.permute.xlu0 %9419  ;;  %v16689_v4 = vld [vmem:[#allocation108_spill] sm:$0xff] }
 0x797   : > { %v9354_v34 = vpop.permute.xlu1 %9353  ;;  %v10064_v26 = vsel %vm10051_vm15, %v10047_v7, %v9608_v39  ;;  %v16690_v7 = vld [vmem:[#allocation103_spill] sm:$0xff] }
 0x798   : > { %v9999_v8 = vsel %vm9985_vm10, %v9982_v21, %v9354_v34  ;;  %v10080_v17 = vsel %vm8877_vm13, %v10064_v26, %v9672_v51  ;;  %v8890_v21 = vsel %vm8877_vm13, %v8873_v2, %v16689_v4  ;;  %v8840_v34 = vsel %vm8826_vm8, %v8823_v63, %v16690_v7  ;;  %v16703_v2 = vld [vmem:[#allocation120_spill] sm:$0xff]  ;;  %v16704_v63 = vld [vmem:[#allocation115_spill] sm:$0xff] }
 0x799   : > { %v10015_v10 = vsel %vm8843_vm9, %v9999_v8, %v16026_v37  ;;  %v10097_v47 = vsel %vm10084_vm1, %v10080_v17, %v9736_v20 }
 0x79a   : > { %v10032_v35 = vsel %vm10018_vm12, %v10015_v10, %v9482_v56  ;;  %v9484_v5 = vpop.permute.xlu0 %9483  ;;  %v16088_v40 = vsel %vm8894_vm14, %v10097_v47, %v9800_v52 }
 0x79b   : > { %v10048_v22 = vsel %vm8860_vm11, %v10032_v35, %v9546_v27  ;;  %v16085_v29 = vpop.permute.xlu1 %9421  ;;  %v16691_v35 = vld [vmem:[#allocation110_spill] sm:$0xff] }
 0x79c   : > { %v10065_v19 = vsel %vm10051_vm15, %v10048_v22, %v9610_v14  ;;  %v8907_v47 = vsel %vm8894_vm14, %v8890_v21, %v16691_v35  ;;  %v16692_v22 = vld [vmem:[#allocation105_spill] sm:$0xff] }
 0x79d   : > { %v10081_v3 = vsel %vm8877_vm13, %v10065_v19, %v9674_v59  ;;  %v16706_v21 = vld [vmem:[#allocation117_spill] sm:$0xff] }
 0x79e   : > { %v10098_v37 = vsel %vm10084_vm1, %v10081_v3, %v9738_v24  ;;  %v9548_v44 = vpop.permute.xlu0 %9547 }
 0x79f   : > { %v16093_v23 = vpop.permute.xlu1 %9485  ;;  %v16096_v42 = vsel %vm8894_vm14, %v10098_v37, %v9802_v60  ;;  %v16693_v37 = vld [vmem:[#allocation112_spill] sm:$0xff] }
 0x7a2   : > { %v9612_v13 = vpop.permute.xlu0 %9611 }
 0x7a3   : > { %v16098_v56 = vpop.permute.xlu1 %9549 }
 0x7a6   : > { %v9676_v33 = vpop.permute.xlu0 %9675 }
 0x7a7   : > { %v16100_v61 = vpop.permute.xlu1 %9613 }
 0x7aa   : > { %v16104_v36 = vpop.permute.xlu0 %9739 }
 0x7ab   : > { %v16102_v49 = vpop.permute.xlu1 %9677 }
 0x7ae   : > { %v16108_v39 = vpop.permute.xlu0 %9803 }
 0x7af   : > { %v16106_v27 = vpop.permute.xlu1 %9741 }
 0x7b2   : > { %v8972_v51 = vpop.permute.xlu0 %8971 }
 0x7b3   : > { %v16110_v14 = vpop.permute.xlu1 %9805  ;;  %v9901_v55 = vsel %vm347_vm0, %v16662_v1, %v8972_v51  ;;  %v16694_v51 = vld [vmem:[#allocation6_spill] sm:$0xff] }
 0x7b6   : > { %v9036_v20 = vpop.permute.xlu0 %9035 }
 0x7b7   : > { %v8974_v59 = vpop.permute.xlu1 %8973  ;;  %v9917_v25 = vsel %vm3688_vm3, %v9901_v55, %v9036_v20  ;;  %v16695_v20 = vld [vmem:[#allocation107_spill] sm:$0xff] }
 0x7b8   : > { %v9902_v0 = vsel %vm347_vm0, %v16663_v6, %v8974_v59  ;;  %v8857_v6 = vsel %vm8843_vm9, %v8840_v34, %v16692_v22  ;;  %v8807_v59 = vsel %vm3688_vm3, %v16694_v51, %v16693_v37 }
 0x7ba   : > { %v9100_v52 = vpop.permute.xlu0 %9099 }
 0x7bb   : > { %v9038_v24 = vpop.permute.xlu1 %9037  ;;  %v9934_v11 = vsel %vm9919_vm5, %v9917_v25, %v9100_v52  ;;  %v16699_v25 = vld [vmem:[#allocation111_spill] sm:$0xff] }
 0x7bc   : > { %v9918_v8 = vsel %vm3688_vm3, %v9902_v0, %v9038_v24  ;;  %v8874_v24 = vsel %vm8860_vm11, %v8857_v6, %v16695_v20  ;;  %v8825_v0 = vsel %vm8809_vm7, %v8808_v18, %v16704_v63  ;;  %v16709_v6 = vld [vmem:[#allocation121_spill] sm:$0xff] }
 0x7be   : > { %v9164_v28 = vpop.permute.xlu0 %9163 }
 0x7bf   : > { %v9102_v60 = vpop.permute.xlu1 %9101  ;;  %v9950_v1 = vsel %vm8809_vm7, %v9934_v11, %v9164_v28  ;;  %v16700_v11 = vld [vmem:[#allocation118_spill] sm:$0xff] }
 0x7c0   : > { %v9935_v19 = vsel %vm9919_vm5, %v9918_v8, %v9102_v60  ;;  %v8891_v60 = vsel %vm8877_vm13, %v8874_v24, %v16697_v46  ;;  %v16707_v8 = vld [vmem:[#allocation124_spill] sm:$0xff] }
 0x7c2   : > { %v9228_v48 = vpop.permute.xlu0 %9227 }
 0x7c3   : > { %v9166_v54 = vpop.permute.xlu1 %9165  ;;  %v9967_v53 = vsel %vm9952_vm6, %v9950_v1, %v9228_v48  ;;  %v16696_v48 = vld [vmem:[#allocation114_spill] sm:$0xff] }
 0x7c4   : > { %v9951_v52 = vsel %vm8809_vm7, %v9935_v19, %v9166_v54  ;;  %v8824_v41 = vsel %vm8809_vm7, %v8807_v59, %v16696_v48  ;;  %v16711_v59 = vld [vmem:[#allocation125_spill] sm:$0xff] }
 0x7c5   : > { %v8841_v16 = vsel %vm8826_vm8, %v8824_v41, %v16698_v43 }
 0x7c6   : > { %v9292_v50 = vpop.permute.xlu0 %9291  ;;  %v8858_v31 = vsel %vm8843_vm9, %v8841_v16, %v16700_v11 }
 0x7c7   : > { %v9230_v45 = vpop.permute.xlu1 %9229  ;;  %v9983_v26 = vsel %vm8826_vm8, %v9967_v53, %v9292_v50  ;;  %v8908_v50 = vsel %vm8894_vm14, %v8891_v60, %v16699_v25  ;;  %v8875_v62 = vsel %vm8860_vm11, %v8858_v31, %v16703_v2  ;;  %v16705_v53 = vld [vmem:[#allocation122_spill] sm:$0xff] }
 0x7c8   : > { %v9968_v9 = vsel %vm9952_vm6, %v9951_v52, %v9230_v45  ;;  %v8892_v4 = vsel %vm8877_vm13, %v8875_v62, %v16705_v53 }
 0x7ca   : > { %v9356_v17 = vpop.permute.xlu0 %9355 }
 0x7cb   : > { %v9294_v10 = vpop.permute.xlu1 %9293  ;;  %v10000_v3 = vsel %vm9985_vm10, %v9983_v26, %v9356_v17  ;;  %v16708_v17 = vld [vmem:[#allocation119_spill] sm:$0xff] }
 0x7cc   : > { %v10016_v28 = vsel %vm8843_vm9, %v10000_v3, %v16075_v30  ;;  %v9984_v54 = vsel %vm8826_vm8, %v9968_v9, %v9294_v10  ;;  %v16710_v3 = vld [vmem:[#allocation123_spill] sm:$0xff] }
 0x7cd   : > { %v10033_v55 = vsel %vm10018_vm12, %v10016_v28, %v9484_v5 }
 0x7ce   : > { %v10049_v30 = vsel %vm8860_vm11, %v10033_v55, %v9548_v44  ;;  %v9864_v57 = vpop.permute.xlu0 %9863 }
 0x7cf   : > { %v9358_v38 = vpop.permute.xlu1 %9357  ;;  %v10130_v5 = vsel %vm10117_vm2, %v16088_v40, %v9864_v57  ;;  %v10066_v12 = vsel %vm10051_vm15, %v10049_v30, %v9612_v13 }
 0x7d0   : > { %v10001_v45 = vsel %vm9985_vm10, %v9984_v54, %v9358_v38  ;;  %v10146_v1 = vadd.f32 %v10130_v5, %v8907_v47  ;;  %v10082_v58 = vsel %vm8877_vm13, %v10066_v12, %v9676_v33 }
 0x7d1   : > { %v10017_v44 = vsel %vm8843_vm9, %v10001_v45, %v16085_v29  ;;  %v10099_v13 = vsel %vm10084_vm1, %v10082_v58, %v16104_v36  ;;  %v8842_v29 = vsel %vm8826_vm8, %v8825_v0, %v16706_v21  ;;  %v8909_v36 = vsel %vm8894_vm14, %v8892_v4, %v16707_v8 }
 0x7d2   : > { %v10034_v40 = vsel %vm10018_vm12, %v10017_v44, %v16093_v23  ;;  %10162 = vst [vmem:[%s15173_s25 + $0xc] sm:$0x1] %v10146_v1  ;;  %v10115_v34 = vsel %vm8894_vm14, %v10099_v13, %v16108_v39  ;;  %v9868_v23 = vpop.permute.xlu0 %9867  ;;  %v8859_v35 = vsel %vm8843_vm9, %v8842_v29, %v16708_v17 }
 0x7d3   : > { %v10050_v33 = vsel %vm8860_vm11, %v10034_v40, %v16098_v56  ;;  %v9866_v7 = vpop.permute.xlu1 %9865  ;;  %v10132_v10 = vsel %vm10117_vm2, %v10115_v34, %v9868_v23  ;;  %v8876_v19 = vsel %vm8860_vm11, %v8859_v35, %v16709_v6 }
 0x7d4   : > { %v10131_v26 = vsel %vm10117_vm2, %v16096_v42, %v9866_v7  ;;  %v10067_v56 = vsel %vm10051_vm15, %v10050_v33, %v16100_v61  ;;  %v10148_v22 = vadd.f32 %v10132_v10, %v8909_v36  ;;  %v8893_v37 = vsel %vm8877_vm13, %v8876_v19, %v16710_v3 }
 0x7d5   : > { %v10147_v47 = vadd.f32 %v10131_v26, %v8908_v50  ;;  %v10083_v39 = vsel %vm8877_vm13, %v10067_v56, %v16102_v49  ;;  %v8910_v20 = vsel %vm8894_vm14, %v8893_v37, %v16711_v59 }
 0x7d6   : > { %v10100_v42 = vsel %vm10084_vm1, %v10083_v39, %v16106_v27  ;;  %10164 = vst [vmem:[%s15173_s25 + $0xe] sm:$0x1] %v10148_v22 }
 0x7d7   : > { %10163 = vst [vmem:[%s15173_s25 + $0xd] sm:$0x1] %v10147_v47  ;;  %v10116_v61 = vsel %vm8894_vm14, %v10100_v42, %v16110_v14  ;;  %v9870_v51 = vpop.permute.xlu1 %9869 }
 0x7d8   : > { %v10133_v49 = vsel %vm10117_vm2, %v10116_v61, %v9870_v51 }
 0x7d9   : > { %v10149_v24 = vadd.f32 %v10133_v49, %v8910_v20 }
 0x7db   : > { %10165 = vst [vmem:[%s15173_s25 + $0xf] sm:$0x1] %v10149_v24 }
 0x7dc PF: > { %s18_s27 = sadd.s32 1, %s12321_s27  }
 0x7dd   : > { %p15_p5 = scmp.ge.s32.totalorder %s18_s27, 4  }
 0x7df   :  { %17 = sbr.rel (!%p15_p5) target bundleno = 1 (0x1), region = 82 }

</bundles_post_ra>
